<compile_context>
chip_gen: v5e
topology: v5e:2x2
jax: 0.10.0
libtpu: 0.0.40
codegen_flags: <defaults>
</compile_context>

<pallas_src>
import functools
import math

import numpy as np

import jax
import jax.numpy as jnp
from jax.experimental import pallas as pl
from jax.experimental.pallas import tpu as pltpu

NUM_BUCKETS = 32
MAX_DISTANCE = 128
N_HEADS = 12
BIDIRECTIONAL = True

_Q_TILE_CANDIDATES = (256, 128, 64, 32, 16, 8)


def _round_up(x, m):
    return -(-x // m) * m


def _choose_tiles(qlen, klen):
    """Pick (tq, qlen_pad, tk, klen_pad): lane-dense, capped, padded tiles."""
    # q tile: multiple of 8, capped at 256 (never the raw full dimension).
    qlen_pad = _round_up(qlen, 8)
    tq = next(c for c in _Q_TILE_CANDIDATES if qlen_pad % c == 0)
    if tq < 64 and qlen_pad > 256:
        # Awkward long qlen: pad up rather than running many tiny q tiles.
        tq = 128
        qlen_pad = _round_up(qlen_pad, tq)
    # k tile: lane-dense (multiple of 128) once klen >= 128, capped at 256.
    if klen < 128:
        tk, klen_pad = klen, klen
    else:
        klen_pad = _round_up(klen, 128)
        tk = 256 if klen_pad % 256 == 0 else 128
    # v7x has 2 TensorCores sharing the grid: avoid a 1x1 grid when splittable.
    if (qlen_pad // tq) * (klen_pad // tk) == 1:
        if tq >= 16:
            tq //= 2
        elif tk == 256:
            tk = 128
    return tq, qlen_pad, tk, klen_pad


def _bias_kernel(step_ref, w_ref, o_ref, *, tq, tk, n_heads,
                 bidirectional, num_buckets, max_distance):
    """One (q, k) output tile of the bias for ALL heads.

    step_ref: SMEM (1,) int32                      -- decode step offset
    w_ref:    SMEM (num_buckets, n_heads) float32  -- embedding table
    o_ref:    VMEM (n_heads, tq, tk) out_dtype     -- bias tile, head-major
    """
    qi = pl.program_id(0)
    ki = pl.program_id(1)
    step = step_ref[0]
    q_base = qi * tq + step    # global (step-shifted) query offset of this tile
    k_base = ki * tk           # global key offset of this tile

    # Hoist all embedding scalars out of the row-group loop (review #10):
    # num_buckets * n_heads SMEM reads once per grid step.
    w = [[w_ref[b, h] for h in range(n_heads)] for b in range(num_buckets)]

    nb = num_buckets // 2 if bidirectional else num_buckets
    max_exact = nb // 2

    def row_group(g, carry):
        row0 = pl.multiple_of(g * 8, 8)

        # relative_position = memory - context ; n = -relative_position
        ctx = q_base + row0 + jax.lax.broadcasted_iota(jnp.int32, (8, tk), 0)
        mem = k_base + jax.lax.broadcasted_iota(jnp.int32, (8, tk), 1)
        n = ctx - mem

        # ---- head-invariant bucket map for this (8, tk) row group ----
        if bidirectional:
            ret = (n < 0).astype(jnp.int32) * nb
            n_abs = jnp.abs(n)
        else:
            ret = jnp.zeros((8, tk), jnp.int32)
            n_abs = jnp.maximum(n, 0)
        is_small = n_abs < max_exact
        # Clamp before the log so masked-out small positions don't produce -inf.
        n_f = jnp.maximum(n_abs, max_exact).astype(jnp.float32)
        val_if_large = max_exact + (
            jnp.log(n_f / float(max_exact)) / math.log(max_distance / max_exact)
            * (nb - max_exact)
        ).astype(jnp.int32)   # trunc-toward-zero == torch .to(long) for values >= 0
        val_if_large = jnp.minimum(val_if_large, nb - 1)
        bucket = ret + jnp.where(is_small, n_abs, val_if_large)

        # ---- gather-free embedding lookup: select chain, one live mask at a time.
        # Working set: 12 accumulators (24 vregs @ tk=256) + bucket + current mask;
        # the full 31-mask set is never materialized (review #1 spill fix).
        accs = [jnp.full((8, tk), w[0][h], dtype=jnp.float32)
                for h in range(n_heads)]
        for b in range(1, num_buckets):
            mask = bucket == b
            wb = w[b]
            for h in range(n_heads):
                accs[h] = jnp.where(mask, wb[h], accs[h])

        # Lane-dense, sublane-aligned stores (row0 is a multiple of 8).
        for h in range(n_heads):
            o_ref[h, pl.ds(row0, 8), :] = accs[h].astype(o_ref.dtype)
        return carry

    # Rolled loop: bounds live ranges to one row group (avoids the vreg spill the
    # rev-2 kernel suffered when all masks were precomputed for the whole tile).
    jax.lax.fori_loop(0, tq // 8, row_group, 0)


def compute_bias(weight, qlen, klen, step=0, *, bidirectional=BIDIRECTIONAL,
                 num_buckets=NUM_BUCKETS, max_distance=MAX_DISTANCE,
                 out_dtype=None):
    """Returns the bias as [n_heads, qlen, klen] (dtype follows `weight` by default)."""
    nb_w, n_heads = weight.shape
    assert nb_w == num_buckets
    out_dtype = weight.dtype if out_dtype is None else out_dtype

    tq, qlen_pad, tk, klen_pad = _choose_tiles(qlen, klen)

    step_arr = jnp.asarray([step], dtype=jnp.int32)
    kernel = functools.partial(
        _bias_kernel, tq=tq, tk=tk, n_heads=n_heads,
        bidirectional=bidirectional, num_buckets=num_buckets,
        max_distance=max_distance)

    out = pl.pallas_call(
        kernel,
        out_shape=jax.ShapeDtypeStruct((n_heads, qlen_pad, klen_pad), out_dtype),
        grid=(qlen_pad // tq, klen_pad // tk),
        in_specs=[
            pl.BlockSpec(memory_space=pltpu.SMEM),   # step (scalar)
            pl.BlockSpec(memory_space=pltpu.SMEM),   # embedding table (small)
        ],
        out_specs=pl.BlockSpec((n_heads, tq, tk), lambda qi, ki: (0, qi, ki)),
        compiler_params=pltpu.CompilerParams(
            dimension_semantics=("parallel", "parallel")),
    )(step_arr, weight.astype(jnp.float32))

    if (qlen_pad, klen_pad) != (qlen, klen):
        out = out[:, :qlen, :klen]
    return out


def relative_position_bias_forward(weight, batch_size, qlen, klen, step=None, *,
                                   bidirectional=BIDIRECTIONAL,
                                   num_buckets=NUM_BUCKETS,
                                   max_distance=MAX_DISTANCE,
                                   out_dtype=None):
    """Mirrors RelativePositionBias.forward -> (batch_size * n_heads, qlen, klen).

    NOTE: the batch repeat writes B identical copies of an H*Q*K tensor to HBM only
    to match the PyTorch contract.  Consumers that can broadcast over batch (or
    fuse the bias addition into the attention kernel) should use compute_bias().
    """
    step = 0 if step is None else step
    values = compute_bias(weight, qlen, klen, step,
                          bidirectional=bidirectional,
                          num_buckets=num_buckets,
                          max_distance=max_distance,
                          out_dtype=out_dtype)               # [H, q, k]
    n_heads = values.shape[0]
    values = jnp.broadcast_to(values[None], (batch_size, n_heads, qlen, klen))
    return values.reshape(-1, qlen, klen)


# ----------------------------- reference & tests -----------------------------

def _reference(weight, batch_size, qlen, klen, step=0, *,
               bidirectional=BIDIRECTIONAL, num_buckets=NUM_BUCKETS,
               max_distance=MAX_DISTANCE):
    """Pure-JAX reference matching the PyTorch module exactly."""
    ctx = step + jnp.arange(qlen, dtype=jnp.int32)[:, None]
    mem = jnp.arange(klen, dtype=jnp.int32)[None, :]
    n = ctx - mem
    ret = jnp.zeros_like(n)
    nb = num_buckets
    if bidirectional:
        nb //= 2
        ret = ret + (n < 0).astype(jnp.int32) * nb
        n = jnp.abs(n)
    else:
        n = jnp.maximum(n, 0)
    max_exact = nb // 2
    is_small = n < max_exact
    nf = jnp.maximum(n, max_exact).astype(jnp.float32)
    vil = max_exact + (jnp.log(nf / float(max_exact)) /
                       math.log(max_distance / max_exact) *
                       (nb - max_exact)).astype(jnp.int32)
    vil = jnp.minimum(vil, nb - 1)
    bucket = ret + jnp.where(is_small, n, vil)
    values = weight[bucket]                       # [q, k, H]
    values = jnp.transpose(values, (2, 0, 1))[None]
    values = jnp.broadcast_to(values, (batch_size,) + values.shape[1:])
    return values.reshape(-1, qlen, klen)


def _bucket_boundary_mask(qlen, klen, step, *, bidirectional=BIDIRECTIONAL,
                          num_buckets=NUM_BUCKETS, max_distance=MAX_DISTANCE):
    """(q, k) positions where the exact log-bucket value is an integer below the
    clamp; there a 1-ulp difference between the kernel's and XLA's f32 log() can
    legally flip the bucket (reviewer correctness concern), so they are excluded
    from the exact comparison.  For the default config that is |n| in {8,16,32,64}."""
    ctx = step + np.arange(qlen, dtype=np.int64)[:, None]
    mem = np.arange(klen, dtype=np.int64)[None, :]
    n = ctx - mem
    nb = num_buckets // 2 if bidirectional else num_buckets
    n_abs = np.abs(n) if bidirectional else np.maximum(n, 0)
    me = nb // 2
    val = (np.log(np.maximum(n_abs, me) / me) / math.log(max_distance / me)
           * (nb - me))
    near_int = np.abs(val - np.rint(val)) < 1e-4
    large = n_abs >= me
    below_clamp = np.rint(val) < (nb - me)
    return near_int & large & below_clamp


def _check(weight, batch_size, qlen, klen, step):
    out = relative_position_bias_forward(weight, batch_size, qlen, klen, step)
    out = jax.block_until_ready(out)
    assert out.shape == (batch_size * weight.shape[1], qlen, klen), out.shape
    assert out.dtype == weight.dtype, (out.dtype, weight.dtype)
    ref = _reference(weight, batch_size, qlen, klen, step)
    ok = ~_bucket_boundary_mask(qlen, klen, step)
    o = np.asarray(jnp.asarray(out, jnp.float32))
    r = np.asarray(jnp.asarray(ref, jnp.float32))
    assert np.allclose(o[:, ok], r[:, ok], atol=1e-6, rtol=0), (
        f"mismatch vs reference (q={qlen}, k={klen}, step={step})")


if __name__ == "__main__":
    key = jax.random.PRNGKey(0)
    # nn.Embedding(num_buckets, n_heads) default init: N(0, 1)
    weight = jax.random.normal(key, (NUM_BUCKETS, N_HEADS), dtype=jnp.float32)

    # Test 1: original small decode-style config (single tile, step offset).
    _check(weight, batch_size=2, qlen=8, klen=8, step=3)

    # Test 2: wide relative-position sweep (|n| up to ~4*max_distance and beyond)
    # across a multi-tile grid and several in-kernel row groups.
    _check(weight, batch_size=2, qlen=64, klen=1024, step=512)

    # Test 3: non-multiple shapes -> padded tiles + crop, plus the >=2-tile split.
    _check(weight, batch_size=2, qlen=10, klen=200, step=0)

    # Test 4: bf16 weights -> bias dtype follows the parameter dtype
    # (f32 accumulation in-kernel, cast at the store).
    _check(weight.astype(jnp.bfloat16), batch_size=2, qlen=8, klen=8, step=0)

    print("KERNEL_OK")
</pallas_src>

<mosaic_0001>
module attributes {stable_mosaic.version = 11 : i64} {
  func.func @_bias_kernel(%arg0: i32, %arg1: i32, %arg2: memref<1xi32, #tpu.memory_space<smem>>, %arg3: memref<32x12xf32, #tpu.memory_space<smem>>, %arg4: memref<12x8x8xf32, #tpu.memory_space<vmem>>) attributes {dimension_semantics = [#tpu.dimension_semantics<parallel>, #tpu.dimension_semantics<parallel>], iteration_bounds = array<i64: 1, 1>, scalar_prefetch = 0 : i64, scratch_operands = 0 : i64, tpu.core_type = #tpu.core_type<tc>, window_params = [{transform_indices = @transform_0, window_bounds = array<i64: 1>}, {transform_indices = @transform_1, window_bounds = array<i64: 32, 12>}, {transform_indices = @transform_2, window_bounds = array<i64: 12, 8, 8>}]} {
    %c0 = arith.constant 0 : index
    %0 = memref.load %arg2[%c0] : memref<1xi32, #tpu.memory_space<smem>>
    %c8_i32 = arith.constant 8 : i32
    %1 = arith.muli %arg0, %c8_i32 : i32
    %2 = arith.addi %1, %0 : i32
    %c8_i32_0 = arith.constant 8 : i32
    %3 = arith.muli %arg1, %c8_i32_0 : i32
    %c0_1 = arith.constant 0 : index
    %c0_2 = arith.constant 0 : index
    %4 = memref.load %arg3[%c0_1, %c0_2] : memref<32x12xf32, #tpu.memory_space<smem>>
    %c0_3 = arith.constant 0 : index
    %c1 = arith.constant 1 : index
    %5 = memref.load %arg3[%c0_3, %c1] : memref<32x12xf32, #tpu.memory_space<smem>>
    %c0_4 = arith.constant 0 : index
    %c2 = arith.constant 2 : index
    %6 = memref.load %arg3[%c0_4, %c2] : memref<32x12xf32, #tpu.memory_space<smem>>
    %c0_5 = arith.constant 0 : index
    %c3 = arith.constant 3 : index
    %7 = memref.load %arg3[%c0_5, %c3] : memref<32x12xf32, #tpu.memory_space<smem>>
    %c0_6 = arith.constant 0 : index
    %c4 = arith.constant 4 : index
    %8 = memref.load %arg3[%c0_6, %c4] : memref<32x12xf32, #tpu.memory_space<smem>>
    %c0_7 = arith.constant 0 : index
    %c5 = arith.constant 5 : index
    %9 = memref.load %arg3[%c0_7, %c5] : memref<32x12xf32, #tpu.memory_space<smem>>
    %c0_8 = arith.constant 0 : index
    %c6 = arith.constant 6 : index
    %10 = memref.load %arg3[%c0_8, %c6] : memref<32x12xf32, #tpu.memory_space<smem>>
    %c0_9 = arith.constant 0 : index
    %c7 = arith.constant 7 : index
    %11 = memref.load %arg3[%c0_9, %c7] : memref<32x12xf32, #tpu.memory_space<smem>>
    %c0_10 = arith.constant 0 : index
    %c8 = arith.constant 8 : index
    %12 = memref.load %arg3[%c0_10, %c8] : memref<32x12xf32, #tpu.memory_space<smem>>
    %c0_11 = arith.constant 0 : index
    %c9 = arith.constant 9 : index
    %13 = memref.load %arg3[%c0_11, %c9] : memref<32x12xf32, #tpu.memory_space<smem>>
    %c0_12 = arith.constant 0 : index
    %c10 = arith.constant 10 : index
    %14 = memref.load %arg3[%c0_12, %c10] : memref<32x12xf32, #tpu.memory_space<smem>>
    %c0_13 = arith.constant 0 : index
    %c11 = arith.constant 11 : index
    %15 = memref.load %arg3[%c0_13, %c11] : memref<32x12xf32, #tpu.memory_space<smem>>
    %c1_14 = arith.constant 1 : index
    %c0_15 = arith.constant 0 : index
    %16 = memref.load %arg3[%c1_14, %c0_15] : memref<32x12xf32, #tpu.memory_space<smem>>
    %c1_16 = arith.constant 1 : index
    %c1_17 = arith.constant 1 : index
    %17 = memref.load %arg3[%c1_16, %c1_17] : memref<32x12xf32, #tpu.memory_space<smem>>
    %c1_18 = arith.constant 1 : index
    %c2_19 = arith.constant 2 : index
    %18 = memref.load %arg3[%c1_18, %c2_19] : memref<32x12xf32, #tpu.memory_space<smem>>
    %c1_20 = arith.constant 1 : index
    %c3_21 = arith.constant 3 : index
    %19 = memref.load %arg3[%c1_20, %c3_21] : memref<32x12xf32, #tpu.memory_space<smem>>
    %c1_22 = arith.constant 1 : index
    %c4_23 = arith.constant 4 : index
    %20 = memref.load %arg3[%c1_22, %c4_23] : memref<32x12xf32, #tpu.memory_space<smem>>
    %c1_24 = arith.constant 1 : index
    %c5_25 = arith.constant 5 : index
    %21 = memref.load %arg3[%c1_24, %c5_25] : memref<32x12xf32, #tpu.memory_space<smem>>
    %c1_26 = arith.constant 1 : index
    %c6_27 = arith.constant 6 : index
    %22 = memref.load %arg3[%c1_26, %c6_27] : memref<32x12xf32, #tpu.memory_space<smem>>
    %c1_28 = arith.constant 1 : index
    %c7_29 = arith.constant 7 : index
    %23 = memref.load %arg3[%c1_28, %c7_29] : memref<32x12xf32, #tpu.memory_space<smem>>
    %c1_30 = arith.constant 1 : index
    %c8_31 = arith.constant 8 : index
    %24 = memref.load %arg3[%c1_30, %c8_31] : memref<32x12xf32, #tpu.memory_space<smem>>
    %c1_32 = arith.constant 1 : index
    %c9_33 = arith.constant 9 : index
    %25 = memref.load %arg3[%c1_32, %c9_33] : memref<32x12xf32, #tpu.memory_space<smem>>
    %c1_34 = arith.constant 1 : index
    %c10_35 = arith.constant 10 : index
    %26 = memref.load %arg3[%c1_34, %c10_35] : memref<32x12xf32, #tpu.memory_space<smem>>
    %c1_36 = arith.constant 1 : index
    %c11_37 = arith.constant 11 : index
    %27 = memref.load %arg3[%c1_36, %c11_37] : memref<32x12xf32, #tpu.memory_space<smem>>
    %c2_38 = arith.constant 2 : index
    %c0_39 = arith.constant 0 : index
    %28 = memref.load %arg3[%c2_38, %c0_39] : memref<32x12xf32, #tpu.memory_space<smem>>
    %c2_40 = arith.constant 2 : index
    %c1_41 = arith.constant 1 : index
    %29 = memref.load %arg3[%c2_40, %c1_41] : memref<32x12xf32, #tpu.memory_space<smem>>
    %c2_42 = arith.constant 2 : index
    %c2_43 = arith.constant 2 : index
    %30 = memref.load %arg3[%c2_42, %c2_43] : memref<32x12xf32, #tpu.memory_space<smem>>
    %c2_44 = arith.constant 2 : index
    %c3_45 = arith.constant 3 : index
    %31 = memref.load %arg3[%c2_44, %c3_45] : memref<32x12xf32, #tpu.memory_space<smem>>
    %c2_46 = arith.constant 2 : index
    %c4_47 = arith.constant 4 : index
    %32 = memref.load %arg3[%c2_46, %c4_47] : memref<32x12xf32, #tpu.memory_space<smem>>
    %c2_48 = arith.constant 2 : index
    %c5_49 = arith.constant 5 : index
    %33 = memref.load %arg3[%c2_48, %c5_49] : memref<32x12xf32, #tpu.memory_space<smem>>
    %c2_50 = arith.constant 2 : index
    %c6_51 = arith.constant 6 : index
    %34 = memref.load %arg3[%c2_50, %c6_51] : memref<32x12xf32, #tpu.memory_space<smem>>
    %c2_52 = arith.constant 2 : index
    %c7_53 = arith.constant 7 : index
    %35 = memref.load %arg3[%c2_52, %c7_53] : memref<32x12xf32, #tpu.memory_space<smem>>
    %c2_54 = arith.constant 2 : index
    %c8_55 = arith.constant 8 : index
    %36 = memref.load %arg3[%c2_54, %c8_55] : memref<32x12xf32, #tpu.memory_space<smem>>
    %c2_56 = arith.constant 2 : index
    %c9_57 = arith.constant 9 : index
    %37 = memref.load %arg3[%c2_56, %c9_57] : memref<32x12xf32, #tpu.memory_space<smem>>
    %c2_58 = arith.constant 2 : index
    %c10_59 = arith.constant 10 : index
    %38 = memref.load %arg3[%c2_58, %c10_59] : memref<32x12xf32, #tpu.memory_space<smem>>
    %c2_60 = arith.constant 2 : index
    %c11_61 = arith.constant 11 : index
    %39 = memref.load %arg3[%c2_60, %c11_61] : memref<32x12xf32, #tpu.memory_space<smem>>
    %c3_62 = arith.constant 3 : index
    %c0_63 = arith.constant 0 : index
    %40 = memref.load %arg3[%c3_62, %c0_63] : memref<32x12xf32, #tpu.memory_space<smem>>
    %c3_64 = arith.constant 3 : index
    %c1_65 = arith.constant 1 : index
    %41 = memref.load %arg3[%c3_64, %c1_65] : memref<32x12xf32, #tpu.memory_space<smem>>
    %c3_66 = arith.constant 3 : index
    %c2_67 = arith.constant 2 : index
    %42 = memref.load %arg3[%c3_66, %c2_67] : memref<32x12xf32, #tpu.memory_space<smem>>
    %c3_68 = arith.constant 3 : index
    %c3_69 = arith.constant 3 : index
    %43 = memref.load %arg3[%c3_68, %c3_69] : memref<32x12xf32, #tpu.memory_space<smem>>
    %c3_70 = arith.constant 3 : index
    %c4_71 = arith.constant 4 : index
    %44 = memref.load %arg3[%c3_70, %c4_71] : memref<32x12xf32, #tpu.memory_space<smem>>
    %c3_72 = arith.constant 3 : index
    %c5_73 = arith.constant 5 : index
    %45 = memref.load %arg3[%c3_72, %c5_73] : memref<32x12xf32, #tpu.memory_space<smem>>
    %c3_74 = arith.constant 3 : index
    %c6_75 = arith.constant 6 : index
    %46 = memref.load %arg3[%c3_74, %c6_75] : memref<32x12xf32, #tpu.memory_space<smem>>
    %c3_76 = arith.constant 3 : index
    %c7_77 = arith.constant 7 : index
    %47 = memref.load %arg3[%c3_76, %c7_77] : memref<32x12xf32, #tpu.memory_space<smem>>
    %c3_78 = arith.constant 3 : index
    %c8_79 = arith.constant 8 : index
    %48 = memref.load %arg3[%c3_78, %c8_79] : memref<32x12xf32, #tpu.memory_space<smem>>
    %c3_80 = arith.constant 3 : index
    %c9_81 = arith.constant 9 : index
    %49 = memref.load %arg3[%c3_80, %c9_81] : memref<32x12xf32, #tpu.memory_space<smem>>
    %c3_82 = arith.constant 3 : index
    %c10_83 = arith.constant 10 : index
    %50 = memref.load %arg3[%c3_82, %c10_83] : memref<32x12xf32, #tpu.memory_space<smem>>
    %c3_84 = arith.constant 3 : index
    %c11_85 = arith.constant 11 : index
    %51 = memref.load %arg3[%c3_84, %c11_85] : memref<32x12xf32, #tpu.memory_space<smem>>
    %c4_86 = arith.constant 4 : index
    %c0_87 = arith.constant 0 : index
    %52 = memref.load %arg3[%c4_86, %c0_87] : memref<32x12xf32, #tpu.memory_space<smem>>
    %c4_88 = arith.constant 4 : index
    %c1_89 = arith.constant 1 : index
    %53 = memref.load %arg3[%c4_88, %c1_89] : memref<32x12xf32, #tpu.memory_space<smem>>
    %c4_90 = arith.constant 4 : index
    %c2_91 = arith.constant 2 : index
    %54 = memref.load %arg3[%c4_90, %c2_91] : memref<32x12xf32, #tpu.memory_space<smem>>
    %c4_92 = arith.constant 4 : index
    %c3_93 = arith.constant 3 : index
    %55 = memref.load %arg3[%c4_92, %c3_93] : memref<32x12xf32, #tpu.memory_space<smem>>
    %c4_94 = arith.constant 4 : index
    %c4_95 = arith.constant 4 : index
    %56 = memref.load %arg3[%c4_94, %c4_95] : memref<32x12xf32, #tpu.memory_space<smem>>
    %c4_96 = arith.constant 4 : index
    %c5_97 = arith.constant 5 : index
    %57 = memref.load %arg3[%c4_96, %c5_97] : memref<32x12xf32, #tpu.memory_space<smem>>
    %c4_98 = arith.constant 4 : index
    %c6_99 = arith.constant 6 : index
    %58 = memref.load %arg3[%c4_98, %c6_99] : memref<32x12xf32, #tpu.memory_space<smem>>
    %c4_100 = arith.constant 4 : index
    %c7_101 = arith.constant 7 : index
    %59 = memref.load %arg3[%c4_100, %c7_101] : memref<32x12xf32, #tpu.memory_space<smem>>
    %c4_102 = arith.constant 4 : index
    %c8_103 = arith.constant 8 : index
    %60 = memref.load %arg3[%c4_102, %c8_103] : memref<32x12xf32, #tpu.memory_space<smem>>
    %c4_104 = arith.constant 4 : index
    %c9_105 = arith.constant 9 : index
    %61 = memref.load %arg3[%c4_104, %c9_105] : memref<32x12xf32, #tpu.memory_space<smem>>
    %c4_106 = arith.constant 4 : index
    %c10_107 = arith.constant 10 : index
    %62 = memref.load %arg3[%c4_106, %c10_107] : memref<32x12xf32, #tpu.memory_space<smem>>
    %c4_108 = arith.constant 4 : index
    %c11_109 = arith.constant 11 : index
    %63 = memref.load %arg3[%c4_108, %c11_109] : memref<32x12xf32, #tpu.memory_space<smem>>
    %c5_110 = arith.constant 5 : index
    %c0_111 = arith.constant 0 : index
    %64 = memref.load %arg3[%c5_110, %c0_111] : memref<32x12xf32, #tpu.memory_space<smem>>
    %c5_112 = arith.constant 5 : index
    %c1_113 = arith.constant 1 : index
    %65 = memref.load %arg3[%c5_112, %c1_113] : memref<32x12xf32, #tpu.memory_space<smem>>
    %c5_114 = arith.constant 5 : index
    %c2_115 = arith.constant 2 : index
    %66 = memref.load %arg3[%c5_114, %c2_115] : memref<32x12xf32, #tpu.memory_space<smem>>
    %c5_116 = arith.constant 5 : index
    %c3_117 = arith.constant 3 : index
    %67 = memref.load %arg3[%c5_116, %c3_117] : memref<32x12xf32, #tpu.memory_space<smem>>
    %c5_118 = arith.constant 5 : index
    %c4_119 = arith.constant 4 : index
    %68 = memref.load %arg3[%c5_118, %c4_119] : memref<32x12xf32, #tpu.memory_space<smem>>
    %c5_120 = arith.constant 5 : index
    %c5_121 = arith.constant 5 : index
    %69 = memref.load %arg3[%c5_120, %c5_121] : memref<32x12xf32, #tpu.memory_space<smem>>
    %c5_122 = arith.constant 5 : index
    %c6_123 = arith.constant 6 : index
    %70 = memref.load %arg3[%c5_122, %c6_123] : memref<32x12xf32, #tpu.memory_space<smem>>
    %c5_124 = arith.constant 5 : index
    %c7_125 = arith.constant 7 : index
    %71 = memref.load %arg3[%c5_124, %c7_125] : memref<32x12xf32, #tpu.memory_space<smem>>
    %c5_126 = arith.constant 5 : index
    %c8_127 = arith.constant 8 : index
    %72 = memref.load %arg3[%c5_126, %c8_127] : memref<32x12xf32, #tpu.memory_space<smem>>
    %c5_128 = arith.constant 5 : index
    %c9_129 = arith.constant 9 : index
    %73 = memref.load %arg3[%c5_128, %c9_129] : memref<32x12xf32, #tpu.memory_space<smem>>
    %c5_130 = arith.constant 5 : index
    %c10_131 = arith.constant 10 : index
    %74 = memref.load %arg3[%c5_130, %c10_131] : memref<32x12xf32, #tpu.memory_space<smem>>
    %c5_132 = arith.constant 5 : index
    %c11_133 = arith.constant 11 : index
    %75 = memref.load %arg3[%c5_132, %c11_133] : memref<32x12xf32, #tpu.memory_space<smem>>
    %c6_134 = arith.constant 6 : index
    %c0_135 = arith.constant 0 : index
    %76 = memref.load %arg3[%c6_134, %c0_135] : memref<32x12xf32, #tpu.memory_space<smem>>
    %c6_136 = arith.constant 6 : index
    %c1_137 = arith.constant 1 : index
    %77 = memref.load %arg3[%c6_136, %c1_137] : memref<32x12xf32, #tpu.memory_space<smem>>
    %c6_138 = arith.constant 6 : index
    %c2_139 = arith.constant 2 : index
    %78 = memref.load %arg3[%c6_138, %c2_139] : memref<32x12xf32, #tpu.memory_space<smem>>
    %c6_140 = arith.constant 6 : index
    %c3_141 = arith.constant 3 : index
    %79 = memref.load %arg3[%c6_140, %c3_141] : memref<32x12xf32, #tpu.memory_space<smem>>
    %c6_142 = arith.constant 6 : index
    %c4_143 = arith.constant 4 : index
    %80 = memref.load %arg3[%c6_142, %c4_143] : memref<32x12xf32, #tpu.memory_space<smem>>
    %c6_144 = arith.constant 6 : index
    %c5_145 = arith.constant 5 : index
    %81 = memref.load %arg3[%c6_144, %c5_145] : memref<32x12xf32, #tpu.memory_space<smem>>
    %c6_146 = arith.constant 6 : index
    %c6_147 = arith.constant 6 : index
    %82 = memref.load %arg3[%c6_146, %c6_147] : memref<32x12xf32, #tpu.memory_space<smem>>
    %c6_148 = arith.constant 6 : index
    %c7_149 = arith.constant 7 : index
    %83 = memref.load %arg3[%c6_148, %c7_149] : memref<32x12xf32, #tpu.memory_space<smem>>
    %c6_150 = arith.constant 6 : index
    %c8_151 = arith.constant 8 : index
    %84 = memref.load %arg3[%c6_150, %c8_151] : memref<32x12xf32, #tpu.memory_space<smem>>
    %c6_152 = arith.constant 6 : index
    %c9_153 = arith.constant 9 : index
    %85 = memref.load %arg3[%c6_152, %c9_153] : memref<32x12xf32, #tpu.memory_space<smem>>
    %c6_154 = arith.constant 6 : index
    %c10_155 = arith.constant 10 : index
    %86 = memref.load %arg3[%c6_154, %c10_155] : memref<32x12xf32, #tpu.memory_space<smem>>
    %c6_156 = arith.constant 6 : index
    %c11_157 = arith.constant 11 : index
    %87 = memref.load %arg3[%c6_156, %c11_157] : memref<32x12xf32, #tpu.memory_space<smem>>
    %c7_158 = arith.constant 7 : index
    %c0_159 = arith.constant 0 : index
    %88 = memref.load %arg3[%c7_158, %c0_159] : memref<32x12xf32, #tpu.memory_space<smem>>
    %c7_160 = arith.constant 7 : index
    %c1_161 = arith.constant 1 : index
    %89 = memref.load %arg3[%c7_160, %c1_161] : memref<32x12xf32, #tpu.memory_space<smem>>
    %c7_162 = arith.constant 7 : index
    %c2_163 = arith.constant 2 : index
    %90 = memref.load %arg3[%c7_162, %c2_163] : memref<32x12xf32, #tpu.memory_space<smem>>
    %c7_164 = arith.constant 7 : index
    %c3_165 = arith.constant 3 : index
    %91 = memref.load %arg3[%c7_164, %c3_165] : memref<32x12xf32, #tpu.memory_space<smem>>
    %c7_166 = arith.constant 7 : index
    %c4_167 = arith.constant 4 : index
    %92 = memref.load %arg3[%c7_166, %c4_167] : memref<32x12xf32, #tpu.memory_space<smem>>
    %c7_168 = arith.constant 7 : index
    %c5_169 = arith.constant 5 : index
    %93 = memref.load %arg3[%c7_168, %c5_169] : memref<32x12xf32, #tpu.memory_space<smem>>
    %c7_170 = arith.constant 7 : index
    %c6_171 = arith.constant 6 : index
    %94 = memref.load %arg3[%c7_170, %c6_171] : memref<32x12xf32, #tpu.memory_space<smem>>
    %c7_172 = arith.constant 7 : index
    %c7_173 = arith.constant 7 : index
    %95 = memref.load %arg3[%c7_172, %c7_173] : memref<32x12xf32, #tpu.memory_space<smem>>
    %c7_174 = arith.constant 7 : index
    %c8_175 = arith.constant 8 : index
    %96 = memref.load %arg3[%c7_174, %c8_175] : memref<32x12xf32, #tpu.memory_space<smem>>
    %c7_176 = arith.constant 7 : index
    %c9_177 = arith.constant 9 : index
    %97 = memref.load %arg3[%c7_176, %c9_177] : memref<32x12xf32, #tpu.memory_space<smem>>
    %c7_178 = arith.constant 7 : index
    %c10_179 = arith.constant 10 : index
    %98 = memref.load %arg3[%c7_178, %c10_179] : memref<32x12xf32, #tpu.memory_space<smem>>
    %c7_180 = arith.constant 7 : index
    %c11_181 = arith.constant 11 : index
    %99 = memref.load %arg3[%c7_180, %c11_181] : memref<32x12xf32, #tpu.memory_space<smem>>
    %c8_182 = arith.constant 8 : index
    %c0_183 = arith.constant 0 : index
    %100 = memref.load %arg3[%c8_182, %c0_183] : memref<32x12xf32, #tpu.memory_space<smem>>
    %c8_184 = arith.constant 8 : index
    %c1_185 = arith.constant 1 : index
    %101 = memref.load %arg3[%c8_184, %c1_185] : memref<32x12xf32, #tpu.memory_space<smem>>
    %c8_186 = arith.constant 8 : index
    %c2_187 = arith.constant 2 : index
    %102 = memref.load %arg3[%c8_186, %c2_187] : memref<32x12xf32, #tpu.memory_space<smem>>
    %c8_188 = arith.constant 8 : index
    %c3_189 = arith.constant 3 : index
    %103 = memref.load %arg3[%c8_188, %c3_189] : memref<32x12xf32, #tpu.memory_space<smem>>
    %c8_190 = arith.constant 8 : index
    %c4_191 = arith.constant 4 : index
    %104 = memref.load %arg3[%c8_190, %c4_191] : memref<32x12xf32, #tpu.memory_space<smem>>
    %c8_192 = arith.constant 8 : index
    %c5_193 = arith.constant 5 : index
    %105 = memref.load %arg3[%c8_192, %c5_193] : memref<32x12xf32, #tpu.memory_space<smem>>
    %c8_194 = arith.constant 8 : index
    %c6_195 = arith.constant 6 : index
    %106 = memref.load %arg3[%c8_194, %c6_195] : memref<32x12xf32, #tpu.memory_space<smem>>
    %c8_196 = arith.constant 8 : index
    %c7_197 = arith.constant 7 : index
    %107 = memref.load %arg3[%c8_196, %c7_197] : memref<32x12xf32, #tpu.memory_space<smem>>
    %c8_198 = arith.constant 8 : index
    %c8_199 = arith.constant 8 : index
    %108 = memref.load %arg3[%c8_198, %c8_199] : memref<32x12xf32, #tpu.memory_space<smem>>
    %c8_200 = arith.constant 8 : index
    %c9_201 = arith.constant 9 : index
    %109 = memref.load %arg3[%c8_200, %c9_201] : memref<32x12xf32, #tpu.memory_space<smem>>
    %c8_202 = arith.constant 8 : index
    %c10_203 = arith.constant 10 : index
    %110 = memref.load %arg3[%c8_202, %c10_203] : memref<32x12xf32, #tpu.memory_space<smem>>
    %c8_204 = arith.constant 8 : index
    %c11_205 = arith.constant 11 : index
    %111 = memref.load %arg3[%c8_204, %c11_205] : memref<32x12xf32, #tpu.memory_space<smem>>
    %c9_206 = arith.constant 9 : index
    %c0_207 = arith.constant 0 : index
    %112 = memref.load %arg3[%c9_206, %c0_207] : memref<32x12xf32, #tpu.memory_space<smem>>
    %c9_208 = arith.constant 9 : index
    %c1_209 = arith.constant 1 : index
    %113 = memref.load %arg3[%c9_208, %c1_209] : memref<32x12xf32, #tpu.memory_space<smem>>
    %c9_210 = arith.constant 9 : index
    %c2_211 = arith.constant 2 : index
    %114 = memref.load %arg3[%c9_210, %c2_211] : memref<32x12xf32, #tpu.memory_space<smem>>
    %c9_212 = arith.constant 9 : index
    %c3_213 = arith.constant 3 : index
    %115 = memref.load %arg3[%c9_212, %c3_213] : memref<32x12xf32, #tpu.memory_space<smem>>
    %c9_214 = arith.constant 9 : index
    %c4_215 = arith.constant 4 : index
    %116 = memref.load %arg3[%c9_214, %c4_215] : memref<32x12xf32, #tpu.memory_space<smem>>
    %c9_216 = arith.constant 9 : index
    %c5_217 = arith.constant 5 : index
    %117 = memref.load %arg3[%c9_216, %c5_217] : memref<32x12xf32, #tpu.memory_space<smem>>
    %c9_218 = arith.constant 9 : index
    %c6_219 = arith.constant 6 : index
    %118 = memref.load %arg3[%c9_218, %c6_219] : memref<32x12xf32, #tpu.memory_space<smem>>
    %c9_220 = arith.constant 9 : index
    %c7_221 = arith.constant 7 : index
    %119 = memref.load %arg3[%c9_220, %c7_221] : memref<32x12xf32, #tpu.memory_space<smem>>
    %c9_222 = arith.constant 9 : index
    %c8_223 = arith.constant 8 : index
    %120 = memref.load %arg3[%c9_222, %c8_223] : memref<32x12xf32, #tpu.memory_space<smem>>
    %c9_224 = arith.constant 9 : index
    %c9_225 = arith.constant 9 : index
    %121 = memref.load %arg3[%c9_224, %c9_225] : memref<32x12xf32, #tpu.memory_space<smem>>
    %c9_226 = arith.constant 9 : index
    %c10_227 = arith.constant 10 : index
    %122 = memref.load %arg3[%c9_226, %c10_227] : memref<32x12xf32, #tpu.memory_space<smem>>
    %c9_228 = arith.constant 9 : index
    %c11_229 = arith.constant 11 : index
    %123 = memref.load %arg3[%c9_228, %c11_229] : memref<32x12xf32, #tpu.memory_space<smem>>
    %c10_230 = arith.constant 10 : index
    %c0_231 = arith.constant 0 : index
    %124 = memref.load %arg3[%c10_230, %c0_231] : memref<32x12xf32, #tpu.memory_space<smem>>
    %c10_232 = arith.constant 10 : index
    %c1_233 = arith.constant 1 : index
    %125 = memref.load %arg3[%c10_232, %c1_233] : memref<32x12xf32, #tpu.memory_space<smem>>
    %c10_234 = arith.constant 10 : index
    %c2_235 = arith.constant 2 : index
    %126 = memref.load %arg3[%c10_234, %c2_235] : memref<32x12xf32, #tpu.memory_space<smem>>
    %c10_236 = arith.constant 10 : index
    %c3_237 = arith.constant 3 : index
    %127 = memref.load %arg3[%c10_236, %c3_237] : memref<32x12xf32, #tpu.memory_space<smem>>
    %c10_238 = arith.constant 10 : index
    %c4_239 = arith.constant 4 : index
    %128 = memref.load %arg3[%c10_238, %c4_239] : memref<32x12xf32, #tpu.memory_space<smem>>
    %c10_240 = arith.constant 10 : index
    %c5_241 = arith.constant 5 : index
    %129 = memref.load %arg3[%c10_240, %c5_241] : memref<32x12xf32, #tpu.memory_space<smem>>
    %c10_242 = arith.constant 10 : index
    %c6_243 = arith.constant 6 : index
    %130 = memref.load %arg3[%c10_242, %c6_243] : memref<32x12xf32, #tpu.memory_space<smem>>
    %c10_244 = arith.constant 10 : index
    %c7_245 = arith.constant 7 : index
    %131 = memref.load %arg3[%c10_244, %c7_245] : memref<32x12xf32, #tpu.memory_space<smem>>
    %c10_246 = arith.constant 10 : index
    %c8_247 = arith.constant 8 : index
    %132 = memref.load %arg3[%c10_246, %c8_247] : memref<32x12xf32, #tpu.memory_space<smem>>
    %c10_248 = arith.constant 10 : index
    %c9_249 = arith.constant 9 : index
    %133 = memref.load %arg3[%c10_248, %c9_249] : memref<32x12xf32, #tpu.memory_space<smem>>
    %c10_250 = arith.constant 10 : index
    %c10_251 = arith.constant 10 : index
    %134 = memref.load %arg3[%c10_250, %c10_251] : memref<32x12xf32, #tpu.memory_space<smem>>
    %c10_252 = arith.constant 10 : index
    %c11_253 = arith.constant 11 : index
    %135 = memref.load %arg3[%c10_252, %c11_253] : memref<32x12xf32, #tpu.memory_space<smem>>
    %c11_254 = arith.constant 11 : index
    %c0_255 = arith.constant 0 : index
    %136 = memref.load %arg3[%c11_254, %c0_255] : memref<32x12xf32, #tpu.memory_space<smem>>
    %c11_256 = arith.constant 11 : index
    %c1_257 = arith.constant 1 : index
    %137 = memref.load %arg3[%c11_256, %c1_257] : memref<32x12xf32, #tpu.memory_space<smem>>
    %c11_258 = arith.constant 11 : index
    %c2_259 = arith.constant 2 : index
    %138 = memref.load %arg3[%c11_258, %c2_259] : memref<32x12xf32, #tpu.memory_space<smem>>
    %c11_260 = arith.constant 11 : index
    %c3_261 = arith.constant 3 : index
    %139 = memref.load %arg3[%c11_260, %c3_261] : memref<32x12xf32, #tpu.memory_space<smem>>
    %c11_262 = arith.constant 11 : index
    %c4_263 = arith.constant 4 : index
    %140 = memref.load %arg3[%c11_262, %c4_263] : memref<32x12xf32, #tpu.memory_space<smem>>
    %c11_264 = arith.constant 11 : index
    %c5_265 = arith.constant 5 : index
    %141 = memref.load %arg3[%c11_264, %c5_265] : memref<32x12xf32, #tpu.memory_space<smem>>
    %c11_266 = arith.constant 11 : index
    %c6_267 = arith.constant 6 : index
    %142 = memref.load %arg3[%c11_266, %c6_267] : memref<32x12xf32, #tpu.memory_space<smem>>
    %c11_268 = arith.constant 11 : index
    %c7_269 = arith.constant 7 : index
    %143 = memref.load %arg3[%c11_268, %c7_269] : memref<32x12xf32, #tpu.memory_space<smem>>
    %c11_270 = arith.constant 11 : index
    %c8_271 = arith.constant 8 : index
    %144 = memref.load %arg3[%c11_270, %c8_271] : memref<32x12xf32, #tpu.memory_space<smem>>
    %c11_272 = arith.constant 11 : index
    %c9_273 = arith.constant 9 : index
    %145 = memref.load %arg3[%c11_272, %c9_273] : memref<32x12xf32, #tpu.memory_space<smem>>
    %c11_274 = arith.constant 11 : index
    %c10_275 = arith.constant 10 : index
    %146 = memref.load %arg3[%c11_274, %c10_275] : memref<32x12xf32, #tpu.memory_space<smem>>
    %c11_276 = arith.constant 11 : index
    %c11_277 = arith.constant 11 : index
    %147 = memref.load %arg3[%c11_276, %c11_277] : memref<32x12xf32, #tpu.memory_space<smem>>
    %c12 = arith.constant 12 : index
    %c0_278 = arith.constant 0 : index
    %148 = memref.load %arg3[%c12, %c0_278] : memref<32x12xf32, #tpu.memory_space<smem>>
    %c12_279 = arith.constant 12 : index
    %c1_280 = arith.constant 1 : index
    %149 = memref.load %arg3[%c12_279, %c1_280] : memref<32x12xf32, #tpu.memory_space<smem>>
    %c12_281 = arith.constant 12 : index
    %c2_282 = arith.constant 2 : index
    %150 = memref.load %arg3[%c12_281, %c2_282] : memref<32x12xf32, #tpu.memory_space<smem>>
    %c12_283 = arith.constant 12 : index
    %c3_284 = arith.constant 3 : index
    %151 = memref.load %arg3[%c12_283, %c3_284] : memref<32x12xf32, #tpu.memory_space<smem>>
    %c12_285 = arith.constant 12 : index
    %c4_286 = arith.constant 4 : index
    %152 = memref.load %arg3[%c12_285, %c4_286] : memref<32x12xf32, #tpu.memory_space<smem>>
    %c12_287 = arith.constant 12 : index
    %c5_288 = arith.constant 5 : index
    %153 = memref.load %arg3[%c12_287, %c5_288] : memref<32x12xf32, #tpu.memory_space<smem>>
    %c12_289 = arith.constant 12 : index
    %c6_290 = arith.constant 6 : index
    %154 = memref.load %arg3[%c12_289, %c6_290] : memref<32x12xf32, #tpu.memory_space<smem>>
    %c12_291 = arith.constant 12 : index
    %c7_292 = arith.constant 7 : index
    %155 = memref.load %arg3[%c12_291, %c7_292] : memref<32x12xf32, #tpu.memory_space<smem>>
    %c12_293 = arith.constant 12 : index
    %c8_294 = arith.constant 8 : index
    %156 = memref.load %arg3[%c12_293, %c8_294] : memref<32x12xf32, #tpu.memory_space<smem>>
    %c12_295 = arith.constant 12 : index
    %c9_296 = arith.constant 9 : index
    %157 = memref.load %arg3[%c12_295, %c9_296] : memref<32x12xf32, #tpu.memory_space<smem>>
    %c12_297 = arith.constant 12 : index
    %c10_298 = arith.constant 10 : index
    %158 = memref.load %arg3[%c12_297, %c10_298] : memref<32x12xf32, #tpu.memory_space<smem>>
    %c12_299 = arith.constant 12 : index
    %c11_300 = arith.constant 11 : index
    %159 = memref.load %arg3[%c12_299, %c11_300] : memref<32x12xf32, #tpu.memory_space<smem>>
    %c13 = arith.constant 13 : index
    %c0_301 = arith.constant 0 : index
    %160 = memref.load %arg3[%c13, %c0_301] : memref<32x12xf32, #tpu.memory_space<smem>>
    %c13_302 = arith.constant 13 : index
    %c1_303 = arith.constant 1 : index
    %161 = memref.load %arg3[%c13_302, %c1_303] : memref<32x12xf32, #tpu.memory_space<smem>>
    %c13_304 = arith.constant 13 : index
    %c2_305 = arith.constant 2 : index
    %162 = memref.load %arg3[%c13_304, %c2_305] : memref<32x12xf32, #tpu.memory_space<smem>>
    %c13_306 = arith.constant 13 : index
    %c3_307 = arith.constant 3 : index
    %163 = memref.load %arg3[%c13_306, %c3_307] : memref<32x12xf32, #tpu.memory_space<smem>>
    %c13_308 = arith.constant 13 : index
    %c4_309 = arith.constant 4 : index
    %164 = memref.load %arg3[%c13_308, %c4_309] : memref<32x12xf32, #tpu.memory_space<smem>>
    %c13_310 = arith.constant 13 : index
    %c5_311 = arith.constant 5 : index
    %165 = memref.load %arg3[%c13_310, %c5_311] : memref<32x12xf32, #tpu.memory_space<smem>>
    %c13_312 = arith.constant 13 : index
    %c6_313 = arith.constant 6 : index
    %166 = memref.load %arg3[%c13_312, %c6_313] : memref<32x12xf32, #tpu.memory_space<smem>>
    %c13_314 = arith.constant 13 : index
    %c7_315 = arith.constant 7 : index
    %167 = memref.load %arg3[%c13_314, %c7_315] : memref<32x12xf32, #tpu.memory_space<smem>>
    %c13_316 = arith.constant 13 : index
    %c8_317 = arith.constant 8 : index
    %168 = memref.load %arg3[%c13_316, %c8_317] : memref<32x12xf32, #tpu.memory_space<smem>>
    %c13_318 = arith.constant 13 : index
    %c9_319 = arith.constant 9 : index
    %169 = memref.load %arg3[%c13_318, %c9_319] : memref<32x12xf32, #tpu.memory_space<smem>>
    %c13_320 = arith.constant 13 : index
    %c10_321 = arith.constant 10 : index
    %170 = memref.load %arg3[%c13_320, %c10_321] : memref<32x12xf32, #tpu.memory_space<smem>>
    %c13_322 = arith.constant 13 : index
    %c11_323 = arith.constant 11 : index
    %171 = memref.load %arg3[%c13_322, %c11_323] : memref<32x12xf32, #tpu.memory_space<smem>>
    %c14 = arith.constant 14 : index
    %c0_324 = arith.constant 0 : index
    %172 = memref.load %arg3[%c14, %c0_324] : memref<32x12xf32, #tpu.memory_space<smem>>
    %c14_325 = arith.constant 14 : index
    %c1_326 = arith.constant 1 : index
    %173 = memref.load %arg3[%c14_325, %c1_326] : memref<32x12xf32, #tpu.memory_space<smem>>
    %c14_327 = arith.constant 14 : index
    %c2_328 = arith.constant 2 : index
    %174 = memref.load %arg3[%c14_327, %c2_328] : memref<32x12xf32, #tpu.memory_space<smem>>
    %c14_329 = arith.constant 14 : index
    %c3_330 = arith.constant 3 : index
    %175 = memref.load %arg3[%c14_329, %c3_330] : memref<32x12xf32, #tpu.memory_space<smem>>
    %c14_331 = arith.constant 14 : index
    %c4_332 = arith.constant 4 : index
    %176 = memref.load %arg3[%c14_331, %c4_332] : memref<32x12xf32, #tpu.memory_space<smem>>
    %c14_333 = arith.constant 14 : index
    %c5_334 = arith.constant 5 : index
    %177 = memref.load %arg3[%c14_333, %c5_334] : memref<32x12xf32, #tpu.memory_space<smem>>
    %c14_335 = arith.constant 14 : index
    %c6_336 = arith.constant 6 : index
    %178 = memref.load %arg3[%c14_335, %c6_336] : memref<32x12xf32, #tpu.memory_space<smem>>
    %c14_337 = arith.constant 14 : index
    %c7_338 = arith.constant 7 : index
    %179 = memref.load %arg3[%c14_337, %c7_338] : memref<32x12xf32, #tpu.memory_space<smem>>
    %c14_339 = arith.constant 14 : index
    %c8_340 = arith.constant 8 : index
    %180 = memref.load %arg3[%c14_339, %c8_340] : memref<32x12xf32, #tpu.memory_space<smem>>
    %c14_341 = arith.constant 14 : index
    %c9_342 = arith.constant 9 : index
    %181 = memref.load %arg3[%c14_341, %c9_342] : memref<32x12xf32, #tpu.memory_space<smem>>
    %c14_343 = arith.constant 14 : index
    %c10_344 = arith.constant 10 : index
    %182 = memref.load %arg3[%c14_343, %c10_344] : memref<32x12xf32, #tpu.memory_space<smem>>
    %c14_345 = arith.constant 14 : index
    %c11_346 = arith.constant 11 : index
    %183 = memref.load %arg3[%c14_345, %c11_346] : memref<32x12xf32, #tpu.memory_space<smem>>
    %c15 = arith.constant 15 : index
    %c0_347 = arith.constant 0 : index
    %184 = memref.load %arg3[%c15, %c0_347] : memref<32x12xf32, #tpu.memory_space<smem>>
    %c15_348 = arith.constant 15 : index
    %c1_349 = arith.constant 1 : index
    %185 = memref.load %arg3[%c15_348, %c1_349] : memref<32x12xf32, #tpu.memory_space<smem>>
    %c15_350 = arith.constant 15 : index
    %c2_351 = arith.constant 2 : index
    %186 = memref.load %arg3[%c15_350, %c2_351] : memref<32x12xf32, #tpu.memory_space<smem>>
    %c15_352 = arith.constant 15 : index
    %c3_353 = arith.constant 3 : index
    %187 = memref.load %arg3[%c15_352, %c3_353] : memref<32x12xf32, #tpu.memory_space<smem>>
    %c15_354 = arith.constant 15 : index
    %c4_355 = arith.constant 4 : index
    %188 = memref.load %arg3[%c15_354, %c4_355] : memref<32x12xf32, #tpu.memory_space<smem>>
    %c15_356 = arith.constant 15 : index
    %c5_357 = arith.constant 5 : index
    %189 = memref.load %arg3[%c15_356, %c5_357] : memref<32x12xf32, #tpu.memory_space<smem>>
    %c15_358 = arith.constant 15 : index
    %c6_359 = arith.constant 6 : index
    %190 = memref.load %arg3[%c15_358, %c6_359] : memref<32x12xf32, #tpu.memory_space<smem>>
    %c15_360 = arith.constant 15 : index
    %c7_361 = arith.constant 7 : index
    %191 = memref.load %arg3[%c15_360, %c7_361] : memref<32x12xf32, #tpu.memory_space<smem>>
    %c15_362 = arith.constant 15 : index
    %c8_363 = arith.constant 8 : index
    %192 = memref.load %arg3[%c15_362, %c8_363] : memref<32x12xf32, #tpu.memory_space<smem>>
    %c15_364 = arith.constant 15 : index
    %c9_365 = arith.constant 9 : index
    %193 = memref.load %arg3[%c15_364, %c9_365] : memref<32x12xf32, #tpu.memory_space<smem>>
    %c15_366 = arith.constant 15 : index
    %c10_367 = arith.constant 10 : index
    %194 = memref.load %arg3[%c15_366, %c10_367] : memref<32x12xf32, #tpu.memory_space<smem>>
    %c15_368 = arith.constant 15 : index
    %c11_369 = arith.constant 11 : index
    %195 = memref.load %arg3[%c15_368, %c11_369] : memref<32x12xf32, #tpu.memory_space<smem>>
    %c16 = arith.constant 16 : index
    %c0_370 = arith.constant 0 : index
    %196 = memref.load %arg3[%c16, %c0_370] : memref<32x12xf32, #tpu.memory_space<smem>>
    %c16_371 = arith.constant 16 : index
    %c1_372 = arith.constant 1 : index
    %197 = memref.load %arg3[%c16_371, %c1_372] : memref<32x12xf32, #tpu.memory_space<smem>>
    %c16_373 = arith.constant 16 : index
    %c2_374 = arith.constant 2 : index
    %198 = memref.load %arg3[%c16_373, %c2_374] : memref<32x12xf32, #tpu.memory_space<smem>>
    %c16_375 = arith.constant 16 : index
    %c3_376 = arith.constant 3 : index
    %199 = memref.load %arg3[%c16_375, %c3_376] : memref<32x12xf32, #tpu.memory_space<smem>>
    %c16_377 = arith.constant 16 : index
    %c4_378 = arith.constant 4 : index
    %200 = memref.load %arg3[%c16_377, %c4_378] : memref<32x12xf32, #tpu.memory_space<smem>>
    %c16_379 = arith.constant 16 : index
    %c5_380 = arith.constant 5 : index
    %201 = memref.load %arg3[%c16_379, %c5_380] : memref<32x12xf32, #tpu.memory_space<smem>>
    %c16_381 = arith.constant 16 : index
    %c6_382 = arith.constant 6 : index
    %202 = memref.load %arg3[%c16_381, %c6_382] : memref<32x12xf32, #tpu.memory_space<smem>>
    %c16_383 = arith.constant 16 : index
    %c7_384 = arith.constant 7 : index
    %203 = memref.load %arg3[%c16_383, %c7_384] : memref<32x12xf32, #tpu.memory_space<smem>>
    %c16_385 = arith.constant 16 : index
    %c8_386 = arith.constant 8 : index
    %204 = memref.load %arg3[%c16_385, %c8_386] : memref<32x12xf32, #tpu.memory_space<smem>>
    %c16_387 = arith.constant 16 : index
    %c9_388 = arith.constant 9 : index
    %205 = memref.load %arg3[%c16_387, %c9_388] : memref<32x12xf32, #tpu.memory_space<smem>>
    %c16_389 = arith.constant 16 : index
    %c10_390 = arith.constant 10 : index
    %206 = memref.load %arg3[%c16_389, %c10_390] : memref<32x12xf32, #tpu.memory_space<smem>>
    %c16_391 = arith.constant 16 : index
    %c11_392 = arith.constant 11 : index
    %207 = memref.load %arg3[%c16_391, %c11_392] : memref<32x12xf32, #tpu.memory_space<smem>>
    %c17 = arith.constant 17 : index
    %c0_393 = arith.constant 0 : index
    %208 = memref.load %arg3[%c17, %c0_393] : memref<32x12xf32, #tpu.memory_space<smem>>
    %c17_394 = arith.constant 17 : index
    %c1_395 = arith.constant 1 : index
    %209 = memref.load %arg3[%c17_394, %c1_395] : memref<32x12xf32, #tpu.memory_space<smem>>
    %c17_396 = arith.constant 17 : index
    %c2_397 = arith.constant 2 : index
    %210 = memref.load %arg3[%c17_396, %c2_397] : memref<32x12xf32, #tpu.memory_space<smem>>
    %c17_398 = arith.constant 17 : index
    %c3_399 = arith.constant 3 : index
    %211 = memref.load %arg3[%c17_398, %c3_399] : memref<32x12xf32, #tpu.memory_space<smem>>
    %c17_400 = arith.constant 17 : index
    %c4_401 = arith.constant 4 : index
    %212 = memref.load %arg3[%c17_400, %c4_401] : memref<32x12xf32, #tpu.memory_space<smem>>
    %c17_402 = arith.constant 17 : index
    %c5_403 = arith.constant 5 : index
    %213 = memref.load %arg3[%c17_402, %c5_403] : memref<32x12xf32, #tpu.memory_space<smem>>
    %c17_404 = arith.constant 17 : index
    %c6_405 = arith.constant 6 : index
    %214 = memref.load %arg3[%c17_404, %c6_405] : memref<32x12xf32, #tpu.memory_space<smem>>
    %c17_406 = arith.constant 17 : index
    %c7_407 = arith.constant 7 : index
    %215 = memref.load %arg3[%c17_406, %c7_407] : memref<32x12xf32, #tpu.memory_space<smem>>
    %c17_408 = arith.constant 17 : index
    %c8_409 = arith.constant 8 : index
    %216 = memref.load %arg3[%c17_408, %c8_409] : memref<32x12xf32, #tpu.memory_space<smem>>
    %c17_410 = arith.constant 17 : index
    %c9_411 = arith.constant 9 : index
    %217 = memref.load %arg3[%c17_410, %c9_411] : memref<32x12xf32, #tpu.memory_space<smem>>
    %c17_412 = arith.constant 17 : index
    %c10_413 = arith.constant 10 : index
    %218 = memref.load %arg3[%c17_412, %c10_413] : memref<32x12xf32, #tpu.memory_space<smem>>
    %c17_414 = arith.constant 17 : index
    %c11_415 = arith.constant 11 : index
    %219 = memref.load %arg3[%c17_414, %c11_415] : memref<32x12xf32, #tpu.memory_space<smem>>
    %c18 = arith.constant 18 : index
    %c0_416 = arith.constant 0 : index
    %220 = memref.load %arg3[%c18, %c0_416] : memref<32x12xf32, #tpu.memory_space<smem>>
    %c18_417 = arith.constant 18 : index
    %c1_418 = arith.constant 1 : index
    %221 = memref.load %arg3[%c18_417, %c1_418] : memref<32x12xf32, #tpu.memory_space<smem>>
    %c18_419 = arith.constant 18 : index
    %c2_420 = arith.constant 2 : index
    %222 = memref.load %arg3[%c18_419, %c2_420] : memref<32x12xf32, #tpu.memory_space<smem>>
    %c18_421 = arith.constant 18 : index
    %c3_422 = arith.constant 3 : index
    %223 = memref.load %arg3[%c18_421, %c3_422] : memref<32x12xf32, #tpu.memory_space<smem>>
    %c18_423 = arith.constant 18 : index
    %c4_424 = arith.constant 4 : index
    %224 = memref.load %arg3[%c18_423, %c4_424] : memref<32x12xf32, #tpu.memory_space<smem>>
    %c18_425 = arith.constant 18 : index
    %c5_426 = arith.constant 5 : index
    %225 = memref.load %arg3[%c18_425, %c5_426] : memref<32x12xf32, #tpu.memory_space<smem>>
    %c18_427 = arith.constant 18 : index
    %c6_428 = arith.constant 6 : index
    %226 = memref.load %arg3[%c18_427, %c6_428] : memref<32x12xf32, #tpu.memory_space<smem>>
    %c18_429 = arith.constant 18 : index
    %c7_430 = arith.constant 7 : index
    %227 = memref.load %arg3[%c18_429, %c7_430] : memref<32x12xf32, #tpu.memory_space<smem>>
    %c18_431 = arith.constant 18 : index
    %c8_432 = arith.constant 8 : index
    %228 = memref.load %arg3[%c18_431, %c8_432] : memref<32x12xf32, #tpu.memory_space<smem>>
    %c18_433 = arith.constant 18 : index
    %c9_434 = arith.constant 9 : index
    %229 = memref.load %arg3[%c18_433, %c9_434] : memref<32x12xf32, #tpu.memory_space<smem>>
    %c18_435 = arith.constant 18 : index
    %c10_436 = arith.constant 10 : index
    %230 = memref.load %arg3[%c18_435, %c10_436] : memref<32x12xf32, #tpu.memory_space<smem>>
    %c18_437 = arith.constant 18 : index
    %c11_438 = arith.constant 11 : index
    %231 = memref.load %arg3[%c18_437, %c11_438] : memref<32x12xf32, #tpu.memory_space<smem>>
    %c19 = arith.constant 19 : index
    %c0_439 = arith.constant 0 : index
    %232 = memref.load %arg3[%c19, %c0_439] : memref<32x12xf32, #tpu.memory_space<smem>>
    %c19_440 = arith.constant 19 : index
    %c1_441 = arith.constant 1 : index
    %233 = memref.load %arg3[%c19_440, %c1_441] : memref<32x12xf32, #tpu.memory_space<smem>>
    %c19_442 = arith.constant 19 : index
    %c2_443 = arith.constant 2 : index
    %234 = memref.load %arg3[%c19_442, %c2_443] : memref<32x12xf32, #tpu.memory_space<smem>>
    %c19_444 = arith.constant 19 : index
    %c3_445 = arith.constant 3 : index
    %235 = memref.load %arg3[%c19_444, %c3_445] : memref<32x12xf32, #tpu.memory_space<smem>>
    %c19_446 = arith.constant 19 : index
    %c4_447 = arith.constant 4 : index
    %236 = memref.load %arg3[%c19_446, %c4_447] : memref<32x12xf32, #tpu.memory_space<smem>>
    %c19_448 = arith.constant 19 : index
    %c5_449 = arith.constant 5 : index
    %237 = memref.load %arg3[%c19_448, %c5_449] : memref<32x12xf32, #tpu.memory_space<smem>>
    %c19_450 = arith.constant 19 : index
    %c6_451 = arith.constant 6 : index
    %238 = memref.load %arg3[%c19_450, %c6_451] : memref<32x12xf32, #tpu.memory_space<smem>>
    %c19_452 = arith.constant 19 : index
    %c7_453 = arith.constant 7 : index
    %239 = memref.load %arg3[%c19_452, %c7_453] : memref<32x12xf32, #tpu.memory_space<smem>>
    %c19_454 = arith.constant 19 : index
    %c8_455 = arith.constant 8 : index
    %240 = memref.load %arg3[%c19_454, %c8_455] : memref<32x12xf32, #tpu.memory_space<smem>>
    %c19_456 = arith.constant 19 : index
    %c9_457 = arith.constant 9 : index
    %241 = memref.load %arg3[%c19_456, %c9_457] : memref<32x12xf32, #tpu.memory_space<smem>>
    %c19_458 = arith.constant 19 : index
    %c10_459 = arith.constant 10 : index
    %242 = memref.load %arg3[%c19_458, %c10_459] : memref<32x12xf32, #tpu.memory_space<smem>>
    %c19_460 = arith.constant 19 : index
    %c11_461 = arith.constant 11 : index
    %243 = memref.load %arg3[%c19_460, %c11_461] : memref<32x12xf32, #tpu.memory_space<smem>>
    %c20 = arith.constant 20 : index
    %c0_462 = arith.constant 0 : index
    %244 = memref.load %arg3[%c20, %c0_462] : memref<32x12xf32, #tpu.memory_space<smem>>
    %c20_463 = arith.constant 20 : index
    %c1_464 = arith.constant 1 : index
    %245 = memref.load %arg3[%c20_463, %c1_464] : memref<32x12xf32, #tpu.memory_space<smem>>
    %c20_465 = arith.constant 20 : index
    %c2_466 = arith.constant 2 : index
    %246 = memref.load %arg3[%c20_465, %c2_466] : memref<32x12xf32, #tpu.memory_space<smem>>
    %c20_467 = arith.constant 20 : index
    %c3_468 = arith.constant 3 : index
    %247 = memref.load %arg3[%c20_467, %c3_468] : memref<32x12xf32, #tpu.memory_space<smem>>
    %c20_469 = arith.constant 20 : index
    %c4_470 = arith.constant 4 : index
    %248 = memref.load %arg3[%c20_469, %c4_470] : memref<32x12xf32, #tpu.memory_space<smem>>
    %c20_471 = arith.constant 20 : index
    %c5_472 = arith.constant 5 : index
    %249 = memref.load %arg3[%c20_471, %c5_472] : memref<32x12xf32, #tpu.memory_space<smem>>
    %c20_473 = arith.constant 20 : index
    %c6_474 = arith.constant 6 : index
    %250 = memref.load %arg3[%c20_473, %c6_474] : memref<32x12xf32, #tpu.memory_space<smem>>
    %c20_475 = arith.constant 20 : index
    %c7_476 = arith.constant 7 : index
    %251 = memref.load %arg3[%c20_475, %c7_476] : memref<32x12xf32, #tpu.memory_space<smem>>
    %c20_477 = arith.constant 20 : index
    %c8_478 = arith.constant 8 : index
    %252 = memref.load %arg3[%c20_477, %c8_478] : memref<32x12xf32, #tpu.memory_space<smem>>
    %c20_479 = arith.constant 20 : index
    %c9_480 = arith.constant 9 : index
    %253 = memref.load %arg3[%c20_479, %c9_480] : memref<32x12xf32, #tpu.memory_space<smem>>
    %c20_481 = arith.constant 20 : index
    %c10_482 = arith.constant 10 : index
    %254 = memref.load %arg3[%c20_481, %c10_482] : memref<32x12xf32, #tpu.memory_space<smem>>
    %c20_483 = arith.constant 20 : index
    %c11_484 = arith.constant 11 : index
    %255 = memref.load %arg3[%c20_483, %c11_484] : memref<32x12xf32, #tpu.memory_space<smem>>
    %c21 = arith.constant 21 : index
    %c0_485 = arith.constant 0 : index
    %256 = memref.load %arg3[%c21, %c0_485] : memref<32x12xf32, #tpu.memory_space<smem>>
    %c21_486 = arith.constant 21 : index
    %c1_487 = arith.constant 1 : index
    %257 = memref.load %arg3[%c21_486, %c1_487] : memref<32x12xf32, #tpu.memory_space<smem>>
    %c21_488 = arith.constant 21 : index
    %c2_489 = arith.constant 2 : index
    %258 = memref.load %arg3[%c21_488, %c2_489] : memref<32x12xf32, #tpu.memory_space<smem>>
    %c21_490 = arith.constant 21 : index
    %c3_491 = arith.constant 3 : index
    %259 = memref.load %arg3[%c21_490, %c3_491] : memref<32x12xf32, #tpu.memory_space<smem>>
    %c21_492 = arith.constant 21 : index
    %c4_493 = arith.constant 4 : index
    %260 = memref.load %arg3[%c21_492, %c4_493] : memref<32x12xf32, #tpu.memory_space<smem>>
    %c21_494 = arith.constant 21 : index
    %c5_495 = arith.constant 5 : index
    %261 = memref.load %arg3[%c21_494, %c5_495] : memref<32x12xf32, #tpu.memory_space<smem>>
    %c21_496 = arith.constant 21 : index
    %c6_497 = arith.constant 6 : index
    %262 = memref.load %arg3[%c21_496, %c6_497] : memref<32x12xf32, #tpu.memory_space<smem>>
    %c21_498 = arith.constant 21 : index
    %c7_499 = arith.constant 7 : index
    %263 = memref.load %arg3[%c21_498, %c7_499] : memref<32x12xf32, #tpu.memory_space<smem>>
    %c21_500 = arith.constant 21 : index
    %c8_501 = arith.constant 8 : index
    %264 = memref.load %arg3[%c21_500, %c8_501] : memref<32x12xf32, #tpu.memory_space<smem>>
    %c21_502 = arith.constant 21 : index
    %c9_503 = arith.constant 9 : index
    %265 = memref.load %arg3[%c21_502, %c9_503] : memref<32x12xf32, #tpu.memory_space<smem>>
    %c21_504 = arith.constant 21 : index
    %c10_505 = arith.constant 10 : index
    %266 = memref.load %arg3[%c21_504, %c10_505] : memref<32x12xf32, #tpu.memory_space<smem>>
    %c21_506 = arith.constant 21 : index
    %c11_507 = arith.constant 11 : index
    %267 = memref.load %arg3[%c21_506, %c11_507] : memref<32x12xf32, #tpu.memory_space<smem>>
    %c22 = arith.constant 22 : index
    %c0_508 = arith.constant 0 : index
    %268 = memref.load %arg3[%c22, %c0_508] : memref<32x12xf32, #tpu.memory_space<smem>>
    %c22_509 = arith.constant 22 : index
    %c1_510 = arith.constant 1 : index
    %269 = memref.load %arg3[%c22_509, %c1_510] : memref<32x12xf32, #tpu.memory_space<smem>>
    %c22_511 = arith.constant 22 : index
    %c2_512 = arith.constant 2 : index
    %270 = memref.load %arg3[%c22_511, %c2_512] : memref<32x12xf32, #tpu.memory_space<smem>>
    %c22_513 = arith.constant 22 : index
    %c3_514 = arith.constant 3 : index
    %271 = memref.load %arg3[%c22_513, %c3_514] : memref<32x12xf32, #tpu.memory_space<smem>>
    %c22_515 = arith.constant 22 : index
    %c4_516 = arith.constant 4 : index
    %272 = memref.load %arg3[%c22_515, %c4_516] : memref<32x12xf32, #tpu.memory_space<smem>>
    %c22_517 = arith.constant 22 : index
    %c5_518 = arith.constant 5 : index
    %273 = memref.load %arg3[%c22_517, %c5_518] : memref<32x12xf32, #tpu.memory_space<smem>>
    %c22_519 = arith.constant 22 : index
    %c6_520 = arith.constant 6 : index
    %274 = memref.load %arg3[%c22_519, %c6_520] : memref<32x12xf32, #tpu.memory_space<smem>>
    %c22_521 = arith.constant 22 : index
    %c7_522 = arith.constant 7 : index
    %275 = memref.load %arg3[%c22_521, %c7_522] : memref<32x12xf32, #tpu.memory_space<smem>>
    %c22_523 = arith.constant 22 : index
    %c8_524 = arith.constant 8 : index
    %276 = memref.load %arg3[%c22_523, %c8_524] : memref<32x12xf32, #tpu.memory_space<smem>>
    %c22_525 = arith.constant 22 : index
    %c9_526 = arith.constant 9 : index
    %277 = memref.load %arg3[%c22_525, %c9_526] : memref<32x12xf32, #tpu.memory_space<smem>>
    %c22_527 = arith.constant 22 : index
    %c10_528 = arith.constant 10 : index
    %278 = memref.load %arg3[%c22_527, %c10_528] : memref<32x12xf32, #tpu.memory_space<smem>>
    %c22_529 = arith.constant 22 : index
    %c11_530 = arith.constant 11 : index
    %279 = memref.load %arg3[%c22_529, %c11_530] : memref<32x12xf32, #tpu.memory_space<smem>>
    %c23 = arith.constant 23 : index
    %c0_531 = arith.constant 0 : index
    %280 = memref.load %arg3[%c23, %c0_531] : memref<32x12xf32, #tpu.memory_space<smem>>
    %c23_532 = arith.constant 23 : index
    %c1_533 = arith.constant 1 : index
    %281 = memref.load %arg3[%c23_532, %c1_533] : memref<32x12xf32, #tpu.memory_space<smem>>
    %c23_534 = arith.constant 23 : index
    %c2_535 = arith.constant 2 : index
    %282 = memref.load %arg3[%c23_534, %c2_535] : memref<32x12xf32, #tpu.memory_space<smem>>
    %c23_536 = arith.constant 23 : index
    %c3_537 = arith.constant 3 : index
    %283 = memref.load %arg3[%c23_536, %c3_537] : memref<32x12xf32, #tpu.memory_space<smem>>
    %c23_538 = arith.constant 23 : index
    %c4_539 = arith.constant 4 : index
    %284 = memref.load %arg3[%c23_538, %c4_539] : memref<32x12xf32, #tpu.memory_space<smem>>
    %c23_540 = arith.constant 23 : index
    %c5_541 = arith.constant 5 : index
    %285 = memref.load %arg3[%c23_540, %c5_541] : memref<32x12xf32, #tpu.memory_space<smem>>
    %c23_542 = arith.constant 23 : index
    %c6_543 = arith.constant 6 : index
    %286 = memref.load %arg3[%c23_542, %c6_543] : memref<32x12xf32, #tpu.memory_space<smem>>
    %c23_544 = arith.constant 23 : index
    %c7_545 = arith.constant 7 : index
    %287 = memref.load %arg3[%c23_544, %c7_545] : memref<32x12xf32, #tpu.memory_space<smem>>
    %c23_546 = arith.constant 23 : index
    %c8_547 = arith.constant 8 : index
    %288 = memref.load %arg3[%c23_546, %c8_547] : memref<32x12xf32, #tpu.memory_space<smem>>
    %c23_548 = arith.constant 23 : index
    %c9_549 = arith.constant 9 : index
    %289 = memref.load %arg3[%c23_548, %c9_549] : memref<32x12xf32, #tpu.memory_space<smem>>
    %c23_550 = arith.constant 23 : index
    %c10_551 = arith.constant 10 : index
    %290 = memref.load %arg3[%c23_550, %c10_551] : memref<32x12xf32, #tpu.memory_space<smem>>
    %c23_552 = arith.constant 23 : index
    %c11_553 = arith.constant 11 : index
    %291 = memref.load %arg3[%c23_552, %c11_553] : memref<32x12xf32, #tpu.memory_space<smem>>
    %c24 = arith.constant 24 : index
    %c0_554 = arith.constant 0 : index
    %292 = memref.load %arg3[%c24, %c0_554] : memref<32x12xf32, #tpu.memory_space<smem>>
    %c24_555 = arith.constant 24 : index
    %c1_556 = arith.constant 1 : index
    %293 = memref.load %arg3[%c24_555, %c1_556] : memref<32x12xf32, #tpu.memory_space<smem>>
    %c24_557 = arith.constant 24 : index
    %c2_558 = arith.constant 2 : index
    %294 = memref.load %arg3[%c24_557, %c2_558] : memref<32x12xf32, #tpu.memory_space<smem>>
    %c24_559 = arith.constant 24 : index
    %c3_560 = arith.constant 3 : index
    %295 = memref.load %arg3[%c24_559, %c3_560] : memref<32x12xf32, #tpu.memory_space<smem>>
    %c24_561 = arith.constant 24 : index
    %c4_562 = arith.constant 4 : index
    %296 = memref.load %arg3[%c24_561, %c4_562] : memref<32x12xf32, #tpu.memory_space<smem>>
    %c24_563 = arith.constant 24 : index
    %c5_564 = arith.constant 5 : index
    %297 = memref.load %arg3[%c24_563, %c5_564] : memref<32x12xf32, #tpu.memory_space<smem>>
    %c24_565 = arith.constant 24 : index
    %c6_566 = arith.constant 6 : index
    %298 = memref.load %arg3[%c24_565, %c6_566] : memref<32x12xf32, #tpu.memory_space<smem>>
    %c24_567 = arith.constant 24 : index
    %c7_568 = arith.constant 7 : index
    %299 = memref.load %arg3[%c24_567, %c7_568] : memref<32x12xf32, #tpu.memory_space<smem>>
    %c24_569 = arith.constant 24 : index
    %c8_570 = arith.constant 8 : index
    %300 = memref.load %arg3[%c24_569, %c8_570] : memref<32x12xf32, #tpu.memory_space<smem>>
    %c24_571 = arith.constant 24 : index
    %c9_572 = arith.constant 9 : index
    %301 = memref.load %arg3[%c24_571, %c9_572] : memref<32x12xf32, #tpu.memory_space<smem>>
    %c24_573 = arith.constant 24 : index
    %c10_574 = arith.constant 10 : index
    %302 = memref.load %arg3[%c24_573, %c10_574] : memref<32x12xf32, #tpu.memory_space<smem>>
    %c24_575 = arith.constant 24 : index
    %c11_576 = arith.constant 11 : index
    %303 = memref.load %arg3[%c24_575, %c11_576] : memref<32x12xf32, #tpu.memory_space<smem>>
    %c25 = arith.constant 25 : index
    %c0_577 = arith.constant 0 : index
    %304 = memref.load %arg3[%c25, %c0_577] : memref<32x12xf32, #tpu.memory_space<smem>>
    %c25_578 = arith.constant 25 : index
    %c1_579 = arith.constant 1 : index
    %305 = memref.load %arg3[%c25_578, %c1_579] : memref<32x12xf32, #tpu.memory_space<smem>>
    %c25_580 = arith.constant 25 : index
    %c2_581 = arith.constant 2 : index
    %306 = memref.load %arg3[%c25_580, %c2_581] : memref<32x12xf32, #tpu.memory_space<smem>>
    %c25_582 = arith.constant 25 : index
    %c3_583 = arith.constant 3 : index
    %307 = memref.load %arg3[%c25_582, %c3_583] : memref<32x12xf32, #tpu.memory_space<smem>>
    %c25_584 = arith.constant 25 : index
    %c4_585 = arith.constant 4 : index
    %308 = memref.load %arg3[%c25_584, %c4_585] : memref<32x12xf32, #tpu.memory_space<smem>>
    %c25_586 = arith.constant 25 : index
    %c5_587 = arith.constant 5 : index
    %309 = memref.load %arg3[%c25_586, %c5_587] : memref<32x12xf32, #tpu.memory_space<smem>>
    %c25_588 = arith.constant 25 : index
    %c6_589 = arith.constant 6 : index
    %310 = memref.load %arg3[%c25_588, %c6_589] : memref<32x12xf32, #tpu.memory_space<smem>>
    %c25_590 = arith.constant 25 : index
    %c7_591 = arith.constant 7 : index
    %311 = memref.load %arg3[%c25_590, %c7_591] : memref<32x12xf32, #tpu.memory_space<smem>>
    %c25_592 = arith.constant 25 : index
    %c8_593 = arith.constant 8 : index
    %312 = memref.load %arg3[%c25_592, %c8_593] : memref<32x12xf32, #tpu.memory_space<smem>>
    %c25_594 = arith.constant 25 : index
    %c9_595 = arith.constant 9 : index
    %313 = memref.load %arg3[%c25_594, %c9_595] : memref<32x12xf32, #tpu.memory_space<smem>>
    %c25_596 = arith.constant 25 : index
    %c10_597 = arith.constant 10 : index
    %314 = memref.load %arg3[%c25_596, %c10_597] : memref<32x12xf32, #tpu.memory_space<smem>>
    %c25_598 = arith.constant 25 : index
    %c11_599 = arith.constant 11 : index
    %315 = memref.load %arg3[%c25_598, %c11_599] : memref<32x12xf32, #tpu.memory_space<smem>>
    %c26 = arith.constant 26 : index
    %c0_600 = arith.constant 0 : index
    %316 = memref.load %arg3[%c26, %c0_600] : memref<32x12xf32, #tpu.memory_space<smem>>
    %c26_601 = arith.constant 26 : index
    %c1_602 = arith.constant 1 : index
    %317 = memref.load %arg3[%c26_601, %c1_602] : memref<32x12xf32, #tpu.memory_space<smem>>
    %c26_603 = arith.constant 26 : index
    %c2_604 = arith.constant 2 : index
    %318 = memref.load %arg3[%c26_603, %c2_604] : memref<32x12xf32, #tpu.memory_space<smem>>
    %c26_605 = arith.constant 26 : index
    %c3_606 = arith.constant 3 : index
    %319 = memref.load %arg3[%c26_605, %c3_606] : memref<32x12xf32, #tpu.memory_space<smem>>
    %c26_607 = arith.constant 26 : index
    %c4_608 = arith.constant 4 : index
    %320 = memref.load %arg3[%c26_607, %c4_608] : memref<32x12xf32, #tpu.memory_space<smem>>
    %c26_609 = arith.constant 26 : index
    %c5_610 = arith.constant 5 : index
    %321 = memref.load %arg3[%c26_609, %c5_610] : memref<32x12xf32, #tpu.memory_space<smem>>
    %c26_611 = arith.constant 26 : index
    %c6_612 = arith.constant 6 : index
    %322 = memref.load %arg3[%c26_611, %c6_612] : memref<32x12xf32, #tpu.memory_space<smem>>
    %c26_613 = arith.constant 26 : index
    %c7_614 = arith.constant 7 : index
    %323 = memref.load %arg3[%c26_613, %c7_614] : memref<32x12xf32, #tpu.memory_space<smem>>
    %c26_615 = arith.constant 26 : index
    %c8_616 = arith.constant 8 : index
    %324 = memref.load %arg3[%c26_615, %c8_616] : memref<32x12xf32, #tpu.memory_space<smem>>
    %c26_617 = arith.constant 26 : index
    %c9_618 = arith.constant 9 : index
    %325 = memref.load %arg3[%c26_617, %c9_618] : memref<32x12xf32, #tpu.memory_space<smem>>
    %c26_619 = arith.constant 26 : index
    %c10_620 = arith.constant 10 : index
    %326 = memref.load %arg3[%c26_619, %c10_620] : memref<32x12xf32, #tpu.memory_space<smem>>
    %c26_621 = arith.constant 26 : index
    %c11_622 = arith.constant 11 : index
    %327 = memref.load %arg3[%c26_621, %c11_622] : memref<32x12xf32, #tpu.memory_space<smem>>
    %c27 = arith.constant 27 : index
    %c0_623 = arith.constant 0 : index
    %328 = memref.load %arg3[%c27, %c0_623] : memref<32x12xf32, #tpu.memory_space<smem>>
    %c27_624 = arith.constant 27 : index
    %c1_625 = arith.constant 1 : index
    %329 = memref.load %arg3[%c27_624, %c1_625] : memref<32x12xf32, #tpu.memory_space<smem>>
    %c27_626 = arith.constant 27 : index
    %c2_627 = arith.constant 2 : index
    %330 = memref.load %arg3[%c27_626, %c2_627] : memref<32x12xf32, #tpu.memory_space<smem>>
    %c27_628 = arith.constant 27 : index
    %c3_629 = arith.constant 3 : index
    %331 = memref.load %arg3[%c27_628, %c3_629] : memref<32x12xf32, #tpu.memory_space<smem>>
    %c27_630 = arith.constant 27 : index
    %c4_631 = arith.constant 4 : index
    %332 = memref.load %arg3[%c27_630, %c4_631] : memref<32x12xf32, #tpu.memory_space<smem>>
    %c27_632 = arith.constant 27 : index
    %c5_633 = arith.constant 5 : index
    %333 = memref.load %arg3[%c27_632, %c5_633] : memref<32x12xf32, #tpu.memory_space<smem>>
    %c27_634 = arith.constant 27 : index
    %c6_635 = arith.constant 6 : index
    %334 = memref.load %arg3[%c27_634, %c6_635] : memref<32x12xf32, #tpu.memory_space<smem>>
    %c27_636 = arith.constant 27 : index
    %c7_637 = arith.constant 7 : index
    %335 = memref.load %arg3[%c27_636, %c7_637] : memref<32x12xf32, #tpu.memory_space<smem>>
    %c27_638 = arith.constant 27 : index
    %c8_639 = arith.constant 8 : index
    %336 = memref.load %arg3[%c27_638, %c8_639] : memref<32x12xf32, #tpu.memory_space<smem>>
    %c27_640 = arith.constant 27 : index
    %c9_641 = arith.constant 9 : index
    %337 = memref.load %arg3[%c27_640, %c9_641] : memref<32x12xf32, #tpu.memory_space<smem>>
    %c27_642 = arith.constant 27 : index
    %c10_643 = arith.constant 10 : index
    %338 = memref.load %arg3[%c27_642, %c10_643] : memref<32x12xf32, #tpu.memory_space<smem>>
    %c27_644 = arith.constant 27 : index
    %c11_645 = arith.constant 11 : index
    %339 = memref.load %arg3[%c27_644, %c11_645] : memref<32x12xf32, #tpu.memory_space<smem>>
    %c28 = arith.constant 28 : index
    %c0_646 = arith.constant 0 : index
    %340 = memref.load %arg3[%c28, %c0_646] : memref<32x12xf32, #tpu.memory_space<smem>>
    %c28_647 = arith.constant 28 : index
    %c1_648 = arith.constant 1 : index
    %341 = memref.load %arg3[%c28_647, %c1_648] : memref<32x12xf32, #tpu.memory_space<smem>>
    %c28_649 = arith.constant 28 : index
    %c2_650 = arith.constant 2 : index
    %342 = memref.load %arg3[%c28_649, %c2_650] : memref<32x12xf32, #tpu.memory_space<smem>>
    %c28_651 = arith.constant 28 : index
    %c3_652 = arith.constant 3 : index
    %343 = memref.load %arg3[%c28_651, %c3_652] : memref<32x12xf32, #tpu.memory_space<smem>>
    %c28_653 = arith.constant 28 : index
    %c4_654 = arith.constant 4 : index
    %344 = memref.load %arg3[%c28_653, %c4_654] : memref<32x12xf32, #tpu.memory_space<smem>>
    %c28_655 = arith.constant 28 : index
    %c5_656 = arith.constant 5 : index
    %345 = memref.load %arg3[%c28_655, %c5_656] : memref<32x12xf32, #tpu.memory_space<smem>>
    %c28_657 = arith.constant 28 : index
    %c6_658 = arith.constant 6 : index
    %346 = memref.load %arg3[%c28_657, %c6_658] : memref<32x12xf32, #tpu.memory_space<smem>>
    %c28_659 = arith.constant 28 : index
    %c7_660 = arith.constant 7 : index
    %347 = memref.load %arg3[%c28_659, %c7_660] : memref<32x12xf32, #tpu.memory_space<smem>>
    %c28_661 = arith.constant 28 : index
    %c8_662 = arith.constant 8 : index
    %348 = memref.load %arg3[%c28_661, %c8_662] : memref<32x12xf32, #tpu.memory_space<smem>>
    %c28_663 = arith.constant 28 : index
    %c9_664 = arith.constant 9 : index
    %349 = memref.load %arg3[%c28_663, %c9_664] : memref<32x12xf32, #tpu.memory_space<smem>>
    %c28_665 = arith.constant 28 : index
    %c10_666 = arith.constant 10 : index
    %350 = memref.load %arg3[%c28_665, %c10_666] : memref<32x12xf32, #tpu.memory_space<smem>>
    %c28_667 = arith.constant 28 : index
    %c11_668 = arith.constant 11 : index
    %351 = memref.load %arg3[%c28_667, %c11_668] : memref<32x12xf32, #tpu.memory_space<smem>>
    %c29 = arith.constant 29 : index
    %c0_669 = arith.constant 0 : index
    %352 = memref.load %arg3[%c29, %c0_669] : memref<32x12xf32, #tpu.memory_space<smem>>
    %c29_670 = arith.constant 29 : index
    %c1_671 = arith.constant 1 : index
    %353 = memref.load %arg3[%c29_670, %c1_671] : memref<32x12xf32, #tpu.memory_space<smem>>
    %c29_672 = arith.constant 29 : index
    %c2_673 = arith.constant 2 : index
    %354 = memref.load %arg3[%c29_672, %c2_673] : memref<32x12xf32, #tpu.memory_space<smem>>
    %c29_674 = arith.constant 29 : index
    %c3_675 = arith.constant 3 : index
    %355 = memref.load %arg3[%c29_674, %c3_675] : memref<32x12xf32, #tpu.memory_space<smem>>
    %c29_676 = arith.constant 29 : index
    %c4_677 = arith.constant 4 : index
    %356 = memref.load %arg3[%c29_676, %c4_677] : memref<32x12xf32, #tpu.memory_space<smem>>
    %c29_678 = arith.constant 29 : index
    %c5_679 = arith.constant 5 : index
    %357 = memref.load %arg3[%c29_678, %c5_679] : memref<32x12xf32, #tpu.memory_space<smem>>
    %c29_680 = arith.constant 29 : index
    %c6_681 = arith.constant 6 : index
    %358 = memref.load %arg3[%c29_680, %c6_681] : memref<32x12xf32, #tpu.memory_space<smem>>
    %c29_682 = arith.constant 29 : index
    %c7_683 = arith.constant 7 : index
    %359 = memref.load %arg3[%c29_682, %c7_683] : memref<32x12xf32, #tpu.memory_space<smem>>
    %c29_684 = arith.constant 29 : index
    %c8_685 = arith.constant 8 : index
    %360 = memref.load %arg3[%c29_684, %c8_685] : memref<32x12xf32, #tpu.memory_space<smem>>
    %c29_686 = arith.constant 29 : index
    %c9_687 = arith.constant 9 : index
    %361 = memref.load %arg3[%c29_686, %c9_687] : memref<32x12xf32, #tpu.memory_space<smem>>
    %c29_688 = arith.constant 29 : index
    %c10_689 = arith.constant 10 : index
    %362 = memref.load %arg3[%c29_688, %c10_689] : memref<32x12xf32, #tpu.memory_space<smem>>
    %c29_690 = arith.constant 29 : index
    %c11_691 = arith.constant 11 : index
    %363 = memref.load %arg3[%c29_690, %c11_691] : memref<32x12xf32, #tpu.memory_space<smem>>
    %c30 = arith.constant 30 : index
    %c0_692 = arith.constant 0 : index
    %364 = memref.load %arg3[%c30, %c0_692] : memref<32x12xf32, #tpu.memory_space<smem>>
    %c30_693 = arith.constant 30 : index
    %c1_694 = arith.constant 1 : index
    %365 = memref.load %arg3[%c30_693, %c1_694] : memref<32x12xf32, #tpu.memory_space<smem>>
    %c30_695 = arith.constant 30 : index
    %c2_696 = arith.constant 2 : index
    %366 = memref.load %arg3[%c30_695, %c2_696] : memref<32x12xf32, #tpu.memory_space<smem>>
    %c30_697 = arith.constant 30 : index
    %c3_698 = arith.constant 3 : index
    %367 = memref.load %arg3[%c30_697, %c3_698] : memref<32x12xf32, #tpu.memory_space<smem>>
    %c30_699 = arith.constant 30 : index
    %c4_700 = arith.constant 4 : index
    %368 = memref.load %arg3[%c30_699, %c4_700] : memref<32x12xf32, #tpu.memory_space<smem>>
    %c30_701 = arith.constant 30 : index
    %c5_702 = arith.constant 5 : index
    %369 = memref.load %arg3[%c30_701, %c5_702] : memref<32x12xf32, #tpu.memory_space<smem>>
    %c30_703 = arith.constant 30 : index
    %c6_704 = arith.constant 6 : index
    %370 = memref.load %arg3[%c30_703, %c6_704] : memref<32x12xf32, #tpu.memory_space<smem>>
    %c30_705 = arith.constant 30 : index
    %c7_706 = arith.constant 7 : index
    %371 = memref.load %arg3[%c30_705, %c7_706] : memref<32x12xf32, #tpu.memory_space<smem>>
    %c30_707 = arith.constant 30 : index
    %c8_708 = arith.constant 8 : index
    %372 = memref.load %arg3[%c30_707, %c8_708] : memref<32x12xf32, #tpu.memory_space<smem>>
    %c30_709 = arith.constant 30 : index
    %c9_710 = arith.constant 9 : index
    %373 = memref.load %arg3[%c30_709, %c9_710] : memref<32x12xf32, #tpu.memory_space<smem>>
    %c30_711 = arith.constant 30 : index
    %c10_712 = arith.constant 10 : index
    %374 = memref.load %arg3[%c30_711, %c10_712] : memref<32x12xf32, #tpu.memory_space<smem>>
    %c30_713 = arith.constant 30 : index
    %c11_714 = arith.constant 11 : index
    %375 = memref.load %arg3[%c30_713, %c11_714] : memref<32x12xf32, #tpu.memory_space<smem>>
    %c31 = arith.constant 31 : index
    %c0_715 = arith.constant 0 : index
    %376 = memref.load %arg3[%c31, %c0_715] : memref<32x12xf32, #tpu.memory_space<smem>>
    %c31_716 = arith.constant 31 : index
    %c1_717 = arith.constant 1 : index
    %377 = memref.load %arg3[%c31_716, %c1_717] : memref<32x12xf32, #tpu.memory_space<smem>>
    %c31_718 = arith.constant 31 : index
    %c2_719 = arith.constant 2 : index
    %378 = memref.load %arg3[%c31_718, %c2_719] : memref<32x12xf32, #tpu.memory_space<smem>>
    %c31_720 = arith.constant 31 : index
    %c3_721 = arith.constant 3 : index
    %379 = memref.load %arg3[%c31_720, %c3_721] : memref<32x12xf32, #tpu.memory_space<smem>>
    %c31_722 = arith.constant 31 : index
    %c4_723 = arith.constant 4 : index
    %380 = memref.load %arg3[%c31_722, %c4_723] : memref<32x12xf32, #tpu.memory_space<smem>>
    %c31_724 = arith.constant 31 : index
    %c5_725 = arith.constant 5 : index
    %381 = memref.load %arg3[%c31_724, %c5_725] : memref<32x12xf32, #tpu.memory_space<smem>>
    %c31_726 = arith.constant 31 : index
    %c6_727 = arith.constant 6 : index
    %382 = memref.load %arg3[%c31_726, %c6_727] : memref<32x12xf32, #tpu.memory_space<smem>>
    %c31_728 = arith.constant 31 : index
    %c7_729 = arith.constant 7 : index
    %383 = memref.load %arg3[%c31_728, %c7_729] : memref<32x12xf32, #tpu.memory_space<smem>>
    %c31_730 = arith.constant 31 : index
    %c8_731 = arith.constant 8 : index
    %384 = memref.load %arg3[%c31_730, %c8_731] : memref<32x12xf32, #tpu.memory_space<smem>>
    %c31_732 = arith.constant 31 : index
    %c9_733 = arith.constant 9 : index
    %385 = memref.load %arg3[%c31_732, %c9_733] : memref<32x12xf32, #tpu.memory_space<smem>>
    %c31_734 = arith.constant 31 : index
    %c10_735 = arith.constant 10 : index
    %386 = memref.load %arg3[%c31_734, %c10_735] : memref<32x12xf32, #tpu.memory_space<smem>>
    %c31_736 = arith.constant 31 : index
    %c11_737 = arith.constant 11 : index
    %387 = memref.load %arg3[%c31_736, %c11_737] : memref<32x12xf32, #tpu.memory_space<smem>>
    %c0_i32 = arith.constant 0 : i32
    %c8_i32_738 = arith.constant 8 : i32
    %388 = arith.muli %c0_i32, %c8_i32_738 : i32
    %389 = tpu.assume_multiple %388, 8 : i32
    %390 = arith.addi %2, %389 : i32
    %391 = tpu.iota {dimensions = array<i32: 0>} : vector<8x8xi32>
    %392 = vector.broadcast %390 : i32 to vector<8x8xi32>
    %393 = arith.addi %392, %391 : vector<8x8xi32>
    %394 = tpu.iota {dimensions = array<i32: 1>} : vector<8x8xi32>
    %395 = vector.broadcast %3 : i32 to vector<8x8xi32>
    %396 = arith.addi %395, %394 : vector<8x8xi32>
    %397 = arith.subi %393, %396 : vector<8x8xi32>
    %c0_i32_739 = arith.constant 0 : i32
    %398 = vector.broadcast %c0_i32_739 : i32 to vector<8x8xi32>
    %399 = arith.cmpi slt, %397, %398 : vector<8x8xi32>
    %400 = arith.extui %399 : vector<8x8xi1> to vector<8x8xi32>
    %c16_i32 = arith.constant 16 : i32
    %401 = vector.broadcast %c16_i32 : i32 to vector<8x8xi32>
    %402 = arith.muli %400, %401 : vector<8x8xi32>
    %403 = math.absi %397 : vector<8x8xi32>
    %c8_i32_740 = arith.constant 8 : i32
    %404 = vector.broadcast %c8_i32_740 : i32 to vector<8x8xi32>
    %405 = arith.cmpi slt, %403, %404 : vector<8x8xi32>
    %c8_i32_741 = arith.constant 8 : i32
    %406 = vector.broadcast %c8_i32_741 : i32 to vector<8x8xi32>
    %407 = arith.maxsi %403, %406 : vector<8x8xi32>
    %408 = arith.sitofp %407 : vector<8x8xi32> to vector<8x8xf32>
    %cst = arith.constant 8.000000e+00 : f32
    %409 = vector.broadcast %cst : f32 to vector<8x8xf32>
    %410 = arith.divf %408, %409 : vector<8x8xf32>
    %411 = math.log %410 : vector<8x8xf32>
    %cst_742 = arith.constant 2.77258873 : f32
    %412 = vector.broadcast %cst_742 : f32 to vector<8x8xf32>
    %413 = arith.divf %411, %412 : vector<8x8xf32>
    %cst_743 = arith.constant 8.000000e+00 : f32
    %414 = vector.broadcast %cst_743 : f32 to vector<8x8xf32>
    %415 = arith.mulf %413, %414 : vector<8x8xf32>
    %416 = arith.fptosi %415 : vector<8x8xf32> to vector<8x8xi32>
    %c8_i32_744 = arith.constant 8 : i32
    %417 = vector.broadcast %c8_i32_744 : i32 to vector<8x8xi32>
    %418 = arith.addi %417, %416 : vector<8x8xi32>
    %c15_i32 = arith.constant 15 : i32
    %419 = vector.broadcast %c15_i32 : i32 to vector<8x8xi32>
    %420 = arith.minsi %418, %419 : vector<8x8xi32>
    %421 = arith.select %405, %403, %420 : vector<8x8xi1>, vector<8x8xi32>
    %422 = arith.addi %402, %421 : vector<8x8xi32>
    %423 = vector.broadcast %4 : f32 to vector<8x8xf32>
    %424 = vector.broadcast %5 : f32 to vector<8x8xf32>
    %425 = vector.broadcast %6 : f32 to vector<8x8xf32>
    %426 = vector.broadcast %7 : f32 to vector<8x8xf32>
    %427 = vector.broadcast %8 : f32 to vector<8x8xf32>
    %428 = vector.broadcast %9 : f32 to vector<8x8xf32>
    %429 = vector.broadcast %10 : f32 to vector<8x8xf32>
    %430 = vector.broadcast %11 : f32 to vector<8x8xf32>
    %431 = vector.broadcast %12 : f32 to vector<8x8xf32>
    %432 = vector.broadcast %13 : f32 to vector<8x8xf32>
    %433 = vector.broadcast %14 : f32 to vector<8x8xf32>
    %434 = vector.broadcast %15 : f32 to vector<8x8xf32>
    %c1_i32 = arith.constant 1 : i32
    %435 = vector.broadcast %c1_i32 : i32 to vector<8x8xi32>
    %436 = arith.cmpi eq, %422, %435 : vector<8x8xi32>
    %437 = vector.broadcast %16 : f32 to vector<8x8xf32>
    %438 = arith.select %436, %437, %423 : vector<8x8xi1>, vector<8x8xf32>
    %439 = vector.broadcast %17 : f32 to vector<8x8xf32>
    %440 = arith.select %436, %439, %424 : vector<8x8xi1>, vector<8x8xf32>
    %441 = vector.broadcast %18 : f32 to vector<8x8xf32>
    %442 = arith.select %436, %441, %425 : vector<8x8xi1>, vector<8x8xf32>
    %443 = vector.broadcast %19 : f32 to vector<8x8xf32>
    %444 = arith.select %436, %443, %426 : vector<8x8xi1>, vector<8x8xf32>
    %445 = vector.broadcast %20 : f32 to vector<8x8xf32>
    %446 = arith.select %436, %445, %427 : vector<8x8xi1>, vector<8x8xf32>
    %447 = vector.broadcast %21 : f32 to vector<8x8xf32>
    %448 = arith.select %436, %447, %428 : vector<8x8xi1>, vector<8x8xf32>
    %449 = vector.broadcast %22 : f32 to vector<8x8xf32>
    %450 = arith.select %436, %449, %429 : vector<8x8xi1>, vector<8x8xf32>
    %451 = vector.broadcast %23 : f32 to vector<8x8xf32>
    %452 = arith.select %436, %451, %430 : vector<8x8xi1>, vector<8x8xf32>
    %453 = vector.broadcast %24 : f32 to vector<8x8xf32>
    %454 = arith.select %436, %453, %431 : vector<8x8xi1>, vector<8x8xf32>
    %455 = vector.broadcast %25 : f32 to vector<8x8xf32>
    %456 = arith.select %436, %455, %432 : vector<8x8xi1>, vector<8x8xf32>
    %457 = vector.broadcast %26 : f32 to vector<8x8xf32>
    %458 = arith.select %436, %457, %433 : vector<8x8xi1>, vector<8x8xf32>
    %459 = vector.broadcast %27 : f32 to vector<8x8xf32>
    %460 = arith.select %436, %459, %434 : vector<8x8xi1>, vector<8x8xf32>
    %c2_i32 = arith.constant 2 : i32
    %461 = vector.broadcast %c2_i32 : i32 to vector<8x8xi32>
    %462 = arith.cmpi eq, %422, %461 : vector<8x8xi32>
    %463 = vector.broadcast %28 : f32 to vector<8x8xf32>
    %464 = arith.select %462, %463, %438 : vector<8x8xi1>, vector<8x8xf32>
    %465 = vector.broadcast %29 : f32 to vector<8x8xf32>
    %466 = arith.select %462, %465, %440 : vector<8x8xi1>, vector<8x8xf32>
    %467 = vector.broadcast %30 : f32 to vector<8x8xf32>
    %468 = arith.select %462, %467, %442 : vector<8x8xi1>, vector<8x8xf32>
    %469 = vector.broadcast %31 : f32 to vector<8x8xf32>
    %470 = arith.select %462, %469, %444 : vector<8x8xi1>, vector<8x8xf32>
    %471 = vector.broadcast %32 : f32 to vector<8x8xf32>
    %472 = arith.select %462, %471, %446 : vector<8x8xi1>, vector<8x8xf32>
    %473 = vector.broadcast %33 : f32 to vector<8x8xf32>
    %474 = arith.select %462, %473, %448 : vector<8x8xi1>, vector<8x8xf32>
    %475 = vector.broadcast %34 : f32 to vector<8x8xf32>
    %476 = arith.select %462, %475, %450 : vector<8x8xi1>, vector<8x8xf32>
    %477 = vector.broadcast %35 : f32 to vector<8x8xf32>
    %478 = arith.select %462, %477, %452 : vector<8x8xi1>, vector<8x8xf32>
    %479 = vector.broadcast %36 : f32 to vector<8x8xf32>
    %480 = arith.select %462, %479, %454 : vector<8x8xi1>, vector<8x8xf32>
    %481 = vector.broadcast %37 : f32 to vector<8x8xf32>
    %482 = arith.select %462, %481, %456 : vector<8x8xi1>, vector<8x8xf32>
    %483 = vector.broadcast %38 : f32 to vector<8x8xf32>
    %484 = arith.select %462, %483, %458 : vector<8x8xi1>, vector<8x8xf32>
    %485 = vector.broadcast %39 : f32 to vector<8x8xf32>
    %486 = arith.select %462, %485, %460 : vector<8x8xi1>, vector<8x8xf32>
    %c3_i32 = arith.constant 3 : i32
    %487 = vector.broadcast %c3_i32 : i32 to vector<8x8xi32>
    %488 = arith.cmpi eq, %422, %487 : vector<8x8xi32>
    %489 = vector.broadcast %40 : f32 to vector<8x8xf32>
    %490 = arith.select %488, %489, %464 : vector<8x8xi1>, vector<8x8xf32>
    %491 = vector.broadcast %41 : f32 to vector<8x8xf32>
    %492 = arith.select %488, %491, %466 : vector<8x8xi1>, vector<8x8xf32>
    %493 = vector.broadcast %42 : f32 to vector<8x8xf32>
    %494 = arith.select %488, %493, %468 : vector<8x8xi1>, vector<8x8xf32>
    %495 = vector.broadcast %43 : f32 to vector<8x8xf32>
    %496 = arith.select %488, %495, %470 : vector<8x8xi1>, vector<8x8xf32>
    %497 = vector.broadcast %44 : f32 to vector<8x8xf32>
    %498 = arith.select %488, %497, %472 : vector<8x8xi1>, vector<8x8xf32>
    %499 = vector.broadcast %45 : f32 to vector<8x8xf32>
    %500 = arith.select %488, %499, %474 : vector<8x8xi1>, vector<8x8xf32>
    %501 = vector.broadcast %46 : f32 to vector<8x8xf32>
    %502 = arith.select %488, %501, %476 : vector<8x8xi1>, vector<8x8xf32>
    %503 = vector.broadcast %47 : f32 to vector<8x8xf32>
    %504 = arith.select %488, %503, %478 : vector<8x8xi1>, vector<8x8xf32>
    %505 = vector.broadcast %48 : f32 to vector<8x8xf32>
    %506 = arith.select %488, %505, %480 : vector<8x8xi1>, vector<8x8xf32>
    %507 = vector.broadcast %49 : f32 to vector<8x8xf32>
    %508 = arith.select %488, %507, %482 : vector<8x8xi1>, vector<8x8xf32>
    %509 = vector.broadcast %50 : f32 to vector<8x8xf32>
    %510 = arith.select %488, %509, %484 : vector<8x8xi1>, vector<8x8xf32>
    %511 = vector.broadcast %51 : f32 to vector<8x8xf32>
    %512 = arith.select %488, %511, %486 : vector<8x8xi1>, vector<8x8xf32>
    %c4_i32 = arith.constant 4 : i32
    %513 = vector.broadcast %c4_i32 : i32 to vector<8x8xi32>
    %514 = arith.cmpi eq, %422, %513 : vector<8x8xi32>
    %515 = vector.broadcast %52 : f32 to vector<8x8xf32>
    %516 = arith.select %514, %515, %490 : vector<8x8xi1>, vector<8x8xf32>
    %517 = vector.broadcast %53 : f32 to vector<8x8xf32>
    %518 = arith.select %514, %517, %492 : vector<8x8xi1>, vector<8x8xf32>
    %519 = vector.broadcast %54 : f32 to vector<8x8xf32>
    %520 = arith.select %514, %519, %494 : vector<8x8xi1>, vector<8x8xf32>
    %521 = vector.broadcast %55 : f32 to vector<8x8xf32>
    %522 = arith.select %514, %521, %496 : vector<8x8xi1>, vector<8x8xf32>
    %523 = vector.broadcast %56 : f32 to vector<8x8xf32>
    %524 = arith.select %514, %523, %498 : vector<8x8xi1>, vector<8x8xf32>
    %525 = vector.broadcast %57 : f32 to vector<8x8xf32>
    %526 = arith.select %514, %525, %500 : vector<8x8xi1>, vector<8x8xf32>
    %527 = vector.broadcast %58 : f32 to vector<8x8xf32>
    %528 = arith.select %514, %527, %502 : vector<8x8xi1>, vector<8x8xf32>
    %529 = vector.broadcast %59 : f32 to vector<8x8xf32>
    %530 = arith.select %514, %529, %504 : vector<8x8xi1>, vector<8x8xf32>
    %531 = vector.broadcast %60 : f32 to vector<8x8xf32>
    %532 = arith.select %514, %531, %506 : vector<8x8xi1>, vector<8x8xf32>
    %533 = vector.broadcast %61 : f32 to vector<8x8xf32>
    %534 = arith.select %514, %533, %508 : vector<8x8xi1>, vector<8x8xf32>
    %535 = vector.broadcast %62 : f32 to vector<8x8xf32>
    %536 = arith.select %514, %535, %510 : vector<8x8xi1>, vector<8x8xf32>
    %537 = vector.broadcast %63 : f32 to vector<8x8xf32>
    %538 = arith.select %514, %537, %512 : vector<8x8xi1>, vector<8x8xf32>
    %c5_i32 = arith.constant 5 : i32
    %539 = vector.broadcast %c5_i32 : i32 to vector<8x8xi32>
    %540 = arith.cmpi eq, %422, %539 : vector<8x8xi32>
    %541 = vector.broadcast %64 : f32 to vector<8x8xf32>
    %542 = arith.select %540, %541, %516 : vector<8x8xi1>, vector<8x8xf32>
    %543 = vector.broadcast %65 : f32 to vector<8x8xf32>
    %544 = arith.select %540, %543, %518 : vector<8x8xi1>, vector<8x8xf32>
    %545 = vector.broadcast %66 : f32 to vector<8x8xf32>
    %546 = arith.select %540, %545, %520 : vector<8x8xi1>, vector<8x8xf32>
    %547 = vector.broadcast %67 : f32 to vector<8x8xf32>
    %548 = arith.select %540, %547, %522 : vector<8x8xi1>, vector<8x8xf32>
    %549 = vector.broadcast %68 : f32 to vector<8x8xf32>
    %550 = arith.select %540, %549, %524 : vector<8x8xi1>, vector<8x8xf32>
    %551 = vector.broadcast %69 : f32 to vector<8x8xf32>
    %552 = arith.select %540, %551, %526 : vector<8x8xi1>, vector<8x8xf32>
    %553 = vector.broadcast %70 : f32 to vector<8x8xf32>
    %554 = arith.select %540, %553, %528 : vector<8x8xi1>, vector<8x8xf32>
    %555 = vector.broadcast %71 : f32 to vector<8x8xf32>
    %556 = arith.select %540, %555, %530 : vector<8x8xi1>, vector<8x8xf32>
    %557 = vector.broadcast %72 : f32 to vector<8x8xf32>
    %558 = arith.select %540, %557, %532 : vector<8x8xi1>, vector<8x8xf32>
    %559 = vector.broadcast %73 : f32 to vector<8x8xf32>
    %560 = arith.select %540, %559, %534 : vector<8x8xi1>, vector<8x8xf32>
    %561 = vector.broadcast %74 : f32 to vector<8x8xf32>
    %562 = arith.select %540, %561, %536 : vector<8x8xi1>, vector<8x8xf32>
    %563 = vector.broadcast %75 : f32 to vector<8x8xf32>
    %564 = arith.select %540, %563, %538 : vector<8x8xi1>, vector<8x8xf32>
    %c6_i32 = arith.constant 6 : i32
    %565 = vector.broadcast %c6_i32 : i32 to vector<8x8xi32>
    %566 = arith.cmpi eq, %422, %565 : vector<8x8xi32>
    %567 = vector.broadcast %76 : f32 to vector<8x8xf32>
    %568 = arith.select %566, %567, %542 : vector<8x8xi1>, vector<8x8xf32>
    %569 = vector.broadcast %77 : f32 to vector<8x8xf32>
    %570 = arith.select %566, %569, %544 : vector<8x8xi1>, vector<8x8xf32>
    %571 = vector.broadcast %78 : f32 to vector<8x8xf32>
    %572 = arith.select %566, %571, %546 : vector<8x8xi1>, vector<8x8xf32>
    %573 = vector.broadcast %79 : f32 to vector<8x8xf32>
    %574 = arith.select %566, %573, %548 : vector<8x8xi1>, vector<8x8xf32>
    %575 = vector.broadcast %80 : f32 to vector<8x8xf32>
    %576 = arith.select %566, %575, %550 : vector<8x8xi1>, vector<8x8xf32>
    %577 = vector.broadcast %81 : f32 to vector<8x8xf32>
    %578 = arith.select %566, %577, %552 : vector<8x8xi1>, vector<8x8xf32>
    %579 = vector.broadcast %82 : f32 to vector<8x8xf32>
    %580 = arith.select %566, %579, %554 : vector<8x8xi1>, vector<8x8xf32>
    %581 = vector.broadcast %83 : f32 to vector<8x8xf32>
    %582 = arith.select %566, %581, %556 : vector<8x8xi1>, vector<8x8xf32>
    %583 = vector.broadcast %84 : f32 to vector<8x8xf32>
    %584 = arith.select %566, %583, %558 : vector<8x8xi1>, vector<8x8xf32>
    %585 = vector.broadcast %85 : f32 to vector<8x8xf32>
    %586 = arith.select %566, %585, %560 : vector<8x8xi1>, vector<8x8xf32>
    %587 = vector.broadcast %86 : f32 to vector<8x8xf32>
    %588 = arith.select %566, %587, %562 : vector<8x8xi1>, vector<8x8xf32>
    %589 = vector.broadcast %87 : f32 to vector<8x8xf32>
    %590 = arith.select %566, %589, %564 : vector<8x8xi1>, vector<8x8xf32>
    %c7_i32 = arith.constant 7 : i32
    %591 = vector.broadcast %c7_i32 : i32 to vector<8x8xi32>
    %592 = arith.cmpi eq, %422, %591 : vector<8x8xi32>
    %593 = vector.broadcast %88 : f32 to vector<8x8xf32>
    %594 = arith.select %592, %593, %568 : vector<8x8xi1>, vector<8x8xf32>
    %595 = vector.broadcast %89 : f32 to vector<8x8xf32>
    %596 = arith.select %592, %595, %570 : vector<8x8xi1>, vector<8x8xf32>
    %597 = vector.broadcast %90 : f32 to vector<8x8xf32>
    %598 = arith.select %592, %597, %572 : vector<8x8xi1>, vector<8x8xf32>
    %599 = vector.broadcast %91 : f32 to vector<8x8xf32>
    %600 = arith.select %592, %599, %574 : vector<8x8xi1>, vector<8x8xf32>
    %601 = vector.broadcast %92 : f32 to vector<8x8xf32>
    %602 = arith.select %592, %601, %576 : vector<8x8xi1>, vector<8x8xf32>
    %603 = vector.broadcast %93 : f32 to vector<8x8xf32>
    %604 = arith.select %592, %603, %578 : vector<8x8xi1>, vector<8x8xf32>
    %605 = vector.broadcast %94 : f32 to vector<8x8xf32>
    %606 = arith.select %592, %605, %580 : vector<8x8xi1>, vector<8x8xf32>
    %607 = vector.broadcast %95 : f32 to vector<8x8xf32>
    %608 = arith.select %592, %607, %582 : vector<8x8xi1>, vector<8x8xf32>
    %609 = vector.broadcast %96 : f32 to vector<8x8xf32>
    %610 = arith.select %592, %609, %584 : vector<8x8xi1>, vector<8x8xf32>
    %611 = vector.broadcast %97 : f32 to vector<8x8xf32>
    %612 = arith.select %592, %611, %586 : vector<8x8xi1>, vector<8x8xf32>
    %613 = vector.broadcast %98 : f32 to vector<8x8xf32>
    %614 = arith.select %592, %613, %588 : vector<8x8xi1>, vector<8x8xf32>
    %615 = vector.broadcast %99 : f32 to vector<8x8xf32>
    %616 = arith.select %592, %615, %590 : vector<8x8xi1>, vector<8x8xf32>
    %c8_i32_745 = arith.constant 8 : i32
    %617 = vector.broadcast %c8_i32_745 : i32 to vector<8x8xi32>
    %618 = arith.cmpi eq, %422, %617 : vector<8x8xi32>
    %619 = vector.broadcast %100 : f32 to vector<8x8xf32>
    %620 = arith.select %618, %619, %594 : vector<8x8xi1>, vector<8x8xf32>
    %621 = vector.broadcast %101 : f32 to vector<8x8xf32>
    %622 = arith.select %618, %621, %596 : vector<8x8xi1>, vector<8x8xf32>
    %623 = vector.broadcast %102 : f32 to vector<8x8xf32>
    %624 = arith.select %618, %623, %598 : vector<8x8xi1>, vector<8x8xf32>
    %625 = vector.broadcast %103 : f32 to vector<8x8xf32>
    %626 = arith.select %618, %625, %600 : vector<8x8xi1>, vector<8x8xf32>
    %627 = vector.broadcast %104 : f32 to vector<8x8xf32>
    %628 = arith.select %618, %627, %602 : vector<8x8xi1>, vector<8x8xf32>
    %629 = vector.broadcast %105 : f32 to vector<8x8xf32>
    %630 = arith.select %618, %629, %604 : vector<8x8xi1>, vector<8x8xf32>
    %631 = vector.broadcast %106 : f32 to vector<8x8xf32>
    %632 = arith.select %618, %631, %606 : vector<8x8xi1>, vector<8x8xf32>
    %633 = vector.broadcast %107 : f32 to vector<8x8xf32>
    %634 = arith.select %618, %633, %608 : vector<8x8xi1>, vector<8x8xf32>
    %635 = vector.broadcast %108 : f32 to vector<8x8xf32>
    %636 = arith.select %618, %635, %610 : vector<8x8xi1>, vector<8x8xf32>
    %637 = vector.broadcast %109 : f32 to vector<8x8xf32>
    %638 = arith.select %618, %637, %612 : vector<8x8xi1>, vector<8x8xf32>
    %639 = vector.broadcast %110 : f32 to vector<8x8xf32>
    %640 = arith.select %618, %639, %614 : vector<8x8xi1>, vector<8x8xf32>
    %641 = vector.broadcast %111 : f32 to vector<8x8xf32>
    %642 = arith.select %618, %641, %616 : vector<8x8xi1>, vector<8x8xf32>
    %c9_i32 = arith.constant 9 : i32
    %643 = vector.broadcast %c9_i32 : i32 to vector<8x8xi32>
    %644 = arith.cmpi eq, %422, %643 : vector<8x8xi32>
    %645 = vector.broadcast %112 : f32 to vector<8x8xf32>
    %646 = arith.select %644, %645, %620 : vector<8x8xi1>, vector<8x8xf32>
    %647 = vector.broadcast %113 : f32 to vector<8x8xf32>
    %648 = arith.select %644, %647, %622 : vector<8x8xi1>, vector<8x8xf32>
    %649 = vector.broadcast %114 : f32 to vector<8x8xf32>
    %650 = arith.select %644, %649, %624 : vector<8x8xi1>, vector<8x8xf32>
    %651 = vector.broadcast %115 : f32 to vector<8x8xf32>
    %652 = arith.select %644, %651, %626 : vector<8x8xi1>, vector<8x8xf32>
    %653 = vector.broadcast %116 : f32 to vector<8x8xf32>
    %654 = arith.select %644, %653, %628 : vector<8x8xi1>, vector<8x8xf32>
    %655 = vector.broadcast %117 : f32 to vector<8x8xf32>
    %656 = arith.select %644, %655, %630 : vector<8x8xi1>, vector<8x8xf32>
    %657 = vector.broadcast %118 : f32 to vector<8x8xf32>
    %658 = arith.select %644, %657, %632 : vector<8x8xi1>, vector<8x8xf32>
    %659 = vector.broadcast %119 : f32 to vector<8x8xf32>
    %660 = arith.select %644, %659, %634 : vector<8x8xi1>, vector<8x8xf32>
    %661 = vector.broadcast %120 : f32 to vector<8x8xf32>
    %662 = arith.select %644, %661, %636 : vector<8x8xi1>, vector<8x8xf32>
    %663 = vector.broadcast %121 : f32 to vector<8x8xf32>
    %664 = arith.select %644, %663, %638 : vector<8x8xi1>, vector<8x8xf32>
    %665 = vector.broadcast %122 : f32 to vector<8x8xf32>
    %666 = arith.select %644, %665, %640 : vector<8x8xi1>, vector<8x8xf32>
    %667 = vector.broadcast %123 : f32 to vector<8x8xf32>
    %668 = arith.select %644, %667, %642 : vector<8x8xi1>, vector<8x8xf32>
    %c10_i32 = arith.constant 10 : i32
    %669 = vector.broadcast %c10_i32 : i32 to vector<8x8xi32>
    %670 = arith.cmpi eq, %422, %669 : vector<8x8xi32>
    %671 = vector.broadcast %124 : f32 to vector<8x8xf32>
    %672 = arith.select %670, %671, %646 : vector<8x8xi1>, vector<8x8xf32>
    %673 = vector.broadcast %125 : f32 to vector<8x8xf32>
    %674 = arith.select %670, %673, %648 : vector<8x8xi1>, vector<8x8xf32>
    %675 = vector.broadcast %126 : f32 to vector<8x8xf32>
    %676 = arith.select %670, %675, %650 : vector<8x8xi1>, vector<8x8xf32>
    %677 = vector.broadcast %127 : f32 to vector<8x8xf32>
    %678 = arith.select %670, %677, %652 : vector<8x8xi1>, vector<8x8xf32>
    %679 = vector.broadcast %128 : f32 to vector<8x8xf32>
    %680 = arith.select %670, %679, %654 : vector<8x8xi1>, vector<8x8xf32>
    %681 = vector.broadcast %129 : f32 to vector<8x8xf32>
    %682 = arith.select %670, %681, %656 : vector<8x8xi1>, vector<8x8xf32>
    %683 = vector.broadcast %130 : f32 to vector<8x8xf32>
    %684 = arith.select %670, %683, %658 : vector<8x8xi1>, vector<8x8xf32>
    %685 = vector.broadcast %131 : f32 to vector<8x8xf32>
    %686 = arith.select %670, %685, %660 : vector<8x8xi1>, vector<8x8xf32>
    %687 = vector.broadcast %132 : f32 to vector<8x8xf32>
    %688 = arith.select %670, %687, %662 : vector<8x8xi1>, vector<8x8xf32>
    %689 = vector.broadcast %133 : f32 to vector<8x8xf32>
    %690 = arith.select %670, %689, %664 : vector<8x8xi1>, vector<8x8xf32>
    %691 = vector.broadcast %134 : f32 to vector<8x8xf32>
    %692 = arith.select %670, %691, %666 : vector<8x8xi1>, vector<8x8xf32>
    %693 = vector.broadcast %135 : f32 to vector<8x8xf32>
    %694 = arith.select %670, %693, %668 : vector<8x8xi1>, vector<8x8xf32>
    %c11_i32 = arith.constant 11 : i32
    %695 = vector.broadcast %c11_i32 : i32 to vector<8x8xi32>
    %696 = arith.cmpi eq, %422, %695 : vector<8x8xi32>
    %697 = vector.broadcast %136 : f32 to vector<8x8xf32>
    %698 = arith.select %696, %697, %672 : vector<8x8xi1>, vector<8x8xf32>
    %699 = vector.broadcast %137 : f32 to vector<8x8xf32>
    %700 = arith.select %696, %699, %674 : vector<8x8xi1>, vector<8x8xf32>
    %701 = vector.broadcast %138 : f32 to vector<8x8xf32>
    %702 = arith.select %696, %701, %676 : vector<8x8xi1>, vector<8x8xf32>
    %703 = vector.broadcast %139 : f32 to vector<8x8xf32>
    %704 = arith.select %696, %703, %678 : vector<8x8xi1>, vector<8x8xf32>
    %705 = vector.broadcast %140 : f32 to vector<8x8xf32>
    %706 = arith.select %696, %705, %680 : vector<8x8xi1>, vector<8x8xf32>
    %707 = vector.broadcast %141 : f32 to vector<8x8xf32>
    %708 = arith.select %696, %707, %682 : vector<8x8xi1>, vector<8x8xf32>
    %709 = vector.broadcast %142 : f32 to vector<8x8xf32>
    %710 = arith.select %696, %709, %684 : vector<8x8xi1>, vector<8x8xf32>
    %711 = vector.broadcast %143 : f32 to vector<8x8xf32>
    %712 = arith.select %696, %711, %686 : vector<8x8xi1>, vector<8x8xf32>
    %713 = vector.broadcast %144 : f32 to vector<8x8xf32>
    %714 = arith.select %696, %713, %688 : vector<8x8xi1>, vector<8x8xf32>
    %715 = vector.broadcast %145 : f32 to vector<8x8xf32>
    %716 = arith.select %696, %715, %690 : vector<8x8xi1>, vector<8x8xf32>
    %717 = vector.broadcast %146 : f32 to vector<8x8xf32>
    %718 = arith.select %696, %717, %692 : vector<8x8xi1>, vector<8x8xf32>
    %719 = vector.broadcast %147 : f32 to vector<8x8xf32>
    %720 = arith.select %696, %719, %694 : vector<8x8xi1>, vector<8x8xf32>
    %c12_i32 = arith.constant 12 : i32
    %721 = vector.broadcast %c12_i32 : i32 to vector<8x8xi32>
    %722 = arith.cmpi eq, %422, %721 : vector<8x8xi32>
    %723 = vector.broadcast %148 : f32 to vector<8x8xf32>
    %724 = arith.select %722, %723, %698 : vector<8x8xi1>, vector<8x8xf32>
    %725 = vector.broadcast %149 : f32 to vector<8x8xf32>
    %726 = arith.select %722, %725, %700 : vector<8x8xi1>, vector<8x8xf32>
    %727 = vector.broadcast %150 : f32 to vector<8x8xf32>
    %728 = arith.select %722, %727, %702 : vector<8x8xi1>, vector<8x8xf32>
    %729 = vector.broadcast %151 : f32 to vector<8x8xf32>
    %730 = arith.select %722, %729, %704 : vector<8x8xi1>, vector<8x8xf32>
    %731 = vector.broadcast %152 : f32 to vector<8x8xf32>
    %732 = arith.select %722, %731, %706 : vector<8x8xi1>, vector<8x8xf32>
    %733 = vector.broadcast %153 : f32 to vector<8x8xf32>
    %734 = arith.select %722, %733, %708 : vector<8x8xi1>, vector<8x8xf32>
    %735 = vector.broadcast %154 : f32 to vector<8x8xf32>
    %736 = arith.select %722, %735, %710 : vector<8x8xi1>, vector<8x8xf32>
    %737 = vector.broadcast %155 : f32 to vector<8x8xf32>
    %738 = arith.select %722, %737, %712 : vector<8x8xi1>, vector<8x8xf32>
    %739 = vector.broadcast %156 : f32 to vector<8x8xf32>
    %740 = arith.select %722, %739, %714 : vector<8x8xi1>, vector<8x8xf32>
    %741 = vector.broadcast %157 : f32 to vector<8x8xf32>
    %742 = arith.select %722, %741, %716 : vector<8x8xi1>, vector<8x8xf32>
    %743 = vector.broadcast %158 : f32 to vector<8x8xf32>
    %744 = arith.select %722, %743, %718 : vector<8x8xi1>, vector<8x8xf32>
    %745 = vector.broadcast %159 : f32 to vector<8x8xf32>
    %746 = arith.select %722, %745, %720 : vector<8x8xi1>, vector<8x8xf32>
    %c13_i32 = arith.constant 13 : i32
    %747 = vector.broadcast %c13_i32 : i32 to vector<8x8xi32>
    %748 = arith.cmpi eq, %422, %747 : vector<8x8xi32>
    %749 = vector.broadcast %160 : f32 to vector<8x8xf32>
    %750 = arith.select %748, %749, %724 : vector<8x8xi1>, vector<8x8xf32>
    %751 = vector.broadcast %161 : f32 to vector<8x8xf32>
    %752 = arith.select %748, %751, %726 : vector<8x8xi1>, vector<8x8xf32>
    %753 = vector.broadcast %162 : f32 to vector<8x8xf32>
    %754 = arith.select %748, %753, %728 : vector<8x8xi1>, vector<8x8xf32>
    %755 = vector.broadcast %163 : f32 to vector<8x8xf32>
    %756 = arith.select %748, %755, %730 : vector<8x8xi1>, vector<8x8xf32>
    %757 = vector.broadcast %164 : f32 to vector<8x8xf32>
    %758 = arith.select %748, %757, %732 : vector<8x8xi1>, vector<8x8xf32>
    %759 = vector.broadcast %165 : f32 to vector<8x8xf32>
    %760 = arith.select %748, %759, %734 : vector<8x8xi1>, vector<8x8xf32>
    %761 = vector.broadcast %166 : f32 to vector<8x8xf32>
    %762 = arith.select %748, %761, %736 : vector<8x8xi1>, vector<8x8xf32>
    %763 = vector.broadcast %167 : f32 to vector<8x8xf32>
    %764 = arith.select %748, %763, %738 : vector<8x8xi1>, vector<8x8xf32>
    %765 = vector.broadcast %168 : f32 to vector<8x8xf32>
    %766 = arith.select %748, %765, %740 : vector<8x8xi1>, vector<8x8xf32>
    %767 = vector.broadcast %169 : f32 to vector<8x8xf32>
    %768 = arith.select %748, %767, %742 : vector<8x8xi1>, vector<8x8xf32>
    %769 = vector.broadcast %170 : f32 to vector<8x8xf32>
    %770 = arith.select %748, %769, %744 : vector<8x8xi1>, vector<8x8xf32>
    %771 = vector.broadcast %171 : f32 to vector<8x8xf32>
    %772 = arith.select %748, %771, %746 : vector<8x8xi1>, vector<8x8xf32>
    %c14_i32 = arith.constant 14 : i32
    %773 = vector.broadcast %c14_i32 : i32 to vector<8x8xi32>
    %774 = arith.cmpi eq, %422, %773 : vector<8x8xi32>
    %775 = vector.broadcast %172 : f32 to vector<8x8xf32>
    %776 = arith.select %774, %775, %750 : vector<8x8xi1>, vector<8x8xf32>
    %777 = vector.broadcast %173 : f32 to vector<8x8xf32>
    %778 = arith.select %774, %777, %752 : vector<8x8xi1>, vector<8x8xf32>
    %779 = vector.broadcast %174 : f32 to vector<8x8xf32>
    %780 = arith.select %774, %779, %754 : vector<8x8xi1>, vector<8x8xf32>
    %781 = vector.broadcast %175 : f32 to vector<8x8xf32>
    %782 = arith.select %774, %781, %756 : vector<8x8xi1>, vector<8x8xf32>
    %783 = vector.broadcast %176 : f32 to vector<8x8xf32>
    %784 = arith.select %774, %783, %758 : vector<8x8xi1>, vector<8x8xf32>
    %785 = vector.broadcast %177 : f32 to vector<8x8xf32>
    %786 = arith.select %774, %785, %760 : vector<8x8xi1>, vector<8x8xf32>
    %787 = vector.broadcast %178 : f32 to vector<8x8xf32>
    %788 = arith.select %774, %787, %762 : vector<8x8xi1>, vector<8x8xf32>
    %789 = vector.broadcast %179 : f32 to vector<8x8xf32>
    %790 = arith.select %774, %789, %764 : vector<8x8xi1>, vector<8x8xf32>
    %791 = vector.broadcast %180 : f32 to vector<8x8xf32>
    %792 = arith.select %774, %791, %766 : vector<8x8xi1>, vector<8x8xf32>
    %793 = vector.broadcast %181 : f32 to vector<8x8xf32>
    %794 = arith.select %774, %793, %768 : vector<8x8xi1>, vector<8x8xf32>
    %795 = vector.broadcast %182 : f32 to vector<8x8xf32>
    %796 = arith.select %774, %795, %770 : vector<8x8xi1>, vector<8x8xf32>
    %797 = vector.broadcast %183 : f32 to vector<8x8xf32>
    %798 = arith.select %774, %797, %772 : vector<8x8xi1>, vector<8x8xf32>
    %c15_i32_746 = arith.constant 15 : i32
    %799 = vector.broadcast %c15_i32_746 : i32 to vector<8x8xi32>
    %800 = arith.cmpi eq, %422, %799 : vector<8x8xi32>
    %801 = vector.broadcast %184 : f32 to vector<8x8xf32>
    %802 = arith.select %800, %801, %776 : vector<8x8xi1>, vector<8x8xf32>
    %803 = vector.broadcast %185 : f32 to vector<8x8xf32>
    %804 = arith.select %800, %803, %778 : vector<8x8xi1>, vector<8x8xf32>
    %805 = vector.broadcast %186 : f32 to vector<8x8xf32>
    %806 = arith.select %800, %805, %780 : vector<8x8xi1>, vector<8x8xf32>
    %807 = vector.broadcast %187 : f32 to vector<8x8xf32>
    %808 = arith.select %800, %807, %782 : vector<8x8xi1>, vector<8x8xf32>
    %809 = vector.broadcast %188 : f32 to vector<8x8xf32>
    %810 = arith.select %800, %809, %784 : vector<8x8xi1>, vector<8x8xf32>
    %811 = vector.broadcast %189 : f32 to vector<8x8xf32>
    %812 = arith.select %800, %811, %786 : vector<8x8xi1>, vector<8x8xf32>
    %813 = vector.broadcast %190 : f32 to vector<8x8xf32>
    %814 = arith.select %800, %813, %788 : vector<8x8xi1>, vector<8x8xf32>
    %815 = vector.broadcast %191 : f32 to vector<8x8xf32>
    %816 = arith.select %800, %815, %790 : vector<8x8xi1>, vector<8x8xf32>
    %817 = vector.broadcast %192 : f32 to vector<8x8xf32>
    %818 = arith.select %800, %817, %792 : vector<8x8xi1>, vector<8x8xf32>
    %819 = vector.broadcast %193 : f32 to vector<8x8xf32>
    %820 = arith.select %800, %819, %794 : vector<8x8xi1>, vector<8x8xf32>
    %821 = vector.broadcast %194 : f32 to vector<8x8xf32>
    %822 = arith.select %800, %821, %796 : vector<8x8xi1>, vector<8x8xf32>
    %823 = vector.broadcast %195 : f32 to vector<8x8xf32>
    %824 = arith.select %800, %823, %798 : vector<8x8xi1>, vector<8x8xf32>
    %c16_i32_747 = arith.constant 16 : i32
    %825 = vector.broadcast %c16_i32_747 : i32 to vector<8x8xi32>
    %826 = arith.cmpi eq, %422, %825 : vector<8x8xi32>
    %827 = vector.broadcast %196 : f32 to vector<8x8xf32>
    %828 = arith.select %826, %827, %802 : vector<8x8xi1>, vector<8x8xf32>
    %829 = vector.broadcast %197 : f32 to vector<8x8xf32>
    %830 = arith.select %826, %829, %804 : vector<8x8xi1>, vector<8x8xf32>
    %831 = vector.broadcast %198 : f32 to vector<8x8xf32>
    %832 = arith.select %826, %831, %806 : vector<8x8xi1>, vector<8x8xf32>
    %833 = vector.broadcast %199 : f32 to vector<8x8xf32>
    %834 = arith.select %826, %833, %808 : vector<8x8xi1>, vector<8x8xf32>
    %835 = vector.broadcast %200 : f32 to vector<8x8xf32>
    %836 = arith.select %826, %835, %810 : vector<8x8xi1>, vector<8x8xf32>
    %837 = vector.broadcast %201 : f32 to vector<8x8xf32>
    %838 = arith.select %826, %837, %812 : vector<8x8xi1>, vector<8x8xf32>
    %839 = vector.broadcast %202 : f32 to vector<8x8xf32>
    %840 = arith.select %826, %839, %814 : vector<8x8xi1>, vector<8x8xf32>
    %841 = vector.broadcast %203 : f32 to vector<8x8xf32>
    %842 = arith.select %826, %841, %816 : vector<8x8xi1>, vector<8x8xf32>
    %843 = vector.broadcast %204 : f32 to vector<8x8xf32>
    %844 = arith.select %826, %843, %818 : vector<8x8xi1>, vector<8x8xf32>
    %845 = vector.broadcast %205 : f32 to vector<8x8xf32>
    %846 = arith.select %826, %845, %820 : vector<8x8xi1>, vector<8x8xf32>
    %847 = vector.broadcast %206 : f32 to vector<8x8xf32>
    %848 = arith.select %826, %847, %822 : vector<8x8xi1>, vector<8x8xf32>
    %849 = vector.broadcast %207 : f32 to vector<8x8xf32>
    %850 = arith.select %826, %849, %824 : vector<8x8xi1>, vector<8x8xf32>
    %c17_i32 = arith.constant 17 : i32
    %851 = vector.broadcast %c17_i32 : i32 to vector<8x8xi32>
    %852 = arith.cmpi eq, %422, %851 : vector<8x8xi32>
    %853 = vector.broadcast %208 : f32 to vector<8x8xf32>
    %854 = arith.select %852, %853, %828 : vector<8x8xi1>, vector<8x8xf32>
    %855 = vector.broadcast %209 : f32 to vector<8x8xf32>
    %856 = arith.select %852, %855, %830 : vector<8x8xi1>, vector<8x8xf32>
    %857 = vector.broadcast %210 : f32 to vector<8x8xf32>
    %858 = arith.select %852, %857, %832 : vector<8x8xi1>, vector<8x8xf32>
    %859 = vector.broadcast %211 : f32 to vector<8x8xf32>
    %860 = arith.select %852, %859, %834 : vector<8x8xi1>, vector<8x8xf32>
    %861 = vector.broadcast %212 : f32 to vector<8x8xf32>
    %862 = arith.select %852, %861, %836 : vector<8x8xi1>, vector<8x8xf32>
    %863 = vector.broadcast %213 : f32 to vector<8x8xf32>
    %864 = arith.select %852, %863, %838 : vector<8x8xi1>, vector<8x8xf32>
    %865 = vector.broadcast %214 : f32 to vector<8x8xf32>
    %866 = arith.select %852, %865, %840 : vector<8x8xi1>, vector<8x8xf32>
    %867 = vector.broadcast %215 : f32 to vector<8x8xf32>
    %868 = arith.select %852, %867, %842 : vector<8x8xi1>, vector<8x8xf32>
    %869 = vector.broadcast %216 : f32 to vector<8x8xf32>
    %870 = arith.select %852, %869, %844 : vector<8x8xi1>, vector<8x8xf32>
    %871 = vector.broadcast %217 : f32 to vector<8x8xf32>
    %872 = arith.select %852, %871, %846 : vector<8x8xi1>, vector<8x8xf32>
    %873 = vector.broadcast %218 : f32 to vector<8x8xf32>
    %874 = arith.select %852, %873, %848 : vector<8x8xi1>, vector<8x8xf32>
    %875 = vector.broadcast %219 : f32 to vector<8x8xf32>
    %876 = arith.select %852, %875, %850 : vector<8x8xi1>, vector<8x8xf32>
    %c18_i32 = arith.constant 18 : i32
    %877 = vector.broadcast %c18_i32 : i32 to vector<8x8xi32>
    %878 = arith.cmpi eq, %422, %877 : vector<8x8xi32>
    %879 = vector.broadcast %220 : f32 to vector<8x8xf32>
    %880 = arith.select %878, %879, %854 : vector<8x8xi1>, vector<8x8xf32>
    %881 = vector.broadcast %221 : f32 to vector<8x8xf32>
    %882 = arith.select %878, %881, %856 : vector<8x8xi1>, vector<8x8xf32>
    %883 = vector.broadcast %222 : f32 to vector<8x8xf32>
    %884 = arith.select %878, %883, %858 : vector<8x8xi1>, vector<8x8xf32>
    %885 = vector.broadcast %223 : f32 to vector<8x8xf32>
    %886 = arith.select %878, %885, %860 : vector<8x8xi1>, vector<8x8xf32>
    %887 = vector.broadcast %224 : f32 to vector<8x8xf32>
    %888 = arith.select %878, %887, %862 : vector<8x8xi1>, vector<8x8xf32>
    %889 = vector.broadcast %225 : f32 to vector<8x8xf32>
    %890 = arith.select %878, %889, %864 : vector<8x8xi1>, vector<8x8xf32>
    %891 = vector.broadcast %226 : f32 to vector<8x8xf32>
    %892 = arith.select %878, %891, %866 : vector<8x8xi1>, vector<8x8xf32>
    %893 = vector.broadcast %227 : f32 to vector<8x8xf32>
    %894 = arith.select %878, %893, %868 : vector<8x8xi1>, vector<8x8xf32>
    %895 = vector.broadcast %228 : f32 to vector<8x8xf32>
    %896 = arith.select %878, %895, %870 : vector<8x8xi1>, vector<8x8xf32>
    %897 = vector.broadcast %229 : f32 to vector<8x8xf32>
    %898 = arith.select %878, %897, %872 : vector<8x8xi1>, vector<8x8xf32>
    %899 = vector.broadcast %230 : f32 to vector<8x8xf32>
    %900 = arith.select %878, %899, %874 : vector<8x8xi1>, vector<8x8xf32>
    %901 = vector.broadcast %231 : f32 to vector<8x8xf32>
    %902 = arith.select %878, %901, %876 : vector<8x8xi1>, vector<8x8xf32>
    %c19_i32 = arith.constant 19 : i32
    %903 = vector.broadcast %c19_i32 : i32 to vector<8x8xi32>
    %904 = arith.cmpi eq, %422, %903 : vector<8x8xi32>
    %905 = vector.broadcast %232 : f32 to vector<8x8xf32>
    %906 = arith.select %904, %905, %880 : vector<8x8xi1>, vector<8x8xf32>
    %907 = vector.broadcast %233 : f32 to vector<8x8xf32>
    %908 = arith.select %904, %907, %882 : vector<8x8xi1>, vector<8x8xf32>
    %909 = vector.broadcast %234 : f32 to vector<8x8xf32>
    %910 = arith.select %904, %909, %884 : vector<8x8xi1>, vector<8x8xf32>
    %911 = vector.broadcast %235 : f32 to vector<8x8xf32>
    %912 = arith.select %904, %911, %886 : vector<8x8xi1>, vector<8x8xf32>
    %913 = vector.broadcast %236 : f32 to vector<8x8xf32>
    %914 = arith.select %904, %913, %888 : vector<8x8xi1>, vector<8x8xf32>
    %915 = vector.broadcast %237 : f32 to vector<8x8xf32>
    %916 = arith.select %904, %915, %890 : vector<8x8xi1>, vector<8x8xf32>
    %917 = vector.broadcast %238 : f32 to vector<8x8xf32>
    %918 = arith.select %904, %917, %892 : vector<8x8xi1>, vector<8x8xf32>
    %919 = vector.broadcast %239 : f32 to vector<8x8xf32>
    %920 = arith.select %904, %919, %894 : vector<8x8xi1>, vector<8x8xf32>
    %921 = vector.broadcast %240 : f32 to vector<8x8xf32>
    %922 = arith.select %904, %921, %896 : vector<8x8xi1>, vector<8x8xf32>
    %923 = vector.broadcast %241 : f32 to vector<8x8xf32>
    %924 = arith.select %904, %923, %898 : vector<8x8xi1>, vector<8x8xf32>
    %925 = vector.broadcast %242 : f32 to vector<8x8xf32>
    %926 = arith.select %904, %925, %900 : vector<8x8xi1>, vector<8x8xf32>
    %927 = vector.broadcast %243 : f32 to vector<8x8xf32>
    %928 = arith.select %904, %927, %902 : vector<8x8xi1>, vector<8x8xf32>
    %c20_i32 = arith.constant 20 : i32
    %929 = vector.broadcast %c20_i32 : i32 to vector<8x8xi32>
    %930 = arith.cmpi eq, %422, %929 : vector<8x8xi32>
    %931 = vector.broadcast %244 : f32 to vector<8x8xf32>
    %932 = arith.select %930, %931, %906 : vector<8x8xi1>, vector<8x8xf32>
    %933 = vector.broadcast %245 : f32 to vector<8x8xf32>
    %934 = arith.select %930, %933, %908 : vector<8x8xi1>, vector<8x8xf32>
    %935 = vector.broadcast %246 : f32 to vector<8x8xf32>
    %936 = arith.select %930, %935, %910 : vector<8x8xi1>, vector<8x8xf32>
    %937 = vector.broadcast %247 : f32 to vector<8x8xf32>
    %938 = arith.select %930, %937, %912 : vector<8x8xi1>, vector<8x8xf32>
    %939 = vector.broadcast %248 : f32 to vector<8x8xf32>
    %940 = arith.select %930, %939, %914 : vector<8x8xi1>, vector<8x8xf32>
    %941 = vector.broadcast %249 : f32 to vector<8x8xf32>
    %942 = arith.select %930, %941, %916 : vector<8x8xi1>, vector<8x8xf32>
    %943 = vector.broadcast %250 : f32 to vector<8x8xf32>
    %944 = arith.select %930, %943, %918 : vector<8x8xi1>, vector<8x8xf32>
    %945 = vector.broadcast %251 : f32 to vector<8x8xf32>
    %946 = arith.select %930, %945, %920 : vector<8x8xi1>, vector<8x8xf32>
    %947 = vector.broadcast %252 : f32 to vector<8x8xf32>
    %948 = arith.select %930, %947, %922 : vector<8x8xi1>, vector<8x8xf32>
    %949 = vector.broadcast %253 : f32 to vector<8x8xf32>
    %950 = arith.select %930, %949, %924 : vector<8x8xi1>, vector<8x8xf32>
    %951 = vector.broadcast %254 : f32 to vector<8x8xf32>
    %952 = arith.select %930, %951, %926 : vector<8x8xi1>, vector<8x8xf32>
    %953 = vector.broadcast %255 : f32 to vector<8x8xf32>
    %954 = arith.select %930, %953, %928 : vector<8x8xi1>, vector<8x8xf32>
    %c21_i32 = arith.constant 21 : i32
    %955 = vector.broadcast %c21_i32 : i32 to vector<8x8xi32>
    %956 = arith.cmpi eq, %422, %955 : vector<8x8xi32>
    %957 = vector.broadcast %256 : f32 to vector<8x8xf32>
    %958 = arith.select %956, %957, %932 : vector<8x8xi1>, vector<8x8xf32>
    %959 = vector.broadcast %257 : f32 to vector<8x8xf32>
    %960 = arith.select %956, %959, %934 : vector<8x8xi1>, vector<8x8xf32>
    %961 = vector.broadcast %258 : f32 to vector<8x8xf32>
    %962 = arith.select %956, %961, %936 : vector<8x8xi1>, vector<8x8xf32>
    %963 = vector.broadcast %259 : f32 to vector<8x8xf32>
    %964 = arith.select %956, %963, %938 : vector<8x8xi1>, vector<8x8xf32>
    %965 = vector.broadcast %260 : f32 to vector<8x8xf32>
    %966 = arith.select %956, %965, %940 : vector<8x8xi1>, vector<8x8xf32>
    %967 = vector.broadcast %261 : f32 to vector<8x8xf32>
    %968 = arith.select %956, %967, %942 : vector<8x8xi1>, vector<8x8xf32>
    %969 = vector.broadcast %262 : f32 to vector<8x8xf32>
    %970 = arith.select %956, %969, %944 : vector<8x8xi1>, vector<8x8xf32>
    %971 = vector.broadcast %263 : f32 to vector<8x8xf32>
    %972 = arith.select %956, %971, %946 : vector<8x8xi1>, vector<8x8xf32>
    %973 = vector.broadcast %264 : f32 to vector<8x8xf32>
    %974 = arith.select %956, %973, %948 : vector<8x8xi1>, vector<8x8xf32>
    %975 = vector.broadcast %265 : f32 to vector<8x8xf32>
    %976 = arith.select %956, %975, %950 : vector<8x8xi1>, vector<8x8xf32>
    %977 = vector.broadcast %266 : f32 to vector<8x8xf32>
    %978 = arith.select %956, %977, %952 : vector<8x8xi1>, vector<8x8xf32>
    %979 = vector.broadcast %267 : f32 to vector<8x8xf32>
    %980 = arith.select %956, %979, %954 : vector<8x8xi1>, vector<8x8xf32>
    %c22_i32 = arith.constant 22 : i32
    %981 = vector.broadcast %c22_i32 : i32 to vector<8x8xi32>
    %982 = arith.cmpi eq, %422, %981 : vector<8x8xi32>
    %983 = vector.broadcast %268 : f32 to vector<8x8xf32>
    %984 = arith.select %982, %983, %958 : vector<8x8xi1>, vector<8x8xf32>
    %985 = vector.broadcast %269 : f32 to vector<8x8xf32>
    %986 = arith.select %982, %985, %960 : vector<8x8xi1>, vector<8x8xf32>
    %987 = vector.broadcast %270 : f32 to vector<8x8xf32>
    %988 = arith.select %982, %987, %962 : vector<8x8xi1>, vector<8x8xf32>
    %989 = vector.broadcast %271 : f32 to vector<8x8xf32>
    %990 = arith.select %982, %989, %964 : vector<8x8xi1>, vector<8x8xf32>
    %991 = vector.broadcast %272 : f32 to vector<8x8xf32>
    %992 = arith.select %982, %991, %966 : vector<8x8xi1>, vector<8x8xf32>
    %993 = vector.broadcast %273 : f32 to vector<8x8xf32>
    %994 = arith.select %982, %993, %968 : vector<8x8xi1>, vector<8x8xf32>
    %995 = vector.broadcast %274 : f32 to vector<8x8xf32>
    %996 = arith.select %982, %995, %970 : vector<8x8xi1>, vector<8x8xf32>
    %997 = vector.broadcast %275 : f32 to vector<8x8xf32>
    %998 = arith.select %982, %997, %972 : vector<8x8xi1>, vector<8x8xf32>
    %999 = vector.broadcast %276 : f32 to vector<8x8xf32>
    %1000 = arith.select %982, %999, %974 : vector<8x8xi1>, vector<8x8xf32>
    %1001 = vector.broadcast %277 : f32 to vector<8x8xf32>
    %1002 = arith.select %982, %1001, %976 : vector<8x8xi1>, vector<8x8xf32>
    %1003 = vector.broadcast %278 : f32 to vector<8x8xf32>
    %1004 = arith.select %982, %1003, %978 : vector<8x8xi1>, vector<8x8xf32>
    %1005 = vector.broadcast %279 : f32 to vector<8x8xf32>
    %1006 = arith.select %982, %1005, %980 : vector<8x8xi1>, vector<8x8xf32>
    %c23_i32 = arith.constant 23 : i32
    %1007 = vector.broadcast %c23_i32 : i32 to vector<8x8xi32>
    %1008 = arith.cmpi eq, %422, %1007 : vector<8x8xi32>
    %1009 = vector.broadcast %280 : f32 to vector<8x8xf32>
    %1010 = arith.select %1008, %1009, %984 : vector<8x8xi1>, vector<8x8xf32>
    %1011 = vector.broadcast %281 : f32 to vector<8x8xf32>
    %1012 = arith.select %1008, %1011, %986 : vector<8x8xi1>, vector<8x8xf32>
    %1013 = vector.broadcast %282 : f32 to vector<8x8xf32>
    %1014 = arith.select %1008, %1013, %988 : vector<8x8xi1>, vector<8x8xf32>
    %1015 = vector.broadcast %283 : f32 to vector<8x8xf32>
    %1016 = arith.select %1008, %1015, %990 : vector<8x8xi1>, vector<8x8xf32>
    %1017 = vector.broadcast %284 : f32 to vector<8x8xf32>
    %1018 = arith.select %1008, %1017, %992 : vector<8x8xi1>, vector<8x8xf32>
    %1019 = vector.broadcast %285 : f32 to vector<8x8xf32>
    %1020 = arith.select %1008, %1019, %994 : vector<8x8xi1>, vector<8x8xf32>
    %1021 = vector.broadcast %286 : f32 to vector<8x8xf32>
    %1022 = arith.select %1008, %1021, %996 : vector<8x8xi1>, vector<8x8xf32>
    %1023 = vector.broadcast %287 : f32 to vector<8x8xf32>
    %1024 = arith.select %1008, %1023, %998 : vector<8x8xi1>, vector<8x8xf32>
    %1025 = vector.broadcast %288 : f32 to vector<8x8xf32>
    %1026 = arith.select %1008, %1025, %1000 : vector<8x8xi1>, vector<8x8xf32>
    %1027 = vector.broadcast %289 : f32 to vector<8x8xf32>
    %1028 = arith.select %1008, %1027, %1002 : vector<8x8xi1>, vector<8x8xf32>
    %1029 = vector.broadcast %290 : f32 to vector<8x8xf32>
    %1030 = arith.select %1008, %1029, %1004 : vector<8x8xi1>, vector<8x8xf32>
    %1031 = vector.broadcast %291 : f32 to vector<8x8xf32>
    %1032 = arith.select %1008, %1031, %1006 : vector<8x8xi1>, vector<8x8xf32>
    %c24_i32 = arith.constant 24 : i32
    %1033 = vector.broadcast %c24_i32 : i32 to vector<8x8xi32>
    %1034 = arith.cmpi eq, %422, %1033 : vector<8x8xi32>
    %1035 = vector.broadcast %292 : f32 to vector<8x8xf32>
    %1036 = arith.select %1034, %1035, %1010 : vector<8x8xi1>, vector<8x8xf32>
    %1037 = vector.broadcast %293 : f32 to vector<8x8xf32>
    %1038 = arith.select %1034, %1037, %1012 : vector<8x8xi1>, vector<8x8xf32>
    %1039 = vector.broadcast %294 : f32 to vector<8x8xf32>
    %1040 = arith.select %1034, %1039, %1014 : vector<8x8xi1>, vector<8x8xf32>
    %1041 = vector.broadcast %295 : f32 to vector<8x8xf32>
    %1042 = arith.select %1034, %1041, %1016 : vector<8x8xi1>, vector<8x8xf32>
    %1043 = vector.broadcast %296 : f32 to vector<8x8xf32>
    %1044 = arith.select %1034, %1043, %1018 : vector<8x8xi1>, vector<8x8xf32>
    %1045 = vector.broadcast %297 : f32 to vector<8x8xf32>
    %1046 = arith.select %1034, %1045, %1020 : vector<8x8xi1>, vector<8x8xf32>
    %1047 = vector.broadcast %298 : f32 to vector<8x8xf32>
    %1048 = arith.select %1034, %1047, %1022 : vector<8x8xi1>, vector<8x8xf32>
    %1049 = vector.broadcast %299 : f32 to vector<8x8xf32>
    %1050 = arith.select %1034, %1049, %1024 : vector<8x8xi1>, vector<8x8xf32>
    %1051 = vector.broadcast %300 : f32 to vector<8x8xf32>
    %1052 = arith.select %1034, %1051, %1026 : vector<8x8xi1>, vector<8x8xf32>
    %1053 = vector.broadcast %301 : f32 to vector<8x8xf32>
    %1054 = arith.select %1034, %1053, %1028 : vector<8x8xi1>, vector<8x8xf32>
    %1055 = vector.broadcast %302 : f32 to vector<8x8xf32>
    %1056 = arith.select %1034, %1055, %1030 : vector<8x8xi1>, vector<8x8xf32>
    %1057 = vector.broadcast %303 : f32 to vector<8x8xf32>
    %1058 = arith.select %1034, %1057, %1032 : vector<8x8xi1>, vector<8x8xf32>
    %c25_i32 = arith.constant 25 : i32
    %1059 = vector.broadcast %c25_i32 : i32 to vector<8x8xi32>
    %1060 = arith.cmpi eq, %422, %1059 : vector<8x8xi32>
    %1061 = vector.broadcast %304 : f32 to vector<8x8xf32>
    %1062 = arith.select %1060, %1061, %1036 : vector<8x8xi1>, vector<8x8xf32>
    %1063 = vector.broadcast %305 : f32 to vector<8x8xf32>
    %1064 = arith.select %1060, %1063, %1038 : vector<8x8xi1>, vector<8x8xf32>
    %1065 = vector.broadcast %306 : f32 to vector<8x8xf32>
    %1066 = arith.select %1060, %1065, %1040 : vector<8x8xi1>, vector<8x8xf32>
    %1067 = vector.broadcast %307 : f32 to vector<8x8xf32>
    %1068 = arith.select %1060, %1067, %1042 : vector<8x8xi1>, vector<8x8xf32>
    %1069 = vector.broadcast %308 : f32 to vector<8x8xf32>
    %1070 = arith.select %1060, %1069, %1044 : vector<8x8xi1>, vector<8x8xf32>
    %1071 = vector.broadcast %309 : f32 to vector<8x8xf32>
    %1072 = arith.select %1060, %1071, %1046 : vector<8x8xi1>, vector<8x8xf32>
    %1073 = vector.broadcast %310 : f32 to vector<8x8xf32>
    %1074 = arith.select %1060, %1073, %1048 : vector<8x8xi1>, vector<8x8xf32>
    %1075 = vector.broadcast %311 : f32 to vector<8x8xf32>
    %1076 = arith.select %1060, %1075, %1050 : vector<8x8xi1>, vector<8x8xf32>
    %1077 = vector.broadcast %312 : f32 to vector<8x8xf32>
    %1078 = arith.select %1060, %1077, %1052 : vector<8x8xi1>, vector<8x8xf32>
    %1079 = vector.broadcast %313 : f32 to vector<8x8xf32>
    %1080 = arith.select %1060, %1079, %1054 : vector<8x8xi1>, vector<8x8xf32>
    %1081 = vector.broadcast %314 : f32 to vector<8x8xf32>
    %1082 = arith.select %1060, %1081, %1056 : vector<8x8xi1>, vector<8x8xf32>
    %1083 = vector.broadcast %315 : f32 to vector<8x8xf32>
    %1084 = arith.select %1060, %1083, %1058 : vector<8x8xi1>, vector<8x8xf32>
    %c26_i32 = arith.constant 26 : i32
    %1085 = vector.broadcast %c26_i32 : i32 to vector<8x8xi32>
    %1086 = arith.cmpi eq, %422, %1085 : vector<8x8xi32>
    %1087 = vector.broadcast %316 : f32 to vector<8x8xf32>
    %1088 = arith.select %1086, %1087, %1062 : vector<8x8xi1>, vector<8x8xf32>
    %1089 = vector.broadcast %317 : f32 to vector<8x8xf32>
    %1090 = arith.select %1086, %1089, %1064 : vector<8x8xi1>, vector<8x8xf32>
    %1091 = vector.broadcast %318 : f32 to vector<8x8xf32>
    %1092 = arith.select %1086, %1091, %1066 : vector<8x8xi1>, vector<8x8xf32>
    %1093 = vector.broadcast %319 : f32 to vector<8x8xf32>
    %1094 = arith.select %1086, %1093, %1068 : vector<8x8xi1>, vector<8x8xf32>
    %1095 = vector.broadcast %320 : f32 to vector<8x8xf32>
    %1096 = arith.select %1086, %1095, %1070 : vector<8x8xi1>, vector<8x8xf32>
    %1097 = vector.broadcast %321 : f32 to vector<8x8xf32>
    %1098 = arith.select %1086, %1097, %1072 : vector<8x8xi1>, vector<8x8xf32>
    %1099 = vector.broadcast %322 : f32 to vector<8x8xf32>
    %1100 = arith.select %1086, %1099, %1074 : vector<8x8xi1>, vector<8x8xf32>
    %1101 = vector.broadcast %323 : f32 to vector<8x8xf32>
    %1102 = arith.select %1086, %1101, %1076 : vector<8x8xi1>, vector<8x8xf32>
    %1103 = vector.broadcast %324 : f32 to vector<8x8xf32>
    %1104 = arith.select %1086, %1103, %1078 : vector<8x8xi1>, vector<8x8xf32>
    %1105 = vector.broadcast %325 : f32 to vector<8x8xf32>
    %1106 = arith.select %1086, %1105, %1080 : vector<8x8xi1>, vector<8x8xf32>
    %1107 = vector.broadcast %326 : f32 to vector<8x8xf32>
    %1108 = arith.select %1086, %1107, %1082 : vector<8x8xi1>, vector<8x8xf32>
    %1109 = vector.broadcast %327 : f32 to vector<8x8xf32>
    %1110 = arith.select %1086, %1109, %1084 : vector<8x8xi1>, vector<8x8xf32>
    %c27_i32 = arith.constant 27 : i32
    %1111 = vector.broadcast %c27_i32 : i32 to vector<8x8xi32>
    %1112 = arith.cmpi eq, %422, %1111 : vector<8x8xi32>
    %1113 = vector.broadcast %328 : f32 to vector<8x8xf32>
    %1114 = arith.select %1112, %1113, %1088 : vector<8x8xi1>, vector<8x8xf32>
    %1115 = vector.broadcast %329 : f32 to vector<8x8xf32>
    %1116 = arith.select %1112, %1115, %1090 : vector<8x8xi1>, vector<8x8xf32>
    %1117 = vector.broadcast %330 : f32 to vector<8x8xf32>
    %1118 = arith.select %1112, %1117, %1092 : vector<8x8xi1>, vector<8x8xf32>
    %1119 = vector.broadcast %331 : f32 to vector<8x8xf32>
    %1120 = arith.select %1112, %1119, %1094 : vector<8x8xi1>, vector<8x8xf32>
    %1121 = vector.broadcast %332 : f32 to vector<8x8xf32>
    %1122 = arith.select %1112, %1121, %1096 : vector<8x8xi1>, vector<8x8xf32>
    %1123 = vector.broadcast %333 : f32 to vector<8x8xf32>
    %1124 = arith.select %1112, %1123, %1098 : vector<8x8xi1>, vector<8x8xf32>
    %1125 = vector.broadcast %334 : f32 to vector<8x8xf32>
    %1126 = arith.select %1112, %1125, %1100 : vector<8x8xi1>, vector<8x8xf32>
    %1127 = vector.broadcast %335 : f32 to vector<8x8xf32>
    %1128 = arith.select %1112, %1127, %1102 : vector<8x8xi1>, vector<8x8xf32>
    %1129 = vector.broadcast %336 : f32 to vector<8x8xf32>
    %1130 = arith.select %1112, %1129, %1104 : vector<8x8xi1>, vector<8x8xf32>
    %1131 = vector.broadcast %337 : f32 to vector<8x8xf32>
    %1132 = arith.select %1112, %1131, %1106 : vector<8x8xi1>, vector<8x8xf32>
    %1133 = vector.broadcast %338 : f32 to vector<8x8xf32>
    %1134 = arith.select %1112, %1133, %1108 : vector<8x8xi1>, vector<8x8xf32>
    %1135 = vector.broadcast %339 : f32 to vector<8x8xf32>
    %1136 = arith.select %1112, %1135, %1110 : vector<8x8xi1>, vector<8x8xf32>
    %c28_i32 = arith.constant 28 : i32
    %1137 = vector.broadcast %c28_i32 : i32 to vector<8x8xi32>
    %1138 = arith.cmpi eq, %422, %1137 : vector<8x8xi32>
    %1139 = vector.broadcast %340 : f32 to vector<8x8xf32>
    %1140 = arith.select %1138, %1139, %1114 : vector<8x8xi1>, vector<8x8xf32>
    %1141 = vector.broadcast %341 : f32 to vector<8x8xf32>
    %1142 = arith.select %1138, %1141, %1116 : vector<8x8xi1>, vector<8x8xf32>
    %1143 = vector.broadcast %342 : f32 to vector<8x8xf32>
    %1144 = arith.select %1138, %1143, %1118 : vector<8x8xi1>, vector<8x8xf32>
    %1145 = vector.broadcast %343 : f32 to vector<8x8xf32>
    %1146 = arith.select %1138, %1145, %1120 : vector<8x8xi1>, vector<8x8xf32>
    %1147 = vector.broadcast %344 : f32 to vector<8x8xf32>
    %1148 = arith.select %1138, %1147, %1122 : vector<8x8xi1>, vector<8x8xf32>
    %1149 = vector.broadcast %345 : f32 to vector<8x8xf32>
    %1150 = arith.select %1138, %1149, %1124 : vector<8x8xi1>, vector<8x8xf32>
    %1151 = vector.broadcast %346 : f32 to vector<8x8xf32>
    %1152 = arith.select %1138, %1151, %1126 : vector<8x8xi1>, vector<8x8xf32>
    %1153 = vector.broadcast %347 : f32 to vector<8x8xf32>
    %1154 = arith.select %1138, %1153, %1128 : vector<8x8xi1>, vector<8x8xf32>
    %1155 = vector.broadcast %348 : f32 to vector<8x8xf32>
    %1156 = arith.select %1138, %1155, %1130 : vector<8x8xi1>, vector<8x8xf32>
    %1157 = vector.broadcast %349 : f32 to vector<8x8xf32>
    %1158 = arith.select %1138, %1157, %1132 : vector<8x8xi1>, vector<8x8xf32>
    %1159 = vector.broadcast %350 : f32 to vector<8x8xf32>
    %1160 = arith.select %1138, %1159, %1134 : vector<8x8xi1>, vector<8x8xf32>
    %1161 = vector.broadcast %351 : f32 to vector<8x8xf32>
    %1162 = arith.select %1138, %1161, %1136 : vector<8x8xi1>, vector<8x8xf32>
    %c29_i32 = arith.constant 29 : i32
    %1163 = vector.broadcast %c29_i32 : i32 to vector<8x8xi32>
    %1164 = arith.cmpi eq, %422, %1163 : vector<8x8xi32>
    %1165 = vector.broadcast %352 : f32 to vector<8x8xf32>
    %1166 = arith.select %1164, %1165, %1140 : vector<8x8xi1>, vector<8x8xf32>
    %1167 = vector.broadcast %353 : f32 to vector<8x8xf32>
    %1168 = arith.select %1164, %1167, %1142 : vector<8x8xi1>, vector<8x8xf32>
    %1169 = vector.broadcast %354 : f32 to vector<8x8xf32>
    %1170 = arith.select %1164, %1169, %1144 : vector<8x8xi1>, vector<8x8xf32>
    %1171 = vector.broadcast %355 : f32 to vector<8x8xf32>
    %1172 = arith.select %1164, %1171, %1146 : vector<8x8xi1>, vector<8x8xf32>
    %1173 = vector.broadcast %356 : f32 to vector<8x8xf32>
    %1174 = arith.select %1164, %1173, %1148 : vector<8x8xi1>, vector<8x8xf32>
    %1175 = vector.broadcast %357 : f32 to vector<8x8xf32>
    %1176 = arith.select %1164, %1175, %1150 : vector<8x8xi1>, vector<8x8xf32>
    %1177 = vector.broadcast %358 : f32 to vector<8x8xf32>
    %1178 = arith.select %1164, %1177, %1152 : vector<8x8xi1>, vector<8x8xf32>
    %1179 = vector.broadcast %359 : f32 to vector<8x8xf32>
    %1180 = arith.select %1164, %1179, %1154 : vector<8x8xi1>, vector<8x8xf32>
    %1181 = vector.broadcast %360 : f32 to vector<8x8xf32>
    %1182 = arith.select %1164, %1181, %1156 : vector<8x8xi1>, vector<8x8xf32>
    %1183 = vector.broadcast %361 : f32 to vector<8x8xf32>
    %1184 = arith.select %1164, %1183, %1158 : vector<8x8xi1>, vector<8x8xf32>
    %1185 = vector.broadcast %362 : f32 to vector<8x8xf32>
    %1186 = arith.select %1164, %1185, %1160 : vector<8x8xi1>, vector<8x8xf32>
    %1187 = vector.broadcast %363 : f32 to vector<8x8xf32>
    %1188 = arith.select %1164, %1187, %1162 : vector<8x8xi1>, vector<8x8xf32>
    %c30_i32 = arith.constant 30 : i32
    %1189 = vector.broadcast %c30_i32 : i32 to vector<8x8xi32>
    %1190 = arith.cmpi eq, %422, %1189 : vector<8x8xi32>
    %1191 = vector.broadcast %364 : f32 to vector<8x8xf32>
    %1192 = arith.select %1190, %1191, %1166 : vector<8x8xi1>, vector<8x8xf32>
    %1193 = vector.broadcast %365 : f32 to vector<8x8xf32>
    %1194 = arith.select %1190, %1193, %1168 : vector<8x8xi1>, vector<8x8xf32>
    %1195 = vector.broadcast %366 : f32 to vector<8x8xf32>
    %1196 = arith.select %1190, %1195, %1170 : vector<8x8xi1>, vector<8x8xf32>
    %1197 = vector.broadcast %367 : f32 to vector<8x8xf32>
    %1198 = arith.select %1190, %1197, %1172 : vector<8x8xi1>, vector<8x8xf32>
    %1199 = vector.broadcast %368 : f32 to vector<8x8xf32>
    %1200 = arith.select %1190, %1199, %1174 : vector<8x8xi1>, vector<8x8xf32>
    %1201 = vector.broadcast %369 : f32 to vector<8x8xf32>
    %1202 = arith.select %1190, %1201, %1176 : vector<8x8xi1>, vector<8x8xf32>
    %1203 = vector.broadcast %370 : f32 to vector<8x8xf32>
    %1204 = arith.select %1190, %1203, %1178 : vector<8x8xi1>, vector<8x8xf32>
    %1205 = vector.broadcast %371 : f32 to vector<8x8xf32>
    %1206 = arith.select %1190, %1205, %1180 : vector<8x8xi1>, vector<8x8xf32>
    %1207 = vector.broadcast %372 : f32 to vector<8x8xf32>
    %1208 = arith.select %1190, %1207, %1182 : vector<8x8xi1>, vector<8x8xf32>
    %1209 = vector.broadcast %373 : f32 to vector<8x8xf32>
    %1210 = arith.select %1190, %1209, %1184 : vector<8x8xi1>, vector<8x8xf32>
    %1211 = vector.broadcast %374 : f32 to vector<8x8xf32>
    %1212 = arith.select %1190, %1211, %1186 : vector<8x8xi1>, vector<8x8xf32>
    %1213 = vector.broadcast %375 : f32 to vector<8x8xf32>
    %1214 = arith.select %1190, %1213, %1188 : vector<8x8xi1>, vector<8x8xf32>
    %c31_i32 = arith.constant 31 : i32
    %1215 = vector.broadcast %c31_i32 : i32 to vector<8x8xi32>
    %1216 = arith.cmpi eq, %422, %1215 : vector<8x8xi32>
    %1217 = vector.broadcast %376 : f32 to vector<8x8xf32>
    %1218 = arith.select %1216, %1217, %1192 : vector<8x8xi1>, vector<8x8xf32>
    %1219 = vector.broadcast %377 : f32 to vector<8x8xf32>
    %1220 = arith.select %1216, %1219, %1194 : vector<8x8xi1>, vector<8x8xf32>
    %1221 = vector.broadcast %378 : f32 to vector<8x8xf32>
    %1222 = arith.select %1216, %1221, %1196 : vector<8x8xi1>, vector<8x8xf32>
    %1223 = vector.broadcast %379 : f32 to vector<8x8xf32>
    %1224 = arith.select %1216, %1223, %1198 : vector<8x8xi1>, vector<8x8xf32>
    %1225 = vector.broadcast %380 : f32 to vector<8x8xf32>
    %1226 = arith.select %1216, %1225, %1200 : vector<8x8xi1>, vector<8x8xf32>
    %1227 = vector.broadcast %381 : f32 to vector<8x8xf32>
    %1228 = arith.select %1216, %1227, %1202 : vector<8x8xi1>, vector<8x8xf32>
    %1229 = vector.broadcast %382 : f32 to vector<8x8xf32>
    %1230 = arith.select %1216, %1229, %1204 : vector<8x8xi1>, vector<8x8xf32>
    %1231 = vector.broadcast %383 : f32 to vector<8x8xf32>
    %1232 = arith.select %1216, %1231, %1206 : vector<8x8xi1>, vector<8x8xf32>
    %1233 = vector.broadcast %384 : f32 to vector<8x8xf32>
    %1234 = arith.select %1216, %1233, %1208 : vector<8x8xi1>, vector<8x8xf32>
    %1235 = vector.broadcast %385 : f32 to vector<8x8xf32>
    %1236 = arith.select %1216, %1235, %1210 : vector<8x8xi1>, vector<8x8xf32>
    %1237 = vector.broadcast %386 : f32 to vector<8x8xf32>
    %1238 = arith.select %1216, %1237, %1212 : vector<8x8xi1>, vector<8x8xf32>
    %1239 = vector.broadcast %387 : f32 to vector<8x8xf32>
    %1240 = arith.select %1216, %1239, %1214 : vector<8x8xi1>, vector<8x8xf32>
    %c0_748 = arith.constant 0 : index
    %1241 = arith.index_cast %389 : i32 to index
    %c0_749 = arith.constant 0 : index
    %1242 = vector.load %arg4[%c0_748, %1241, %c0_749] : memref<12x8x8xf32, #tpu.memory_space<vmem>>, vector<1x8x8xf32>
    %1243 = vector.shape_cast %1242 : vector<1x8x8xf32> to vector<8x8xf32>
    %1244 = vector.shape_cast %1218 : vector<8x8xf32> to vector<1x8x8xf32>
    tpu.vector_store %arg4[%c0_748, %1241, %c0_749], %1244 {strides = array<i32>} : memref<12x8x8xf32, #tpu.memory_space<vmem>>, vector<1x8x8xf32>,
    %c1_750 = arith.constant 1 : index
    %1245 = arith.index_cast %389 : i32 to index
    %c0_751 = arith.constant 0 : index
    %1246 = vector.load %arg4[%c1_750, %1245, %c0_751] : memref<12x8x8xf32, #tpu.memory_space<vmem>>, vector<1x8x8xf32>
    %1247 = vector.shape_cast %1246 : vector<1x8x8xf32> to vector<8x8xf32>
    %1248 = vector.shape_cast %1220 : vector<8x8xf32> to vector<1x8x8xf32>
    tpu.vector_store %arg4[%c1_750, %1245, %c0_751], %1248 {strides = array<i32>} : memref<12x8x8xf32, #tpu.memory_space<vmem>>, vector<1x8x8xf32>,
    %c2_752 = arith.constant 2 : index
    %1249 = arith.index_cast %389 : i32 to index
    %c0_753 = arith.constant 0 : index
    %1250 = vector.load %arg4[%c2_752, %1249, %c0_753] : memref<12x8x8xf32, #tpu.memory_space<vmem>>, vector<1x8x8xf32>
    %1251 = vector.shape_cast %1250 : vector<1x8x8xf32> to vector<8x8xf32>
    %1252 = vector.shape_cast %1222 : vector<8x8xf32> to vector<1x8x8xf32>
    tpu.vector_store %arg4[%c2_752, %1249, %c0_753], %1252 {strides = array<i32>} : memref<12x8x8xf32, #tpu.memory_space<vmem>>, vector<1x8x8xf32>,
    %c3_754 = arith.constant 3 : index
    %1253 = arith.index_cast %389 : i32 to index
    %c0_755 = arith.constant 0 : index
    %1254 = vector.load %arg4[%c3_754, %1253, %c0_755] : memref<12x8x8xf32, #tpu.memory_space<vmem>>, vector<1x8x8xf32>
    %1255 = vector.shape_cast %1254 : vector<1x8x8xf32> to vector<8x8xf32>
    %1256 = vector.shape_cast %1224 : vector<8x8xf32> to vector<1x8x8xf32>
    tpu.vector_store %arg4[%c3_754, %1253, %c0_755], %1256 {strides = array<i32>} : memref<12x8x8xf32, #tpu.memory_space<vmem>>, vector<1x8x8xf32>,
    %c4_756 = arith.constant 4 : index
    %1257 = arith.index_cast %389 : i32 to index
    %c0_757 = arith.constant 0 : index
    %1258 = vector.load %arg4[%c4_756, %1257, %c0_757] : memref<12x8x8xf32, #tpu.memory_space<vmem>>, vector<1x8x8xf32>
    %1259 = vector.shape_cast %1258 : vector<1x8x8xf32> to vector<8x8xf32>
    %1260 = vector.shape_cast %1226 : vector<8x8xf32> to vector<1x8x8xf32>
    tpu.vector_store %arg4[%c4_756, %1257, %c0_757], %1260 {strides = array<i32>} : memref<12x8x8xf32, #tpu.memory_space<vmem>>, vector<1x8x8xf32>,
    %c5_758 = arith.constant 5 : index
    %1261 = arith.index_cast %389 : i32 to index
    %c0_759 = arith.constant 0 : index
    %1262 = vector.load %arg4[%c5_758, %1261, %c0_759] : memref<12x8x8xf32, #tpu.memory_space<vmem>>, vector<1x8x8xf32>
    %1263 = vector.shape_cast %1262 : vector<1x8x8xf32> to vector<8x8xf32>
    %1264 = vector.shape_cast %1228 : vector<8x8xf32> to vector<1x8x8xf32>
    tpu.vector_store %arg4[%c5_758, %1261, %c0_759], %1264 {strides = array<i32>} : memref<12x8x8xf32, #tpu.memory_space<vmem>>, vector<1x8x8xf32>,
    %c6_760 = arith.constant 6 : index
    %1265 = arith.index_cast %389 : i32 to index
    %c0_761 = arith.constant 0 : index
    %1266 = vector.load %arg4[%c6_760, %1265, %c0_761] : memref<12x8x8xf32, #tpu.memory_space<vmem>>, vector<1x8x8xf32>
    %1267 = vector.shape_cast %1266 : vector<1x8x8xf32> to vector<8x8xf32>
    %1268 = vector.shape_cast %1230 : vector<8x8xf32> to vector<1x8x8xf32>
    tpu.vector_store %arg4[%c6_760, %1265, %c0_761], %1268 {strides = array<i32>} : memref<12x8x8xf32, #tpu.memory_space<vmem>>, vector<1x8x8xf32>,
    %c7_762 = arith.constant 7 : index
    %1269 = arith.index_cast %389 : i32 to index
    %c0_763 = arith.constant 0 : index
    %1270 = vector.load %arg4[%c7_762, %1269, %c0_763] : memref<12x8x8xf32, #tpu.memory_space<vmem>>, vector<1x8x8xf32>
    %1271 = vector.shape_cast %1270 : vector<1x8x8xf32> to vector<8x8xf32>
    %1272 = vector.shape_cast %1232 : vector<8x8xf32> to vector<1x8x8xf32>
    tpu.vector_store %arg4[%c7_762, %1269, %c0_763], %1272 {strides = array<i32>} : memref<12x8x8xf32, #tpu.memory_space<vmem>>, vector<1x8x8xf32>,
    %c8_764 = arith.constant 8 : index
    %1273 = arith.index_cast %389 : i32 to index
    %c0_765 = arith.constant 0 : index
    %1274 = vector.load %arg4[%c8_764, %1273, %c0_765] : memref<12x8x8xf32, #tpu.memory_space<vmem>>, vector<1x8x8xf32>
    %1275 = vector.shape_cast %1274 : vector<1x8x8xf32> to vector<8x8xf32>
    %1276 = vector.shape_cast %1234 : vector<8x8xf32> to vector<1x8x8xf32>
    tpu.vector_store %arg4[%c8_764, %1273, %c0_765], %1276 {strides = array<i32>} : memref<12x8x8xf32, #tpu.memory_space<vmem>>, vector<1x8x8xf32>,
    %c9_766 = arith.constant 9 : index
    %1277 = arith.index_cast %389 : i32 to index
    %c0_767 = arith.constant 0 : index
    %1278 = vector.load %arg4[%c9_766, %1277, %c0_767] : memref<12x8x8xf32, #tpu.memory_space<vmem>>, vector<1x8x8xf32>
    %1279 = vector.shape_cast %1278 : vector<1x8x8xf32> to vector<8x8xf32>
    %1280 = vector.shape_cast %1236 : vector<8x8xf32> to vector<1x8x8xf32>
    tpu.vector_store %arg4[%c9_766, %1277, %c0_767], %1280 {strides = array<i32>} : memref<12x8x8xf32, #tpu.memory_space<vmem>>, vector<1x8x8xf32>,
    %c10_768 = arith.constant 10 : index
    %1281 = arith.index_cast %389 : i32 to index
    %c0_769 = arith.constant 0 : index
    %1282 = vector.load %arg4[%c10_768, %1281, %c0_769] : memref<12x8x8xf32, #tpu.memory_space<vmem>>, vector<1x8x8xf32>
    %1283 = vector.shape_cast %1282 : vector<1x8x8xf32> to vector<8x8xf32>
    %1284 = vector.shape_cast %1238 : vector<8x8xf32> to vector<1x8x8xf32>
    tpu.vector_store %arg4[%c10_768, %1281, %c0_769], %1284 {strides = array<i32>} : memref<12x8x8xf32, #tpu.memory_space<vmem>>, vector<1x8x8xf32>,
    %c11_770 = arith.constant 11 : index
    %1285 = arith.index_cast %389 : i32 to index
    %c0_771 = arith.constant 0 : index
    %1286 = vector.load %arg4[%c11_770, %1285, %c0_771] : memref<12x8x8xf32, #tpu.memory_space<vmem>>, vector<1x8x8xf32>
    %1287 = vector.shape_cast %1286 : vector<1x8x8xf32> to vector<8x8xf32>
    %1288 = vector.shape_cast %1240 : vector<8x8xf32> to vector<1x8x8xf32>
    tpu.vector_store %arg4[%c11_770, %1285, %c0_771], %1288 {strides = array<i32>} : memref<12x8x8xf32, #tpu.memory_space<vmem>>, vector<1x8x8xf32>,
    %c1_i32_772 = arith.constant 1 : i32
    return
  }
  func.func @transform_0(%arg0: i32, %arg1: i32) -> i32 {
    %c0_i32 = arith.constant 0 : i32
    %c0_i32_0 = arith.constant 0 : i32
    return %c0_i32 : i32
  }
  func.func @transform_1(%arg0: i32, %arg1: i32) -> (i32, i32) {
    %c0_i32 = arith.constant 0 : i32
    %c0_i32_0 = arith.constant 0 : i32
    %c0_i32_1 = arith.constant 0 : i32
    return %c0_i32, %c0_i32_0 : i32, i32
  }
  func.func @transform_2(%arg0: i32, %arg1: i32) -> (i32, i32, i32) {
    %c0_i32 = arith.constant 0 : i32
    %c0_i32_0 = arith.constant 0 : i32
    return %c0_i32, %arg0, %arg1 : i32, i32, i32
  }
}

</mosaic_0001>

<bundles_post_ra>
// kernel: tpu_custom_call.1
= control target key start
LH: loop header
LB: loop body
LE: loop exit
PB: predicated region body
PF: predicated region fallthrough
CT: control target
= control target key end

     0   :  { %s3741_s0 = inlined_call_operand.<no memory space> [shape: s32[1], index: 0, kind: input, shape index: {}]   ;;  %s3742_s1 = inlined_call_operand.vmem [shape: f32[32,12], index: 1, kind: input, shape index: {}]   ;;  %s3743_s2 = inlined_call_operand.vmem [shape: f32[12,8,8], index: 2, kind: output, shape index: {}]  }
   0x1   :  { %3745 = sst [smem:[#allocation174_spill]] %s3743_s2 }
   0x2   :  { %8 = vsyncpa [#allocation4], 0  ;;  %s15_s11 = sshll.u32 %s3742_s1, 4  ;;  %s1722_s12 = smov [#allocation3]   ;;  %s16_s11 = int_to_ptr.vmem [resolvable:$true] %s15_s11 }
   0x3   :  { %s1723_s13 = smov 128   ;;  %s1724_s14 = smov 8  }
   0x4   :  { %21 = dma.vmem_to_smem %s16_s11, 512, %s1722_s12, [#allocation4], %s1723_s13, %s1723_s13, %s1724_s14  }
   0x5   :  { %1720 = dma.done.wait [#allocation4], 512  }
   0x6   :  { %1721 = vsyncadd [#allocation4], 4294966784 }
   0x7   :  { %26 = sfence }
   0x8   :  { %s1746_s15 = sld [smem:[#allocation3]]  ;;  %v1725_v0 = vmov 8.0   ;;  %v416_v1 = vlaneseq  ;;  %v418_v3 = vstv %s3741_s0  ;;  %v1726_v13 = vmov 2.7725887  }
   0x9   :  { %s1748_s16 = sld [smem:[#allocation3 + $0x1]]  ;;  %1702 = vrcp.f32 %v1725_v0  ;;  %v1727_v34 = vmov 0  }
   0xa   :  { %s1750_s17 = sld [smem:[#allocation3 + $0x2]]  ;;  %v417_v2 = vshrl.u32 %v416_v1, 7  ;;  %v421_v5 = vand.u32 127, %v416_v1  ;;  %1704 = vrcp.f32 %v1726_v13 }
   0xb   :  { %s1752_s18 = sld [smem:[#allocation3 + $0x3]] }
   0xc   :  { %s1754_s19 = sld [smem:[#allocation3 + $0x4]]  ;;  %v419_v4 = vadd.s32 %v418_v3, %v417_v2 }
   0xd   :  { %s1756_s20 = sld [smem:[#allocation3 + $0x5]] }
   0xe   :  { %s1758_s1 = sld [smem:[#allocation3 + $0x6]]  ;;  %v2057_v7 = vsub.s32 %v419_v4, %v421_v5  ;;  %v459_v40 = vstv %s1746_s15 }
   0xf   :  { %s1760_s21 = sld [smem:[#allocation3 + $0x7]]  ;;  %v1703_v6 = vpop.eup %1702  ;;  %v460_v41 = vstv %s1748_s16 }
  0x10   :  { %s1762_s22 = sld [smem:[#allocation3 + $0x8]]  ;;  %v435_v8 = vmul.f32 8.0, %v1703_v6  ;;  %v428_v9 = vsub.s32 0, %v2057_v7  ;;  %vm425_vm0 = vcmp.lt.s32.totalorder %v2057_v7, 0  ;;  %vm439_vm2 = vweird.f32 %v1703_v6  ;;  %v1705_v19 = vpop.eup %1704 }
  0x11   :  { %s1764_s23 = sld [smem:[#allocation3 + $0x9]]  ;;  %v445_v20 = vmul.f32 2.7725887, %v1705_v19  ;;  %vm449_vm3 = vweird.f32 %v1705_v19  ;;  %v426_v35 = vsel %vm425_vm0, 1, %v1727_v34  ;;  %v461_v42 = vstv %s1750_s17 }
  0x12   :  { %s1766_s24 = sld [smem:[#allocation3 + $0xa]]  ;;  %v436_v10 = vsub.f32 1.0, %v435_v8  ;;  %v2072_v11 = vsel %vm425_vm0, %v428_v9, %v2057_v7  ;;  %v427_v37 = vmul.u32 16, %v426_v35  ;;  %v462_v43 = vstv %s1752_s18 }
  0x13   :  { %s1768_s25 = sld [smem:[#allocation3 + $0xb]]  ;;  %vm431_vm1 = vcmp.gt.s32.totalorder %v2072_v11, 8  ;;  %v446_v21 = vsub.f32 1.0, %v445_v20  ;;  %vm430_vm6 = vcmp.lt.s32.totalorder %v2072_v11, 8  ;;  %v463_v44 = vstv %s1754_s19 }
  0x14   :  { %s1770_s26 = sld [smem:[#allocation3 + $0x80]]  ;;  %v437_v12 = vmul.f32 %v1703_v6, %v436_v10  ;;  %v432_v14 = vsel %vm431_vm1, %v2072_v11, 8  ;;  %v464_v45 = vstv %s1756_s20  ;;  %v465_v46 = vstv %s1758_s1 }
  0x15   :  { %s1772_s27 = sld [smem:[#allocation3 + $0x81]]  ;;  %v433_v16 = vcvt.s32.f32 %v432_v14  ;;  %v447_v22 = vmul.f32 %v1705_v19, %v446_v21  ;;  %v466_v47 = vstv %s1760_s21 }
  0x16   :  { %s1774_s28 = sld [smem:[#allocation3 + $0x82]]  ;;  %v438_v15 = vadd.f32 %v1703_v6, %v437_v12  ;;  %v467_v48 = vstv %s1762_s22 }
  0x17   :  { %s1776_s29 = sld [smem:[#allocation3 + $0x83]]  ;;  %v448_v24 = vadd.f32 %v1705_v19, %v447_v22  ;;  %v468_v55 = vstv %s1764_s23 }
  0x18   :  { %s1778_s30 = sld [smem:[#allocation3 + $0x84]]  ;;  %v440_v17 = vsel %vm439_vm2, %v1703_v6, %v438_v15  ;;  %v469_v56 = vstv %s1766_s24 }
  0x19   :  { %3746 = sst [smem:[#allocation6_spill]] %s1768_s25  ;;  %v441_v18 = vmul.f32 %v440_v17, %v433_v16  ;;  %v450_v26 = vsel %vm449_vm3, %v1705_v19, %v448_v24 }
  0x1a   :  { %s1780_s3 = sld [smem:[#allocation3 + $0x85]]  ;;  %v472_v49 = vstv %s1770_s26 }
  0x1b   :  { %s1782_s4 = sld [smem:[#allocation3 + $0x86]]  ;;  %1706 = vlog2.f32 %v441_v18  ;;  %v474_v50 = vstv %s1772_s27 }
  0x1c   :  { %s1784_s5 = sld [smem:[#allocation3 + $0x87]]  ;;  %v476_v51 = vstv %s1774_s28 }
  0x1d   :  { %s1786_s6 = sld [smem:[#allocation3 + $0x88]]  ;;  %v478_v52 = vstv %s1776_s29 }
  0x1e   :  { %s1788_s7 = sld [smem:[#allocation3 + $0x89]]  ;;  %v480_v53 = vstv %s1778_s30 }
  0x1f   :  { %s1790_s8 = sld [smem:[#allocation3 + $0x8a]] }
  0x20   :  { %s1792_s9 = sld [smem:[#allocation3 + $0x8b]]  ;;  %v482_v54 = vstv %s1780_s3 }
  0x21   :  { %s1794_s10 = sld [smem:[#allocation3 + $0x100]]  ;;  %v1707_v23 = vpop.eup %1706  ;;  %v484_v57 = vstv %s1782_s4 }
  0x22   :  { %s1796_s11 = sld [smem:[#allocation3 + $0x101]]  ;;  %v443_v25 = vmul.f32 0.6931472, %v1707_v23  ;;  %v486_v58 = vstv %s1784_s5 }
  0x23   :  { %3747 = sst [smem:[#allocation7_spill]] %s1786_s6 }
  0x24   :  { %3748 = sst [smem:[#allocation8_spill]] %s1788_s7  ;;  %v451_v27 = vmul.f32 %v450_v26, %v443_v25 }
  0x25   :  { %3749 = sst [smem:[#allocation9_spill]] %s1790_s8 }
  0x26   :  { %3750 = sst [smem:[#allocation10_spill]] %s1792_s9  ;;  %v452_v28 = vmul.f32 8.0, %v451_v27 }
  0x27   :  { %3751 = sst [smem:[#allocation11_spill]] %s1794_s10 }
  0x28   :  { %3752 = sst [smem:[#allocation12_spill]] %s1796_s11  ;;  %v1692_v29 = vceil.f32 %v452_v28  ;;  %v1693_v30 = vfloor.f32 %v452_v28  ;;  %vm1691_vm4 = vcmp.lt.s32.totalorder %v452_v28, 0 }
  0x29   :  { %s1798_s12 = sld [smem:[#allocation3 + $0x102]] }
  0x2a   :  { %s1800_s13 = sld [smem:[#allocation3 + $0x103]]  ;;  %v1694_v31 = vsel %vm1691_vm4, %v1692_v29, %v1693_v30 }
  0x2b   :  { %s1802_s14 = sld [smem:[#allocation3 + $0x104]]  ;;  %v1695_v32 = vcvt.f32.s32 %v1694_v31 }
  0x2c   :  { %s1804_s2 = sld [smem:[#allocation3 + $0x105]] }
  0x2d   :  { %s1806_s25 = sld [smem:[#allocation3 + $0x106]]  ;;  %v454_v33 = vadd.s32 8, %v1695_v32 }
  0x2e   :  { %s1808_s6 = sld [smem:[#allocation3 + $0x107]] }
  0x2f   :  { %3753 = sst [smem:[#allocation13_spill]] %s1798_s12  ;;  %vm455_vm5 = vcmp.lt.s32.totalorder %v454_v33, 15 }
  0x30   :  { %3754 = sst [smem:[#allocation14_spill]] %s1800_s13  ;;  %v456_v36 = vsel %vm455_vm5, %v454_v33, 15 }
  0x31   :  { %3755 = sst [smem:[#allocation15_spill]] %s1802_s14  ;;  %v457_v38 = vsel %vm430_vm6, %v2072_v11, %v456_v36 }
  0x32   :  { %3756 = sst [smem:[#allocation16_spill]] %s1804_s2  ;;  %v2152_v39 = vadd.s32 %v457_v38, %v427_v37 }
  0x33   :  { %3757 = sst [smem:[#allocation17_spill]] %s1806_s25 }
  0x34   :  { %3758 = sst [smem:[#allocation18_spill]] %s1808_s6  ;;  %vm471_vm7 = vcmp.eq.s32.totalorder %v2152_v39, 1  ;;  %vm496_vm8 = vcmp.eq.s32.totalorder %v2152_v39, 2  ;;  %vm521_vm9 = vcmp.eq.s32.totalorder %v2152_v39, 3  ;;  %vm546_vm10 = vcmp.eq.s32.totalorder %v2152_v39, 4 }
  0x35   :  { %s1810_s7 = sld [smem:[#allocation3 + $0x108]]  ;;  %v473_v60 = vsel %vm471_vm7, %v472_v49, %v459_v40  ;;  %v475_v61 = vsel %vm471_vm7, %v474_v50, %v460_v41  ;;  %v477_v63 = vsel %vm471_vm7, %v476_v51, %v461_v42  ;;  %v479_v0 = vsel %vm471_vm7, %v478_v52, %v462_v43 }
  0x36   :  { %s1812_s8 = sld [smem:[#allocation3 + $0x109]]  ;;  %v481_v1 = vsel %vm471_vm7, %v480_v53, %v463_v44  ;;  %v483_v2 = vsel %vm471_vm7, %v482_v54, %v464_v45  ;;  %v485_v3 = vsel %vm471_vm7, %v484_v57, %v465_v46  ;;  %v487_v4 = vsel %vm471_vm7, %v486_v58, %v466_v47 }
  0x37   :  { %s1814_s9 = sld [smem:[#allocation3 + $0x10a]]  ;;  %vm571_vm11 = vcmp.eq.s32.totalorder %v2152_v39, 5  ;;  %vm596_vm12 = vcmp.eq.s32.totalorder %v2152_v39, 6  ;;  %vm621_vm13 = vcmp.eq.s32.totalorder %v2152_v39, 7  ;;  %vm646_vm14 = vcmp.eq.s32.totalorder %v2152_v39, 8 }
  0x38   :  { %s1816_s10 = sld [smem:[#allocation3 + $0x10b]]  ;;  %vm671_vm15 = vcmp.eq.s32.totalorder %v2152_v39, 9  ;;  %vm696_vm0 = vcmp.eq.s32.totalorder %v2152_v39, 10  ;;  %vm721_vm1 = vcmp.eq.s32.totalorder %v2152_v39, 11  ;;  %vm746_vm2 = vcmp.eq.s32.totalorder %v2152_v39, 12 }
  0x39   :  { %s1818_s11 = sld [smem:[#allocation3 + $0x180]]  ;;  %vm771_vm3 = vcmp.eq.s32.totalorder %v2152_v39, 13  ;;  %vm796_vm4 = vcmp.eq.s32.totalorder %v2152_v39, 14  ;;  %vm821_vm5 = vcmp.eq.s32.totalorder %v2152_v39, 15  ;;  %vm846_vm6 = vcmp.eq.s32.totalorder %v2152_v39, 16 }
  0x3a   :  { %s1820_s12 = sld [smem:[#allocation3 + $0x181]] }
  0x3b   :  { %3759 = sst [smem:[#allocation19_spill]] %s1810_s7 }
  0x3c   :  { %3760 = sst [smem:[#allocation20_spill]] %s1812_s8 }
  0x3d   :  { %3761 = sst [smem:[#allocation21_spill]] %s1814_s9 }
  0x3e   :  { %3762 = sst [smem:[#allocation22_spill]] %s1816_s10 }
  0x3f   :  { %3763 = sst [smem:[#allocation23_spill]] %s1818_s11 }
  0x40   :  { %3764 = sst [smem:[#allocation24_spill]] %s1820_s12 }
  0x41   :  { %s1822_s13 = sld [smem:[#allocation3 + $0x182]] }
  0x42   :  { %s1824_s14 = sld [smem:[#allocation3 + $0x183]] }
  0x43   :  { %s1826_s2 = sld [smem:[#allocation3 + $0x184]] }
  0x44   :  { %s1828_s25 = sld [smem:[#allocation3 + $0x185]] }
  0x45   :  { %s1830_s6 = sld [smem:[#allocation3 + $0x186]] }
  0x46   :  { %s1832_s7 = sld [smem:[#allocation3 + $0x187]] }
  0x47   :  { %3765 = sst [smem:[#allocation25_spill]] %s1822_s13 }
  0x48   :  { %3766 = sst [smem:[#allocation26_spill]] %s1824_s14 }
  0x49   :  { %3767 = sst [smem:[#allocation27_spill]] %s1826_s2 }
  0x4a   :  { %3768 = sst [smem:[#allocation28_spill]] %s1828_s25 }
  0x4b   :  { %3769 = sst [smem:[#allocation29_spill]] %s1830_s6 }
  0x4c   :  { %3770 = sst [smem:[#allocation30_spill]] %s1832_s7 }
  0x4d   :  { %s1834_s8 = sld [smem:[#allocation3 + $0x188]] }
  0x4e   :  { %s1836_s9 = sld [smem:[#allocation3 + $0x189]] }
  0x4f   :  { %s1838_s10 = sld [smem:[#allocation3 + $0x18a]] }
  0x50   :  { %s1840_s11 = sld [smem:[#allocation3 + $0x18b]] }
  0x51   :  { %s1842_s12 = sld [smem:[#allocation3 + $0x200]] }
  0x52   :  { %s1844_s13 = sld [smem:[#allocation3 + $0x201]] }
  0x53   :  { %3771 = sst [smem:[#allocation31_spill]] %s1834_s8 }
  0x54   :  { %3772 = sst [smem:[#allocation32_spill]] %s1836_s9 }
  0x55   :  { %3773 = sst [smem:[#allocation33_spill]] %s1838_s10 }
  0x56   :  { %3774 = sst [smem:[#allocation34_spill]] %s1840_s11 }
  0x57   :  { %3775 = sst [smem:[#allocation35_spill]] %s1842_s12 }
  0x58   :  { %3776 = sst [smem:[#allocation36_spill]] %s1844_s13 }
  0x59   :  { %s1846_s14 = sld [smem:[#allocation3 + $0x202]] }
  0x5a   :  { %s1848_s2 = sld [smem:[#allocation3 + $0x203]] }
  0x5b   :  { %s1850_s25 = sld [smem:[#allocation3 + $0x204]] }
  0x5c   :  { %s1852_s6 = sld [smem:[#allocation3 + $0x205]] }
  0x5d   :  { %s1854_s7 = sld [smem:[#allocation3 + $0x206]] }
  0x5e   :  { %s1856_s8 = sld [smem:[#allocation3 + $0x207]] }
  0x5f   :  { %3777 = sst [smem:[#allocation37_spill]] %s1846_s14 }
  0x60   :  { %3778 = sst [smem:[#allocation38_spill]] %s1848_s2 }
  0x61   :  { %3779 = sst [smem:[#allocation39_spill]] %s1850_s25 }
  0x62   :  { %3780 = sst [smem:[#allocation40_spill]] %s1852_s6 }
  0x63   :  { %3781 = sst [smem:[#allocation41_spill]] %s1854_s7 }
  0x64   :  { %3782 = sst [smem:[#allocation42_spill]] %s1856_s8 }
  0x65   :  { %s1858_s9 = sld [smem:[#allocation3 + $0x208]] }
  0x66   :  { %s1860_s10 = sld [smem:[#allocation3 + $0x209]] }
  0x67   :  { %s1862_s11 = sld [smem:[#allocation3 + $0x20a]] }
  0x68   :  { %s1864_s12 = sld [smem:[#allocation3 + $0x20b]] }
  0x69   :  { %s1866_s13 = sld [smem:[#allocation3 + $0x280]] }
  0x6a   :  { %s1868_s14 = sld [smem:[#allocation3 + $0x281]] }
  0x6b   :  { %3783 = sst [smem:[#allocation43_spill]] %s1858_s9 }
  0x6c   :  { %3784 = sst [smem:[#allocation44_spill]] %s1860_s10 }
  0x6d   :  { %3785 = sst [smem:[#allocation45_spill]] %s1862_s11 }
  0x6e   :  { %3786 = sst [smem:[#allocation46_spill]] %s1864_s12 }
  0x6f   :  { %3787 = sst [smem:[#allocation47_spill]] %s1866_s13 }
  0x70   :  { %3788 = sst [smem:[#allocation48_spill]] %s1868_s14 }
  0x71   :  { %s1870_s2 = sld [smem:[#allocation3 + $0x282]] }
  0x72   :  { %s1872_s25 = sld [smem:[#allocation3 + $0x283]] }
  0x73   :  { %s1874_s6 = sld [smem:[#allocation3 + $0x284]] }
  0x74   :  { %s1876_s7 = sld [smem:[#allocation3 + $0x285]] }
  0x75   :  { %s1878_s8 = sld [smem:[#allocation3 + $0x286]] }
  0x76   :  { %s1880_s9 = sld [smem:[#allocation3 + $0x287]] }
  0x77   :  { %3789 = sst [smem:[#allocation49_spill]] %s1870_s2 }
  0x78   :  { %3790 = sst [smem:[#allocation50_spill]] %s1872_s25 }
  0x79   :  { %3791 = sst [smem:[#allocation51_spill]] %s1874_s6 }
  0x7a   :  { %3792 = sst [smem:[#allocation52_spill]] %s1876_s7 }
  0x7b   :  { %3793 = sst [smem:[#allocation53_spill]] %s1878_s8 }
  0x7c   :  { %3794 = sst [smem:[#allocation54_spill]] %s1880_s9 }
  0x7d   :  { %s1882_s10 = sld [smem:[#allocation3 + $0x288]] }
  0x7e   :  { %s1884_s11 = sld [smem:[#allocation3 + $0x289]] }
  0x7f   :  { %s1886_s12 = sld [smem:[#allocation3 + $0x28a]] }
  0x80   :  { %s1888_s13 = sld [smem:[#allocation3 + $0x28b]] }
  0x81   :  { %s1890_s14 = sld [smem:[#allocation3 + $0x300]] }
  0x82   :  { %s1892_s2 = sld [smem:[#allocation3 + $0x301]] }
  0x83   :  { %3795 = sst [smem:[#allocation55_spill]] %s1882_s10 }
  0x84   :  { %3796 = sst [smem:[#allocation56_spill]] %s1884_s11 }
  0x85   :  { %3797 = sst [smem:[#allocation57_spill]] %s1886_s12 }
  0x86   :  { %3798 = sst [smem:[#allocation58_spill]] %s1888_s13 }
  0x87   :  { %3799 = sst [smem:[#allocation59_spill]] %s1890_s14 }
  0x88   :  { %3800 = sst [smem:[#allocation60_spill]] %s1892_s2 }
  0x89   :  { %s1894_s25 = sld [smem:[#allocation3 + $0x302]] }
  0x8a   :  { %s1896_s6 = sld [smem:[#allocation3 + $0x303]] }
  0x8b   :  { %s1898_s7 = sld [smem:[#allocation3 + $0x304]] }
  0x8c   :  { %s1900_s8 = sld [smem:[#allocation3 + $0x305]] }
  0x8d   :  { %s1902_s9 = sld [smem:[#allocation3 + $0x306]] }
  0x8e   :  { %s1904_s10 = sld [smem:[#allocation3 + $0x307]] }
  0x8f   :  { %3801 = sst [smem:[#allocation61_spill]] %s1894_s25 }
  0x90   :  { %3802 = sst [smem:[#allocation62_spill]] %s1896_s6 }
  0x91   :  { %3803 = sst [smem:[#allocation63_spill]] %s1898_s7 }
  0x92   :  { %3804 = sst [smem:[#allocation64_spill]] %s1900_s8 }
  0x93   :  { %3805 = sst [smem:[#allocation65_spill]] %s1902_s9 }
  0x94   :  { %3806 = sst [smem:[#allocation66_spill]] %s1904_s10 }
  0x95   :  { %s1906_s11 = sld [smem:[#allocation3 + $0x308]] }
  0x96   :  { %s1908_s12 = sld [smem:[#allocation3 + $0x309]] }
  0x97   :  { %s1910_s13 = sld [smem:[#allocation3 + $0x30a]] }
  0x98   :  { %s1912_s14 = sld [smem:[#allocation3 + $0x30b]] }
  0x99   :  { %s1914_s2 = sld [smem:[#allocation3 + $0x380]] }
  0x9a   :  { %s1916_s25 = sld [smem:[#allocation3 + $0x381]] }
  0x9b   :  { %3807 = sst [smem:[#allocation67_spill]] %s1906_s11 }
  0x9c   :  { %3808 = sst [smem:[#allocation68_spill]] %s1908_s12 }
  0x9d   :  { %3809 = sst [smem:[#allocation69_spill]] %s1910_s13 }
  0x9e   :  { %3810 = sst [smem:[#allocation70_spill]] %s1912_s14 }
  0x9f   :  { %3811 = sst [smem:[#allocation71_spill]] %s1914_s2 }
  0xa0   :  { %3812 = sst [smem:[#allocation72_spill]] %s1916_s25 }
  0xa1   :  { %s1918_s6 = sld [smem:[#allocation3 + $0x382]] }
  0xa2   :  { %s1920_s7 = sld [smem:[#allocation3 + $0x383]] }
  0xa3   :  { %s1922_s8 = sld [smem:[#allocation3 + $0x384]] }
  0xa4   :  { %s1924_s9 = sld [smem:[#allocation3 + $0x385]] }
  0xa5   :  { %s1926_s10 = sld [smem:[#allocation3 + $0x386]] }
  0xa6   :  { %s1928_s11 = sld [smem:[#allocation3 + $0x387]] }
  0xa7   :  { %3813 = sst [smem:[#allocation73_spill]] %s1918_s6 }
  0xa8   :  { %3814 = sst [smem:[#allocation74_spill]] %s1920_s7 }
  0xa9   :  { %3815 = sst [smem:[#allocation75_spill]] %s1922_s8 }
  0xaa   :  { %3816 = sst [smem:[#allocation76_spill]] %s1924_s9 }
  0xab   :  { %3817 = sst [smem:[#allocation77_spill]] %s1926_s10 }
  0xac   :  { %3818 = sst [smem:[#allocation78_spill]] %s1928_s11 }
  0xad   :  { %s1930_s12 = sld [smem:[#allocation3 + $0x388]] }
  0xae   :  { %s1932_s13 = sld [smem:[#allocation3 + $0x389]] }
  0xaf   :  { %s1934_s14 = sld [smem:[#allocation3 + $0x38a]] }
  0xb0   :  { %s1936_s2 = sld [smem:[#allocation3 + $0x38b]] }
  0xb1   :  { %s1938_s25 = sld [smem:[#allocation3 + $0x400]] }
  0xb2   :  { %s1940_s6 = sld [smem:[#allocation3 + $0x401]] }
  0xb3   :  { %3819 = sst [smem:[#allocation79_spill]] %s1930_s12 }
  0xb4   :  { %3820 = sst [smem:[#allocation80_spill]] %s1932_s13 }
  0xb5   :  { %3821 = sst [smem:[#allocation81_spill]] %s1934_s14 }
  0xb6   :  { %3822 = sst [smem:[#allocation82_spill]] %s1936_s2 }
  0xb7   :  { %3823 = sst [smem:[#allocation83_spill]] %s1938_s25 }
  0xb8   :  { %3824 = sst [smem:[#allocation84_spill]] %s1940_s6 }
  0xb9   :  { %s1942_s7 = sld [smem:[#allocation3 + $0x402]] }
  0xba   :  { %s1944_s8 = sld [smem:[#allocation3 + $0x403]] }
  0xbb   :  { %s1946_s9 = sld [smem:[#allocation3 + $0x404]] }
  0xbc   :  { %s1948_s10 = sld [smem:[#allocation3 + $0x405]] }
  0xbd   :  { %s1950_s11 = sld [smem:[#allocation3 + $0x406]] }
  0xbe   :  { %s1952_s12 = sld [smem:[#allocation3 + $0x407]] }
  0xbf   :  { %3825 = sst [smem:[#allocation85_spill]] %s1942_s7 }
  0xc0   :  { %3826 = sst [smem:[#allocation86_spill]] %s1944_s8 }
  0xc1   :  { %3827 = sst [smem:[#allocation87_spill]] %s1946_s9 }
  0xc2   :  { %3828 = sst [smem:[#allocation88_spill]] %s1948_s10 }
  0xc3   :  { %3829 = sst [smem:[#allocation89_spill]] %s1950_s11 }
  0xc4   :  { %3830 = sst [smem:[#allocation90_spill]] %s1952_s12 }
  0xc5   :  { %s1954_s13 = sld [smem:[#allocation3 + $0x408]] }
  0xc6   :  { %s1956_s14 = sld [smem:[#allocation3 + $0x409]] }
  0xc7   :  { %s1958_s2 = sld [smem:[#allocation3 + $0x40a]] }
  0xc8   :  { %s1960_s25 = sld [smem:[#allocation3 + $0x40b]] }
  0xc9   :  { %s1962_s6 = sld [smem:[#allocation3 + $0x480]] }
  0xca   :  { %s1964_s7 = sld [smem:[#allocation3 + $0x481]] }
  0xcb   :  { %3831 = sst [smem:[#allocation91_spill]] %s1954_s13 }
  0xcc   :  { %3832 = sst [smem:[#allocation92_spill]] %s1956_s14 }
  0xcd   :  { %3833 = sst [smem:[#allocation93_spill]] %s1958_s2 }
  0xce   :  { %3834 = sst [smem:[#allocation94_spill]] %s1960_s25 }
  0xcf   :  { %3835 = sst [smem:[#allocation95_spill]] %s1962_s6 }
  0xd0   :  { %3836 = sst [smem:[#allocation96_spill]] %s1964_s7 }
  0xd1   :  { %s1966_s8 = sld [smem:[#allocation3 + $0x482]] }
  0xd2   :  { %s1968_s9 = sld [smem:[#allocation3 + $0x483]] }
  0xd3   :  { %s1970_s10 = sld [smem:[#allocation3 + $0x484]] }
  0xd4   :  { %s1972_s11 = sld [smem:[#allocation3 + $0x485]] }
  0xd5   :  { %s1974_s12 = sld [smem:[#allocation3 + $0x486]] }
  0xd6   :  { %s1976_s13 = sld [smem:[#allocation3 + $0x487]] }
  0xd7   :  { %3837 = sst [smem:[#allocation97_spill]] %s1966_s8 }
  0xd8   :  { %3838 = sst [smem:[#allocation98_spill]] %s1968_s9 }
  0xd9   :  { %3839 = sst [smem:[#allocation99_spill]] %s1970_s10 }
  0xda   :  { %3840 = sst [smem:[#allocation100_spill]] %s1972_s11 }
  0xdb   :  { %3841 = sst [smem:[#allocation101_spill]] %s1974_s12 }
  0xdc   :  { %3842 = sst [smem:[#allocation102_spill]] %s1976_s13 }
  0xdd   :  { %s1978_s14 = sld [smem:[#allocation3 + $0x488]] }
  0xde   :  { %s1980_s2 = sld [smem:[#allocation3 + $0x489]] }
  0xdf   :  { %s1982_s25 = sld [smem:[#allocation3 + $0x48a]] }
  0xe0   :  { %s1984_s6 = sld [smem:[#allocation3 + $0x48b]] }
  0xe1   :  { %s1986_s7 = sld [smem:[#allocation3 + $0x500]] }
  0xe2   :  { %s1988_s8 = sld [smem:[#allocation3 + $0x501]] }
  0xe3   :  { %3843 = sst [smem:[#allocation103_spill]] %s1978_s14 }
  0xe4   :  { %3844 = sst [smem:[#allocation104_spill]] %s1980_s2 }
  0xe5   :  { %3845 = sst [smem:[#allocation105_spill]] %s1982_s25 }
  0xe6   :  { %3846 = sst [smem:[#allocation106_spill]] %s1984_s6 }
  0xe7   :  { %3847 = sst [smem:[#allocation107_spill]] %s1986_s7 }
  0xe8   :  { %3848 = sst [smem:[#allocation108_spill]] %s1988_s8 }
  0xe9   :  { %s1990_s9 = sld [smem:[#allocation3 + $0x502]] }
  0xea   :  { %s1992_s10 = sld [smem:[#allocation3 + $0x503]] }
  0xeb   :  { %s1994_s11 = sld [smem:[#allocation3 + $0x504]] }
  0xec   :  { %s1996_s12 = sld [smem:[#allocation3 + $0x505]] }
  0xed   :  { %s1998_s13 = sld [smem:[#allocation3 + $0x506]] }
  0xee   :  { %s2000_s14 = sld [smem:[#allocation3 + $0x507]] }
  0xef   :  { %3849 = sst [smem:[#allocation109_spill]] %s1990_s9 }
  0xf0   :  { %3850 = sst [smem:[#allocation110_spill]] %s1992_s10 }
  0xf1   :  { %3851 = sst [smem:[#allocation111_spill]] %s1994_s11 }
  0xf2   :  { %3852 = sst [smem:[#allocation112_spill]] %s1996_s12 }
  0xf3   :  { %3853 = sst [smem:[#allocation113_spill]] %s1998_s13 }
  0xf4   :  { %3854 = sst [smem:[#allocation114_spill]] %s2000_s14 }
  0xf5   :  { %s2002_s2 = sld [smem:[#allocation3 + $0x508]] }
  0xf6   :  { %s2004_s25 = sld [smem:[#allocation3 + $0x509]] }
  0xf7   :  { %s2006_s6 = sld [smem:[#allocation3 + $0x50a]] }
  0xf8   :  { %s2008_s7 = sld [smem:[#allocation3 + $0x50b]] }
  0xf9   :  { %s2010_s8 = sld [smem:[#allocation3 + $0x580]] }
  0xfa   :  { %s2012_s9 = sld [smem:[#allocation3 + $0x581]] }
  0xfb   :  { %3855 = sst [smem:[#allocation115_spill]] %s2002_s2 }
  0xfc   :  { %3856 = sst [smem:[#allocation116_spill]] %s2004_s25 }
  0xfd   :  { %3857 = sst [smem:[#allocation117_spill]] %s2006_s6 }
  0xfe   :  { %3858 = sst [smem:[#allocation118_spill]] %s2008_s7 }
  0xff   :  { %3859 = sst [smem:[#allocation119_spill]] %s2010_s8 }
 0x100   :  { %3860 = sst [smem:[#allocation120_spill]] %s2012_s9 }
 0x101   :  { %s2014_s10 = sld [smem:[#allocation3 + $0x582]] }
 0x102   :  { %s2016_s11 = sld [smem:[#allocation3 + $0x583]] }
 0x103   :  { %s2018_s12 = sld [smem:[#allocation3 + $0x584]] }
 0x104   :  { %s2020_s13 = sld [smem:[#allocation3 + $0x585]] }
 0x105   :  { %s2022_s14 = sld [smem:[#allocation3 + $0x586]] }
 0x106   :  { %s2024_s2 = sld [smem:[#allocation3 + $0x587]] }
 0x107   :  { %3861 = sst [smem:[#allocation121_spill]] %s2014_s10 }
 0x108   :  { %3862 = sst [smem:[#allocation122_spill]] %s2016_s11 }
 0x109   :  { %s2026_s25 = sld [smem:[#allocation3 + $0x588]] }
 0x10a   :  { %3863 = sst [smem:[#allocation123_spill]] %s2020_s13 }
 0x10b   :  { %s2028_s6 = sld [smem:[#allocation3 + $0x589]] }
 0x10c   :  { %3864 = sst [smem:[#allocation124_spill]] %s2024_s2 }
 0x10d   :  { %s2030_s7 = sld [smem:[#allocation3 + $0x58a]] }
 0x10e   :  { %s2032_s8 = sld [smem:[#allocation3 + $0x58b]] }
 0x10f   :  { %3865 = sst [smem:[#allocation125_spill]] %s2026_s25 }
 0x110   :  { %s2034_s9 = sld [smem:[#allocation3 + $0x600]] }
 0x111   :  { %3866 = sst [smem:[#allocation126_spill]] %s2028_s6 }
 0x112   :  { %s2036_s10 = sld [smem:[#allocation3 + $0x601]] }
 0x113   :  { %3867 = sst [smem:[#allocation127_spill]] %s2030_s7 }
 0x114   :  { %3868 = sst [smem:[#allocation128_spill]] %s2032_s8 }
 0x115   :  { %s2038_s11 = sld [smem:[#allocation3 + $0x602]] }
 0x116   :  { %3869 = sst [smem:[#allocation129_spill]] %s2034_s9 }
 0x117   :  { %s2040_s13 = sld [smem:[#allocation3 + $0x603]] }
 0x118   :  { %s2042_s2 = sld [smem:[#allocation3 + $0x604]] }
 0x119   :  { %s2044_s25 = sld [smem:[#allocation3 + $0x605]] }
 0x11a   :  { %s2046_s6 = sld [smem:[#allocation3 + $0x606]] }
 0x11b   :  { %3870 = sst [smem:[#allocation130_spill]] %s2038_s11 }
 0x11c   :  { %s2051_s9 = sld [smem:[#allocation3 + $0x607]] }
 0x11d   :  { %3871 = sst [smem:[#allocation131_spill]] %s2040_s13 }
 0x11e   :  { %3872 = sst [smem:[#allocation132_spill]] %s2042_s2 }
 0x11f   :  { %3873 = sst [smem:[#allocation133_spill]] %s2044_s25 }
 0x120   :  { %s2053_s11 = sld [smem:[#allocation3 + $0x608]] }
 0x121   :  { %s2055_s13 = sld [smem:[#allocation3 + $0x609]] }
 0x122   :  { %3874 = sst [smem:[#allocation134_spill]] %s2051_s9 }
 0x123   :  { %s2059_s25 = sld [smem:[#allocation3 + $0x60a]] }
 0x124   :  { %s2061_s2 = sld [smem:[#allocation3 + $0x60b]] }
 0x125   :  { %s2064_s0 = sld [smem:[#allocation3 + $0x680]] }
 0x126   :  { %3875 = sst [smem:[#allocation135_spill]] %s2053_s11 }
 0x127   :  { %3876 = sst [smem:[#allocation136_spill]] %s2055_s13 }
 0x128   :  { %s2067_s7 = sld [smem:[#allocation3 + $0x681]] }
 0x129   :  { %3877 = sst [smem:[#allocation137_spill]] %s2059_s25 }
 0x12a   :  { %3878 = sst [smem:[#allocation138_spill]] %s2061_s2 }
 0x12b   :  { %3879 = sst [smem:[#allocation139_spill]] %s2064_s0 }
 0x12c   :  { %s2074_s8 = sld [smem:[#allocation3 + $0x682]] }
 0x12d   :  { %s2077_s2 = sld [smem:[#allocation3 + $0x683]] }
 0x12e   :  { %3880 = sst [smem:[#allocation140_spill]] %s2067_s7 }
 0x12f   :  { %s2080_s0 = sld [smem:[#allocation3 + $0x684]] }
 0x130   :  { %s2082_s7 = sld [smem:[#allocation3 + $0x685]] }
 0x131   :  { %s2084_s25 = sld [smem:[#allocation3 + $0x686]] }
 0x132   :  { %3881 = sst [smem:[#allocation141_spill]] %s2074_s8 }
 0x133   :  { %3882 = sst [smem:[#allocation142_spill]] %s2077_s2 }
 0x134   :  { %s2086_s13 = sld [smem:[#allocation3 + $0x687]] }
 0x135   :  { %3883 = sst [smem:[#allocation143_spill]] %s2080_s0 }
 0x136   :  { %3884 = sst [smem:[#allocation144_spill]] %s2082_s7 }
 0x137   :  { %3885 = sst [smem:[#allocation145_spill]] %s2084_s25 }
 0x138   :  { %s2088_s8 = sld [smem:[#allocation3 + $0x688]] }
 0x139   :  { %s2090_s2 = sld [smem:[#allocation3 + $0x689]] }
 0x13a   :  { %3886 = sst [smem:[#allocation146_spill]] %s2086_s13 }
 0x13b   :  { %s2092_s11 = sld [smem:[#allocation3 + $0x68a]] }
 0x13c   :  { %s2094_s0 = sld [smem:[#allocation3 + $0x68b]] }
 0x13d   :  { %s2096_s9 = sld [smem:[#allocation3 + $0x700]] }
 0x13e   :  { %3887 = sst [smem:[#allocation147_spill]] %s2088_s8 }
 0x13f   :  { %3888 = sst [smem:[#allocation148_spill]] %s2090_s2 }
 0x140   :  { %s2098_s7 = sld [smem:[#allocation3 + $0x701]] }
 0x141   :  { %3889 = sst [smem:[#allocation149_spill]] %s2092_s11 }
 0x142   :  { %3890 = sst [smem:[#allocation150_spill]] %s2094_s0 }
 0x143   :  { %3891 = sst [smem:[#allocation151_spill]] %s2096_s9 }
 0x144   :  { %s2100_s25 = sld [smem:[#allocation3 + $0x702]] }
 0x145   :  { %s2102_s13 = sld [smem:[#allocation3 + $0x703]] }
 0x146   :  { %3892 = sst [smem:[#allocation152_spill]] %s2098_s7 }
 0x147   :  { %s2104_s8 = sld [smem:[#allocation3 + $0x704]] }
 0x148   :  { %s2106_s11 = sld [smem:[#allocation3 + $0x705]] }
 0x149   :  { %s2108_s0 = sld [smem:[#allocation3 + $0x706]] }
 0x14a   :  { %3893 = sst [smem:[#allocation153_spill]] %s2100_s25 }
 0x14b   :  { %3894 = sst [smem:[#allocation154_spill]] %s2102_s13 }
 0x14c   :  { %s2110_s9 = sld [smem:[#allocation3 + $0x707]] }
 0x14d   :  { %3895 = sst [smem:[#allocation155_spill]] %s2104_s8 }
 0x14e   :  { %3896 = sst [smem:[#allocation156_spill]] %s2106_s11 }
 0x14f   :  { %3897 = sst [smem:[#allocation157_spill]] %s2108_s0 }
 0x150   :  { %s2112_s7 = sld [smem:[#allocation3 + $0x708]] }
 0x151   :  { %s2114_s2 = sld [smem:[#allocation3 + $0x709]] }
 0x152   :  { %3898 = sst [smem:[#allocation158_spill]] %s2110_s9 }
 0x153   :  { %s2116_s13 = sld [smem:[#allocation3 + $0x70a]] }
 0x154   :  { %s2118_s25 = sld [smem:[#allocation3 + $0x70b]] }
 0x155   :  { %s2120_s8 = sld [smem:[#allocation3 + $0x780]] }
 0x156   :  { %3899 = sst [smem:[#allocation159_spill]] %s2112_s7 }
 0x157   :  { %3900 = sst [smem:[#allocation160_spill]] %s2114_s2 }
 0x158   :  { %s2122_s11 = sld [smem:[#allocation3 + $0x781]] }
 0x159   :  { %3901 = sst [smem:[#allocation161_spill]] %s2116_s13 }
 0x15a   :  { %s2124_s0 = sld [smem:[#allocation3 + $0x782]] }
 0x15b   :  { %3902 = sst [smem:[#allocation162_spill]] %s2120_s8 }
 0x15c   :  { %s2126_s9 = sld [smem:[#allocation3 + $0x783]] }
 0x15d   :  { %s2128_s7 = sld [smem:[#allocation3 + $0x784]] }
 0x15e   :  { %s2130_s2 = sld [smem:[#allocation3 + $0x785]] }
 0x15f   :  { %s2132_s13 = sld [smem:[#allocation3 + $0x786]] }
 0x160   :  { %3903 = sst [smem:[#allocation163_spill]] %s2124_s0 }
 0x161   :  { %s2136_s8 = sld [smem:[#allocation3 + $0x787]] }
 0x162   :  { %3904 = sst [smem:[#allocation164_spill]] %s2126_s9 }
 0x163   :  { %3905 = sst [smem:[#allocation165_spill]] %s2128_s7 }
 0x164   :  { %3906 = sst [smem:[#allocation166_spill]] %s2130_s2 }
 0x165   :  { %3907 = sst [smem:[#allocation167_spill]] %s2132_s13 }
 0x166   :  { %s2139_s9 = sld [smem:[#allocation3 + $0x788]] }
 0x167   :  { %3908 = sst [smem:[#allocation168_spill]] %s2136_s8 }
 0x168   :  { %s2141_s7 = sld [smem:[#allocation3 + $0x789]] }
 0x169   :  { %s2143_s13 = sld [smem:[#allocation3 + $0x78a]] }
 0x16a   :  { %s2146_s2 = sld [smem:[#allocation3 + $0x78b]] }
 0x16b   :  { %s2148_s8 = sld [smem:[#allocation3 + $0x800]] }
 0x16c   :  { %3909 = sst [smem:[#allocation169_spill]] %s2139_s9 }
 0x16d   :  { %s2150_s0 = sld [smem:[#allocation3 + $0x801]] }
 0x16e   :  { %3910 = sst [smem:[#allocation170_spill]] %s2141_s7 }
 0x16f   :  { %s2154_s7 = sld [smem:[#allocation3 + $0x802]] }
 0x170   :  { %3911 = sst [smem:[#allocation171_spill]] %s2146_s2 }
 0x171   :  { %s2156_s9 = sld [smem:[#allocation3 + $0x803]] }
 0x172   :  { %s2162_s2 = sld [smem:[#allocation3 + $0x804]] }
 0x173   :  { %s3915_s15 = sld [smem:[#allocation7_spill]] }
 0x174   :  { %s2174_s16 = sld [smem:[#allocation3 + $0x806]] }
 0x175   :  { %3912 = sst [smem:[#allocation172_spill]] %s2154_s7 }
 0x176   :  { %s2168_s7 = sld [smem:[#allocation3 + $0x805]] }
 0x177   :  { %3913 = sst [smem:[#allocation173_spill]] %s2156_s9 }
 0x178   :  { %s3914_s9 = sld [smem:[#allocation6_spill]] }
 0x179   :  { %s2180_s17 = sld [smem:[#allocation3 + $0x807]]  ;;  %v488_v62 = vstv %s3915_s15 }
 0x17a   :  { %s3916_s18 = sld [smem:[#allocation8_spill]]  ;;  %v489_v7 = vsel %vm471_vm7, %v488_v62, %v467_v48 }
 0x17b   :  { %s3917_s19 = sld [smem:[#allocation9_spill]] }
 0x17c   :  { %s2186_s20 = sld [smem:[#allocation3 + $0x808]] }
 0x17d   :  { %s3918_s1 = sld [smem:[#allocation10_spill]] }
 0x17e   :  { %v470_v59 = vstv %s3914_s9  ;;  %s3919_s21 = sld [smem:[#allocation11_spill]] }
 0x17f   :  { %s2194_s22 = sld [smem:[#allocation3 + $0x809]] }
 0x180   :  { %s3920_s23 = sld [smem:[#allocation12_spill]]  ;;  %v490_v5 = vstv %s3916_s18 }
 0x181   :  { %s3921_s24 = sld [smem:[#allocation13_spill]]  ;;  %v492_v6 = vstv %s3917_s19  ;;  %v491_v14 = vsel %vm471_vm7, %v490_v5, %v468_v55 }
 0x182   :  { %s3922_s26 = sld [smem:[#allocation14_spill]]  ;;  %v493_v18 = vsel %vm471_vm7, %v492_v6, %v469_v56 }
 0x183   :  { %s3923_s27 = sld [smem:[#allocation15_spill]]  ;;  %v494_v8 = vstv %s3918_s1 }
 0x184   :  { %s2204_s28 = sld [smem:[#allocation3 + $0x80a]]  ;;  %v497_v9 = vstv %s3919_s21  ;;  %v495_v19 = vsel %vm471_vm7, %v494_v8, %v470_v59  ;;  %vm871_vm7 = vcmp.eq.s32.totalorder %v2152_v39, 17 }
 0x185   :  { %s3924_s29 = sld [smem:[#allocation16_spill]]  ;;  %v498_v20 = vsel %vm496_vm8, %v497_v9, %v473_v60 }
 0x186   :  { %s3925_s30 = sld [smem:[#allocation17_spill]]  ;;  %v499_v10 = vstv %s3920_s23 }
 0x187   :  { %s3926_s3 = sld [smem:[#allocation18_spill]]  ;;  %v501_v11 = vstv %s3921_s24  ;;  %v500_v22 = vsel %vm496_vm8, %v499_v10, %v475_v61 }
 0x188   :  { %s2212_s4 = sld [smem:[#allocation3 + $0x80b]]  ;;  %v503_v12 = vstv %s3922_s26  ;;  %v502_v23 = vsel %vm496_vm8, %v501_v11, %v477_v63 }
 0x189   :  { %s3928_s5 = sld [smem:[#allocation19_spill]]  ;;  %v505_v13 = vstv %s3923_s27  ;;  %v504_v24 = vsel %vm496_vm8, %v503_v12, %v479_v0 }
 0x18a   :  { %s2219_s9 = sld [smem:[#allocation3 + $0x880]]  ;;  %v506_v25 = vsel %vm496_vm8, %v505_v13, %v481_v1 }
 0x18b   :  { %s2225_s15 = sld [smem:[#allocation3 + $0x881]]  ;;  %v507_v15 = vstv %s3924_s29 }
 0x18c   :  { %v509_v16 = vstv %s3925_s30  ;;  %s3931_s18 = sld [smem:[#allocation20_spill]]  ;;  %v508_v26 = vsel %vm496_vm8, %v507_v15, %v483_v2 }
 0x18d   :  { %v511_v17 = vstv %s3926_s3  ;;  %s2232_s19 = sld [smem:[#allocation3 + $0x882]]  ;;  %v510_v27 = vsel %vm496_vm8, %v509_v16, %v485_v3 }
 0x18e   :  { %3927 = sst [smem:[#allocation6_spill]] %s2212_s4  ;;  %v512_v28 = vsel %vm496_vm8, %v511_v17, %v487_v4 }
 0x18f   :  { %s3933_s1 = sld [smem:[#allocation21_spill]]  ;;  %v513_v21 = vstv %s3928_s5 }
 0x190   :  { %3929 = sst [smem:[#allocation7_spill]] %s2219_s9  ;;  %v514_v30 = vsel %vm496_vm8, %v513_v21, %v489_v7 }
 0x191   :  { %3930 = sst [smem:[#allocation8_spill]] %s2225_s15 }
 0x192   :  { %s3934_s21 = sld [smem:[#allocation22_spill]]  ;;  %v515_v29 = vstv %s3931_s18 }
 0x193   :  { %3932 = sst [smem:[#allocation9_spill]] %s2232_s19  ;;  %v516_v42 = vsel %vm496_vm8, %v515_v29, %v491_v14 }
 0x194   :  { %s2241_s23 = sld [smem:[#allocation3 + $0x883]] }
 0x195   :  { %s3936_s24 = sld [smem:[#allocation23_spill]]  ;;  %v517_v31 = vstv %s3933_s1 }
 0x196   :  { %s3937_s26 = sld [smem:[#allocation24_spill]]  ;;  %v518_v43 = vsel %vm496_vm8, %v517_v31, %v493_v18 }
 0x197   :  { %s3938_s27 = sld [smem:[#allocation25_spill]] }
 0x198   :  { %s3939_s29 = sld [smem:[#allocation26_spill]]  ;;  %v519_v32 = vstv %s3934_s21 }
 0x199   :  { %s2251_s30 = sld [smem:[#allocation3 + $0x884]]  ;;  %v520_v44 = vsel %vm496_vm8, %v519_v32, %v495_v19  ;;  %vm896_vm8 = vcmp.eq.s32.totalorder %v2152_v39, 18 }
 0x19a   :  { %3935 = sst [smem:[#allocation10_spill]] %s2241_s23 }
 0x19b   :  { %s3941_s3 = sld [smem:[#allocation27_spill]]  ;;  %v522_v33 = vstv %s3936_s24 }
 0x19c   :  { %s3942_s5 = sld [smem:[#allocation28_spill]]  ;;  %v524_v34 = vstv %s3937_s26  ;;  %v523_v46 = vsel %vm521_vm9, %v522_v33, %v498_v20 }
 0x19d   :  { %s3943_s23 = sld [smem:[#allocation29_spill]]  ;;  %v526_v35 = vstv %s3938_s27  ;;  %v525_v47 = vsel %vm521_vm9, %v524_v34, %v500_v22 }
 0x19e   :  { %s3944_s19 = sld [smem:[#allocation30_spill]]  ;;  %v528_v36 = vstv %s3939_s29  ;;  %v527_v48 = vsel %vm521_vm9, %v526_v35, %v502_v23 }
 0x19f   :  { %3940 = sst [smem:[#allocation11_spill]] %s2251_s30  ;;  %v529_v49 = vsel %vm521_vm9, %v528_v36, %v504_v24 }
 0x1a0   :  { %s2260_s15 = sld [smem:[#allocation3 + $0x885]] }
 0x1a1   :  { %s3946_s30 = sld [smem:[#allocation31_spill]]  ;;  %v530_v37 = vstv %s3941_s3 }
 0x1a2   :  { %s2267_s9 = sld [smem:[#allocation3 + $0x886]]  ;;  %v532_v38 = vstv %s3942_s5  ;;  %v531_v50 = vsel %vm521_vm9, %v530_v37, %v506_v25 }
 0x1a3   :  { %s2273_s4 = sld [smem:[#allocation3 + $0x887]]  ;;  %v534_v40 = vstv %s3943_s23  ;;  %v533_v51 = vsel %vm521_vm9, %v532_v38, %v508_v26 }
 0x1a4   :  { %v536_v41 = vstv %s3944_s19  ;;  %s2279_s18 = sld [smem:[#allocation3 + $0x888]]  ;;  %v535_v52 = vsel %vm521_vm9, %v534_v40, %v510_v27 }
 0x1a5   :  { %s3950_s1 = sld [smem:[#allocation32_spill]]  ;;  %v537_v53 = vsel %vm521_vm9, %v536_v41, %v512_v28 }
 0x1a6   :  { %3945 = sst [smem:[#allocation12_spill]] %s2260_s15 }
 0x1a7   :  { %s3951_s21 = sld [smem:[#allocation33_spill]]  ;;  %v538_v45 = vstv %s3946_s30 }
 0x1a8   :  { %3947 = sst [smem:[#allocation13_spill]] %s2267_s9  ;;  %v539_v54 = vsel %vm521_vm9, %v538_v45, %v514_v30 }
 0x1a9   :  { %3948 = sst [smem:[#allocation14_spill]] %s2273_s4 }
 0x1aa   :  { %3949 = sst [smem:[#allocation15_spill]] %s2279_s18 }
 0x1ab   :  { %s3952_s24 = sld [smem:[#allocation34_spill]]  ;;  %v540_v55 = vstv %s3950_s1 }
 0x1ac   :  { %s2288_s26 = sld [smem:[#allocation3 + $0x889]]  ;;  %v541_v1 = vsel %vm521_vm9, %v540_v55, %v516_v42 }
 0x1ad   :  { %s3954_s19 = sld [smem:[#allocation35_spill]]  ;;  %v542_v56 = vstv %s3951_s21 }
 0x1ae   :  { %s3955_s23 = sld [smem:[#allocation36_spill]]  ;;  %v543_v2 = vsel %vm521_vm9, %v542_v56, %v518_v43 }
 0x1af   :  { %s3956_s27 = sld [smem:[#allocation37_spill]] }
 0x1b0   :  { %s2298_s29 = sld [smem:[#allocation3 + $0x88a]] }
 0x1b1   :  { %s3958_s30 = sld [smem:[#allocation38_spill]]  ;;  %v544_v57 = vstv %s3952_s24 }
 0x1b2   :  { %3953 = sst [smem:[#allocation16_spill]] %s2288_s26  ;;  %v545_v3 = vsel %vm521_vm9, %v544_v57, %v520_v44  ;;  %vm921_vm9 = vcmp.eq.s32.totalorder %v2152_v39, 19 }
 0x1b3   :  { %s3959_s3 = sld [smem:[#allocation39_spill]]  ;;  %v547_v58 = vstv %s3954_s19 }
 0x1b4   :  { %s3960_s5 = sld [smem:[#allocation40_spill]]  ;;  %v549_v59 = vstv %s3955_s23  ;;  %v548_v5 = vsel %vm546_vm10, %v547_v58, %v523_v46 }
 0x1b5   :  { %s3961_s26 = sld [smem:[#allocation41_spill]]  ;;  %v551_v60 = vstv %s3956_s27  ;;  %v550_v6 = vsel %vm546_vm10, %v549_v59, %v525_v47 }
 0x1b6   :  { %3957 = sst [smem:[#allocation17_spill]] %s2298_s29  ;;  %v552_v7 = vsel %vm546_vm10, %v551_v60, %v527_v48 }
 0x1b7   :  { %s2308_s18 = sld [smem:[#allocation3 + $0x88b]]  ;;  %v553_v61 = vstv %s3958_s30 }
 0x1b8   :  { %s3963_s29 = sld [smem:[#allocation42_spill]]  ;;  %v554_v9 = vsel %vm546_vm10, %v553_v61, %v529_v49 }
 0x1b9   :  { %s2315_s4 = sld [smem:[#allocation3 + $0x900]]  ;;  %v555_v62 = vstv %s3959_s3 }
 0x1ba   :  { %s3965_s9 = sld [smem:[#allocation43_spill]]  ;;  %v557_v63 = vstv %s3960_s5  ;;  %v556_v10 = vsel %vm546_vm10, %v555_v62, %v531_v50 }
 0x1bb   :  { %s2321_s15 = sld [smem:[#allocation3 + $0x901]]  ;;  %v559_v0 = vstv %s3961_s26  ;;  %v558_v11 = vsel %vm546_vm10, %v557_v63, %v533_v51 }
 0x1bc   :  { %s3968_s1 = sld [smem:[#allocation44_spill]]  ;;  %v560_v12 = vsel %vm546_vm10, %v559_v0, %v535_v52 }
 0x1bd   :  { %3962 = sst [smem:[#allocation18_spill]] %s2308_s18 }
 0x1be   :  { %s2327_s18 = sld [smem:[#allocation3 + $0x902]]  ;;  %v561_v4 = vstv %s3963_s29 }
 0x1bf   :  { %3964 = sst [smem:[#allocation19_spill]] %s2315_s4  ;;  %v562_v13 = vsel %vm546_vm10, %v561_v4, %v537_v53 }
 0x1c0   :  { %s3969_s21 = sld [smem:[#allocation45_spill]]  ;;  %v563_v8 = vstv %s3965_s9 }
 0x1c1   :  { %3966 = sst [smem:[#allocation20_spill]] %s2321_s15  ;;  %v564_v17 = vsel %vm546_vm10, %v563_v8, %v539_v54 }
 0x1c2   :  { %s3970_s24 = sld [smem:[#allocation46_spill]]  ;;  %v565_v14 = vstv %s3968_s1 }
 0x1c3   :  { %s2336_s19 = sld [smem:[#allocation3 + $0x903]]  ;;  %v566_v24 = vsel %vm546_vm10, %v565_v14, %v541_v1 }
 0x1c4   :  { %3967 = sst [smem:[#allocation21_spill]] %s2327_s18 }
 0x1c5   :  { %s3972_s26 = sld [smem:[#allocation47_spill]] }
 0x1c6   :  { %s3973_s23 = sld [smem:[#allocation48_spill]]  ;;  %v567_v15 = vstv %s3969_s21 }
 0x1c7   :  { %s2345_s27 = sld [smem:[#allocation3 + $0x904]]  ;;  %v568_v25 = vsel %vm546_vm10, %v567_v15, %v543_v2 }
 0x1c8   :  { %s3975_s30 = sld [smem:[#allocation49_spill]]  ;;  %v569_v16 = vstv %s3970_s24 }
 0x1c9   :  { %3971 = sst [smem:[#allocation22_spill]] %s2336_s19  ;;  %v570_v28 = vsel %vm546_vm10, %v569_v16, %v545_v3  ;;  %vm946_vm10 = vcmp.eq.s32.totalorder %v2152_v39, 20 }
 0x1ca   :  { %s3976_s29 = sld [smem:[#allocation50_spill]] }
 0x1cb   :  { %s3977_s3 = sld [smem:[#allocation51_spill]]  ;;  %v572_v18 = vstv %s3972_s26 }
 0x1cc   :  { %s3978_s5 = sld [smem:[#allocation52_spill]]  ;;  %v574_v19 = vstv %s3973_s23  ;;  %v573_v29 = vsel %vm571_vm11, %v572_v18, %v548_v5 }
 0x1cd   :  { %3974 = sst [smem:[#allocation23_spill]] %s2345_s27  ;;  %v575_v30 = vsel %vm571_vm11, %v574_v19, %v550_v6 }
 0x1ce   :  { %s2355_s19 = sld [smem:[#allocation3 + $0x905]]  ;;  %v576_v20 = vstv %s3975_s30 }
 0x1cf   :  { %s3980_s9 = sld [smem:[#allocation53_spill]]  ;;  %v577_v32 = vsel %vm571_vm11, %v576_v20, %v552_v7 }
 0x1d0   :  { %s3981_s27 = sld [smem:[#allocation54_spill]]  ;;  %v578_v21 = vstv %s3976_s29 }
 0x1d1   :  { %s2362_s18 = sld [smem:[#allocation3 + $0x906]]  ;;  %v580_v22 = vstv %s3977_s3  ;;  %v579_v33 = vsel %vm571_vm11, %v578_v21, %v554_v9 }
 0x1d2   :  { %s3983_s15 = sld [smem:[#allocation55_spill]]  ;;  %v582_v23 = vstv %s3978_s5  ;;  %v581_v34 = vsel %vm571_vm11, %v580_v22, %v556_v10 }
 0x1d3   :  { %s2369_s4 = sld [smem:[#allocation3 + $0x907]]  ;;  %v583_v35 = vsel %vm571_vm11, %v582_v23, %v558_v11 }
 0x1d4   :  { %3979 = sst [smem:[#allocation24_spill]] %s2355_s19 }
 0x1d5   :  { %s2375_s1 = sld [smem:[#allocation3 + $0x908]]  ;;  %v584_v26 = vstv %s3980_s9 }
 0x1d6   :  { %s3986_s21 = sld [smem:[#allocation56_spill]]  ;;  %v586_v27 = vstv %s3981_s27  ;;  %v585_v36 = vsel %vm571_vm11, %v584_v26, %v560_v12 }
 0x1d7   :  { %3982 = sst [smem:[#allocation25_spill]] %s2362_s18  ;;  %v587_v37 = vsel %vm571_vm11, %v586_v27, %v562_v13 }
 0x1d8   :  { %s3987_s24 = sld [smem:[#allocation57_spill]]  ;;  %v588_v31 = vstv %s3983_s15 }
 0x1d9   :  { %3984 = sst [smem:[#allocation26_spill]] %s2369_s4  ;;  %v589_v41 = vsel %vm571_vm11, %v588_v31, %v564_v17 }
 0x1da   :  { %s2383_s26 = sld [smem:[#allocation3 + $0x909]] }
 0x1db   :  { %3985 = sst [smem:[#allocation27_spill]] %s2375_s1 }
 0x1dc   :  { %s3989_s23 = sld [smem:[#allocation58_spill]]  ;;  %v590_v38 = vstv %s3986_s21 }
 0x1dd   :  { %s3990_s30 = sld [smem:[#allocation59_spill]]  ;;  %v591_v48 = vsel %vm571_vm11, %v590_v38, %v566_v24 }
 0x1de   :  { %s2392_s29 = sld [smem:[#allocation3 + $0x90a]]  ;;  %v592_v40 = vstv %s3987_s24 }
 0x1df   :  { %s3992_s3 = sld [smem:[#allocation60_spill]]  ;;  %v593_v52 = vsel %vm571_vm11, %v592_v40, %v568_v25 }
 0x1e0   :  { %3988 = sst [smem:[#allocation28_spill]] %s2383_s26 }
 0x1e1   :  { %s3993_s27 = sld [smem:[#allocation61_spill]] }
 0x1e2   :  { %s3994_s5 = sld [smem:[#allocation62_spill]]  ;;  %v594_v42 = vstv %s3989_s23 }
 0x1e3   :  { %s3995_s9 = sld [smem:[#allocation63_spill]]  ;;  %v597_v43 = vstv %s3990_s30  ;;  %v595_v53 = vsel %vm571_vm11, %v594_v42, %v570_v28  ;;  %vm971_vm11 = vcmp.eq.s32.totalorder %v2152_v39, 21 }
 0x1e4   :  { %3991 = sst [smem:[#allocation29_spill]] %s2392_s29  ;;  %v598_v54 = vsel %vm596_vm12, %v597_v43, %v573_v29 }
 0x1e5   :  { %s2402_s26 = sld [smem:[#allocation3 + $0x90b]]  ;;  %v599_v44 = vstv %s3992_s3 }
 0x1e6   :  { %s3997_s15 = sld [smem:[#allocation64_spill]]  ;;  %v600_v56 = vsel %vm596_vm12, %v599_v44, %v575_v30 }
 0x1e7   :  { %s3998_s29 = sld [smem:[#allocation65_spill]]  ;;  %v601_v45 = vstv %s3993_s27 }
 0x1e8   :  { %s3999_s1 = sld [smem:[#allocation66_spill]]  ;;  %v603_v46 = vstv %s3994_s5  ;;  %v602_v57 = vsel %vm596_vm12, %v601_v45, %v577_v32 }
 0x1e9   :  { %s2410_s4 = sld [smem:[#allocation3 + $0x980]]  ;;  %v605_v47 = vstv %s3995_s9  ;;  %v604_v58 = vsel %vm596_vm12, %v603_v46, %v579_v33 }
 0x1ea   :  { %s2417_s18 = sld [smem:[#allocation3 + $0x981]]  ;;  %v606_v59 = vsel %vm596_vm12, %v605_v47, %v581_v34 }
 0x1eb   :  { %3996 = sst [smem:[#allocation30_spill]] %s2402_s26 }
 0x1ec   :  { %s4001_s26 = sld [smem:[#allocation67_spill]]  ;;  %v607_v49 = vstv %s3997_s15 }
 0x1ed   :  { %s2423_s19 = sld [smem:[#allocation3 + $0x982]]  ;;  %v609_v50 = vstv %s3998_s29  ;;  %v608_v60 = vsel %vm596_vm12, %v607_v49, %v583_v35 }
 0x1ee   :  { %s4004_s21 = sld [smem:[#allocation68_spill]]  ;;  %v611_v51 = vstv %s3999_s1  ;;  %v610_v61 = vsel %vm596_vm12, %v609_v50, %v585_v36 }
 0x1ef   :  { %4000 = sst [smem:[#allocation31_spill]] %s2410_s4  ;;  %v612_v62 = vsel %vm596_vm12, %v611_v51, %v587_v37 }
 0x1f0   :  { %4002 = sst [smem:[#allocation32_spill]] %s2417_s18 }
 0x1f1   :  { %s2430_s24 = sld [smem:[#allocation3 + $0x983]] }
 0x1f2   :  { %s4006_s23 = sld [smem:[#allocation69_spill]]  ;;  %v613_v55 = vstv %s4001_s26 }
 0x1f3   :  { %4003 = sst [smem:[#allocation33_spill]] %s2423_s19  ;;  %v614_v0 = vsel %vm596_vm12, %v613_v55, %v589_v41 }
 0x1f4   :  { %s4007_s30 = sld [smem:[#allocation70_spill]]  ;;  %v615_v63 = vstv %s4004_s21 }
 0x1f5   :  { %s2439_s3 = sld [smem:[#allocation3 + $0x984]]  ;;  %v616_v11 = vsel %vm596_vm12, %v615_v63, %v591_v48 }
 0x1f6   :  { %s4009_s29 = sld [smem:[#allocation71_spill]] }
 0x1f7   :  { %4005 = sst [smem:[#allocation34_spill]] %s2430_s24 }
 0x1f8   :  { %s4010_s1 = sld [smem:[#allocation72_spill]]  ;;  %v617_v1 = vstv %s4006_s23 }
 0x1f9   :  { %s4011_s27 = sld [smem:[#allocation73_spill]]  ;;  %v618_v12 = vsel %vm596_vm12, %v617_v1, %v593_v52 }
 0x1fa   :  { %s4012_s5 = sld [smem:[#allocation74_spill]]  ;;  %v619_v2 = vstv %s4007_s30 }
 0x1fb   :  { %4008 = sst [smem:[#allocation35_spill]] %s2439_s3  ;;  %v620_v13 = vsel %vm596_vm12, %v619_v2, %v595_v53  ;;  %vm996_vm12 = vcmp.eq.s32.totalorder %v2152_v39, 22 }
 0x1fc   :  { %s2449_s9 = sld [smem:[#allocation3 + $0x985]]  ;;  %v622_v3 = vstv %s4009_s29 }
 0x1fd   :  { %s4014_s26 = sld [smem:[#allocation75_spill]]  ;;  %v623_v15 = vsel %vm621_vm13, %v622_v3, %v598_v54 }
 0x1fe   :  { %s4015_s15 = sld [smem:[#allocation76_spill]]  ;;  %v624_v4 = vstv %s4010_s1 }
 0x1ff   :  { %s4016_s3 = sld [smem:[#allocation77_spill]]  ;;  %v626_v5 = vstv %s4011_s27  ;;  %v625_v16 = vsel %vm621_vm13, %v624_v4, %v600_v56 }
 0x200   :  { %s4017_s24 = sld [smem:[#allocation78_spill]]  ;;  %v628_v6 = vstv %s4012_s5  ;;  %v627_v17 = vsel %vm621_vm13, %v626_v5, %v602_v57 }
 0x201   :  { %s2458_s19 = sld [smem:[#allocation3 + $0x986]]  ;;  %v629_v18 = vsel %vm621_vm13, %v628_v6, %v604_v58 }
 0x202   :  { %4013 = sst [smem:[#allocation36_spill]] %s2449_s9 }
 0x203   :  { %s4019_s9 = sld [smem:[#allocation79_spill]]  ;;  %v630_v7 = vstv %s4014_s26 }
 0x204   :  { %s2465_s18 = sld [smem:[#allocation3 + $0x987]]  ;;  %v632_v8 = vstv %s4015_s15  ;;  %v631_v19 = vsel %vm621_vm13, %v630_v7, %v606_v59 }
 0x205   :  { %s2471_s4 = sld [smem:[#allocation3 + $0x988]]  ;;  %v634_v9 = vstv %s4016_s3  ;;  %v633_v20 = vsel %vm621_vm13, %v632_v8, %v608_v60 }
 0x206   :  { %v636_v10 = vstv %s4017_s24  ;;  %s2477_s21 = sld [smem:[#allocation3 + $0x989]]  ;;  %v635_v21 = vsel %vm621_vm13, %v634_v9, %v610_v61 }
 0x207   :  { %4018 = sst [smem:[#allocation37_spill]] %s2458_s19  ;;  %v637_v22 = vsel %vm621_vm13, %v636_v10, %v612_v62 }
 0x208   :  { %s4023_s23 = sld [smem:[#allocation80_spill]] }
 0x209   :  { %s4024_s30 = sld [smem:[#allocation81_spill]]  ;;  %v638_v14 = vstv %s4019_s9 }
 0x20a   :  { %4020 = sst [smem:[#allocation38_spill]] %s2465_s18  ;;  %v639_v23 = vsel %vm621_vm13, %v638_v14, %v614_v0 }
 0x20b   :  { %4021 = sst [smem:[#allocation39_spill]] %s2471_s4 }
 0x20c   :  { %4022 = sst [smem:[#allocation40_spill]] %s2477_s21 }
 0x20d   :  { %s4025_s29 = sld [smem:[#allocation82_spill]] }
 0x20e   :  { %s2486_s1 = sld [smem:[#allocation3 + $0x98a]]  ;;  %v640_v24 = vstv %s4023_s23 }
 0x20f   :  { %s4027_s24 = sld [smem:[#allocation83_spill]]  ;;  %v642_v25 = vstv %s4024_s30  ;;  %v641_v34 = vsel %vm621_vm13, %v640_v24, %v616_v11 }
 0x210   :  { %s4028_s3 = sld [smem:[#allocation84_spill]]  ;;  %v643_v35 = vsel %vm621_vm13, %v642_v25, %v618_v12 }
 0x211   :  { %s4029_s27 = sld [smem:[#allocation85_spill]] }
 0x212   :  { %s2496_s5 = sld [smem:[#allocation3 + $0x98b]] }
 0x213   :  { %s4031_s9 = sld [smem:[#allocation86_spill]]  ;;  %v644_v26 = vstv %s4025_s29 }
 0x214   :  { %4026 = sst [smem:[#allocation41_spill]] %s2486_s1  ;;  %v645_v36 = vsel %vm621_vm13, %v644_v26, %v620_v13  ;;  %vm1021_vm13 = vcmp.eq.s32.totalorder %v2152_v39, 23 }
 0x215   :  { %s4032_s26 = sld [smem:[#allocation87_spill]]  ;;  %v647_v27 = vstv %s4027_s24 }
 0x216   :  { %s4033_s15 = sld [smem:[#allocation88_spill]]  ;;  %v649_v28 = vstv %s4028_s3  ;;  %v648_v38 = vsel %vm646_vm14, %v647_v27, %v623_v15 }
 0x217   :  { %s4034_s1 = sld [smem:[#allocation89_spill]]  ;;  %v651_v29 = vstv %s4029_s27  ;;  %v650_v40 = vsel %vm646_vm14, %v649_v28, %v625_v16 }
 0x218   :  { %4030 = sst [smem:[#allocation42_spill]] %s2496_s5  ;;  %v652_v41 = vsel %vm646_vm14, %v651_v29, %v627_v17 }
 0x219   :  { %s2506_s21 = sld [smem:[#allocation3 + $0xa00]]  ;;  %v653_v30 = vstv %s4031_s9 }
 0x21a   :  { %s4036_s5 = sld [smem:[#allocation90_spill]]  ;;  %v654_v43 = vsel %vm646_vm14, %v653_v30, %v629_v18 }
 0x21b   :  { %s2513_s4 = sld [smem:[#allocation3 + $0xa01]]  ;;  %v655_v31 = vstv %s4032_s26 }
 0x21c   :  { %s4038_s18 = sld [smem:[#allocation91_spill]]  ;;  %v657_v32 = vstv %s4033_s15  ;;  %v656_v44 = vsel %vm646_vm14, %v655_v31, %v631_v19 }
 0x21d   :  { %s2519_s19 = sld [smem:[#allocation3 + $0xa02]]  ;;  %v659_v33 = vstv %s4034_s1  ;;  %v658_v45 = vsel %vm646_vm14, %v657_v32, %v633_v20 }
 0x21e   :  { %s4041_s23 = sld [smem:[#allocation92_spill]]  ;;  %v660_v46 = vsel %vm646_vm14, %v659_v33, %v635_v21 }
 0x21f   :  { %4035 = sst [smem:[#allocation43_spill]] %s2506_s21 }
 0x220   :  { %s2525_s21 = sld [smem:[#allocation3 + $0xa03]]  ;;  %v661_v37 = vstv %s4036_s5 }
 0x221   :  { %4037 = sst [smem:[#allocation44_spill]] %s2513_s4  ;;  %v662_v47 = vsel %vm646_vm14, %v661_v37, %v637_v22 }
 0x222   :  { %s4042_s30 = sld [smem:[#allocation93_spill]]  ;;  %v663_v42 = vstv %s4038_s18 }
 0x223   :  { %4039 = sst [smem:[#allocation45_spill]] %s2519_s19  ;;  %v664_v51 = vsel %vm646_vm14, %v663_v42, %v639_v23 }
 0x224   :  { %s4043_s29 = sld [smem:[#allocation94_spill]]  ;;  %v665_v48 = vstv %s4041_s23 }
 0x225   :  { %s2534_s24 = sld [smem:[#allocation3 + $0xa04]]  ;;  %v666_v58 = vsel %vm646_vm14, %v665_v48, %v641_v34 }
 0x226   :  { %4040 = sst [smem:[#allocation46_spill]] %s2525_s21 }
 0x227   :  { %s4045_s1 = sld [smem:[#allocation95_spill]] }
 0x228   :  { %s4046_s3 = sld [smem:[#allocation96_spill]]  ;;  %v667_v49 = vstv %s4042_s30 }
 0x229   :  { %s2543_s27 = sld [smem:[#allocation3 + $0xa05]]  ;;  %v668_v59 = vsel %vm646_vm14, %v667_v49, %v643_v35 }
 0x22a   :  { %s4048_s9 = sld [smem:[#allocation97_spill]]  ;;  %v669_v50 = vstv %s4043_s29 }
 0x22b   :  { %4044 = sst [smem:[#allocation47_spill]] %s2534_s24  ;;  %v670_v62 = vsel %vm646_vm14, %v669_v50, %v645_v36  ;;  %vm1046_vm14 = vcmp.eq.s32.totalorder %v2152_v39, 24 }
 0x22c   :  { %s4049_s5 = sld [smem:[#allocation98_spill]] }
 0x22d   :  { %s4050_s26 = sld [smem:[#allocation99_spill]]  ;;  %v672_v52 = vstv %s4045_s1 }
 0x22e   :  { %s4051_s15 = sld [smem:[#allocation100_spill]]  ;;  %v674_v53 = vstv %s4046_s3  ;;  %v673_v63 = vsel %vm671_vm15, %v672_v52, %v648_v38 }
 0x22f   :  { %4047 = sst [smem:[#allocation48_spill]] %s2543_s27  ;;  %v675_v0 = vsel %vm671_vm15, %v674_v53, %v650_v40 }
 0x230   :  { %s2553_s24 = sld [smem:[#allocation3 + $0xa06]]  ;;  %v676_v54 = vstv %s4048_s9 }
 0x231   :  { %s4053_s18 = sld [smem:[#allocation101_spill]]  ;;  %v677_v2 = vsel %vm671_vm15, %v676_v54, %v652_v41  ;;  %v730_v41 = vstv %s2018_s12 }
 0x232   :  { %s4054_s27 = sld [smem:[#allocation102_spill]]  ;;  %v678_v55 = vstv %s4049_s5 }
 0x233   :  { %s2560_s21 = sld [smem:[#allocation3 + $0xa07]]  ;;  %v680_v56 = vstv %s4050_s26  ;;  %v679_v3 = vsel %vm671_vm15, %v678_v55, %v654_v43  ;;  %v734_v43 = vstv %s2022_s14 }
 0x234   :  { %s4056_s19 = sld [smem:[#allocation103_spill]]  ;;  %v682_v57 = vstv %s4051_s15  ;;  %v681_v4 = vsel %vm671_vm15, %v680_v56, %v656_v44 }
 0x235   :  { %s2567_s4 = sld [smem:[#allocation3 + $0xa08]]  ;;  %v683_v5 = vsel %vm671_vm15, %v682_v57, %v658_v45 }
 0x236   :  { %4052 = sst [smem:[#allocation49_spill]] %s2553_s24 }
 0x237   :  { %s2573_s23 = sld [smem:[#allocation3 + $0xa09]]  ;;  %v684_v60 = vstv %s4053_s18 }
 0x238   :  { %s4059_s30 = sld [smem:[#allocation104_spill]]  ;;  %v686_v61 = vstv %s4054_s27  ;;  %v685_v6 = vsel %vm671_vm15, %v684_v60, %v660_v46 }
 0x239   :  { %4055 = sst [smem:[#allocation50_spill]] %s2560_s21  ;;  %v687_v7 = vsel %vm671_vm15, %v686_v61, %v662_v47 }
 0x23a   :  { %s4060_s29 = sld [smem:[#allocation105_spill]]  ;;  %v688_v1 = vstv %s4056_s19 }
 0x23b   :  { %4057 = sst [smem:[#allocation51_spill]] %s2567_s4  ;;  %v689_v10 = vsel %vm671_vm15, %v688_v1, %v664_v51 }
 0x23c   :  { %s2581_s1 = sld [smem:[#allocation3 + $0xa0a]] }
 0x23d   :  { %4058 = sst [smem:[#allocation52_spill]] %s2573_s23 }
 0x23e   :  { %s4062_s3 = sld [smem:[#allocation106_spill]]  ;;  %v690_v8 = vstv %s4059_s30 }
 0x23f   :  { %s4063_s9 = sld [smem:[#allocation107_spill]]  ;;  %v691_v17 = vsel %vm671_vm15, %v690_v8, %v666_v58 }
 0x240   :  { %s2590_s5 = sld [smem:[#allocation3 + $0xa0b]]  ;;  %v692_v9 = vstv %s4060_s29 }
 0x241   :  { %s4065_s26 = sld [smem:[#allocation108_spill]]  ;;  %v693_v21 = vsel %vm671_vm15, %v692_v9, %v668_v59 }
 0x242   :  { %4061 = sst [smem:[#allocation53_spill]] %s2581_s1 }
 0x243   :  { %s4066_s27 = sld [smem:[#allocation109_spill]] }
 0x244   :  { %s4067_s15 = sld [smem:[#allocation110_spill]]  ;;  %v694_v11 = vstv %s4062_s3 }
 0x245   :  { %s4068_s18 = sld [smem:[#allocation111_spill]]  ;;  %v697_v12 = vstv %s4063_s9  ;;  %v695_v22 = vsel %vm671_vm15, %v694_v11, %v670_v62  ;;  %v749_v62 = vstv %s2036_s10  ;;  %vm1071_vm15 = vcmp.eq.s32.totalorder %v2152_v39, 25 }
 0x246   :  { %4064 = sst [smem:[#allocation54_spill]] %s2590_s5  ;;  %v698_v23 = vsel %vm696_vm0, %v697_v12, %v673_v63 }
 0x247   :  { %s2600_s1 = sld [smem:[#allocation3 + $0xa80]]  ;;  %v699_v13 = vstv %s4065_s26 }
 0x248   :  { %s4070_s19 = sld [smem:[#allocation112_spill]]  ;;  %v700_v25 = vsel %vm696_vm0, %v699_v13, %v675_v0 }
 0x249   :  { %s4071_s5 = sld [smem:[#allocation113_spill]]  ;;  %v701_v14 = vstv %s4066_s27 }
 0x24a   :  { %s4072_s23 = sld [smem:[#allocation114_spill]]  ;;  %v703_v15 = vstv %s4067_s15  ;;  %v702_v26 = vsel %vm696_vm0, %v701_v14, %v677_v2 }
 0x24b   :  { %s2608_s4 = sld [smem:[#allocation3 + $0xa81]]  ;;  %v705_v16 = vstv %s4068_s18  ;;  %v704_v27 = vsel %vm696_vm0, %v703_v15, %v679_v3  ;;  %v759_v3 = vstv %s2046_s6 }
 0x24c   :  { %s2615_s21 = sld [smem:[#allocation3 + $0xa82]]  ;;  %v706_v28 = vsel %vm696_vm0, %v705_v16, %v681_v4 }
 0x24d   :  { %4069 = sst [smem:[#allocation55_spill]] %s2600_s1  ;;  %v731_v53 = vsel %vm721_vm1, %v730_v41, %v706_v28 }
 0x24e   :  { %s4073_s1 = sld [smem:[#allocation115_spill]]  ;;  %v707_v18 = vstv %s4070_s19 }
 0x24f   :  { %s2621_s24 = sld [smem:[#allocation3 + $0xa83]]  ;;  %v709_v19 = vstv %s4071_s5  ;;  %v708_v29 = vsel %vm696_vm0, %v707_v18, %v683_v5 }
 0x250   :  { %s4075_s30 = sld [smem:[#allocation116_spill]]  ;;  %v711_v20 = vstv %s4072_s23  ;;  %v710_v30 = vsel %vm696_vm0, %v709_v19, %v685_v6 }
 0x251   :  { %s2628_s29 = sld [smem:[#allocation3 + $0xa84]]  ;;  %v712_v31 = vsel %vm696_vm0, %v711_v20, %v687_v7  ;;  %v735_v55 = vsel %vm721_vm1, %v734_v43, %v710_v30 }
 0x252   :  { %s4077_s3 = sld [smem:[#allocation117_spill]]  ;;  %v760_v15 = vsel %vm746_vm2, %v759_v3, %v735_v55 }
 0x253   :  { %s4078_s9 = sld [smem:[#allocation118_spill]] }
 0x254   :  { %v713_v24 = vstv %s4073_s1  ;;  %s2637_s26 = sld [smem:[#allocation3 + $0xa85]] }
 0x255   :  { %4074 = sst [smem:[#allocation56_spill]] %s2621_s24  ;;  %v714_v33 = vsel %vm696_vm0, %v713_v24, %v689_v10 }
 0x256   :  { %s4080_s5 = sld [smem:[#allocation119_spill]]  ;;  %v715_v32 = vstv %s4075_s30 }
 0x257   :  { %4076 = sst [smem:[#allocation57_spill]] %s2628_s29  ;;  %v716_v45 = vsel %vm696_vm0, %v715_v32, %v691_v17 }
 0x258   :  { %s4081_s23 = sld [smem:[#allocation120_spill]]  ;;  %v717_v34 = vstv %s4077_s3 }
 0x259   :  { %s4082_s27 = sld [smem:[#allocation121_spill]]  ;;  %v719_v35 = vstv %s4078_s9  ;;  %v718_v46 = vsel %vm696_vm0, %v717_v34, %v693_v21 }
 0x25a   :  { %4079 = sst [smem:[#allocation58_spill]] %s2637_s26  ;;  %v720_v47 = vsel %vm696_vm0, %v719_v35, %v695_v22  ;;  %vm1096_vm0 = vcmp.eq.s32.totalorder %v2152_v39, 26 }
 0x25b   :  { %s4083_s15 = sld [smem:[#allocation122_spill]] }
 0x25c   :  { %s2647_s18 = sld [smem:[#allocation3 + $0xa86]]  ;;  %v722_v36 = vstv %s4080_s5 }
 0x25d   :  { %s4085_s1 = sld [smem:[#allocation123_spill]]  ;;  %v723_v49 = vsel %vm721_vm1, %v722_v36, %v698_v23 }
 0x25e   :  { %s4086_s19 = sld [smem:[#allocation124_spill]]  ;;  %v724_v37 = vstv %s4081_s23 }
 0x25f   :  { %s2656_s26 = sld [smem:[#allocation3 + $0xa87]]  ;;  %v726_v38 = vstv %s4082_s27  ;;  %v725_v50 = vsel %vm721_vm1, %v724_v37, %v700_v25 }
 0x260   :  { %s2663_s29 = sld [smem:[#allocation3 + $0xa88]]  ;;  %v727_v51 = vsel %vm721_vm1, %v726_v38, %v702_v26  ;;  %v750_v9 = vsel %vm746_vm2, %v749_v62, %v725_v50 }
 0x261   :  { %v728_v40 = vstv %s4083_s15  ;;  %s2669_s24 = sld [smem:[#allocation3 + $0xa89]] }
 0x262   :  { %4084 = sst [smem:[#allocation59_spill]] %s2647_s18  ;;  %v729_v52 = vsel %vm721_vm1, %v728_v40, %v704_v27 }
 0x263   :  { %s4087_s18 = sld [smem:[#allocation125_spill]]  ;;  %v732_v42 = vstv %s4085_s1 }
 0x264   :  { %v736_v44 = vstv %s4086_s19  ;;  %s2675_s30 = sld [smem:[#allocation3 + $0xa8a]]  ;;  %v733_v54 = vsel %vm721_vm1, %v732_v42, %v708_v29 }
 0x265   :  { %s4090_s3 = sld [smem:[#allocation126_spill]]  ;;  %v737_v56 = vsel %vm721_vm1, %v736_v44, %v712_v31 }
 0x266   :  { %s4091_s9 = sld [smem:[#allocation127_spill]] }
 0x267   :  { %4088 = sst [smem:[#allocation60_spill]] %s2669_s24 }
 0x268   :  { %s4092_s5 = sld [smem:[#allocation128_spill]] }
 0x269   :  { %v738_v48 = vstv %s4087_s18  ;;  %s2684_s23 = sld [smem:[#allocation3 + $0xa8b]] }
 0x26a   :  { %4089 = sst [smem:[#allocation61_spill]] %s2675_s30  ;;  %v739_v57 = vsel %vm721_vm1, %v738_v48, %v714_v33 }
 0x26b   :  { %s4094_s12 = sld [smem:[#allocation129_spill]]  ;;  %v740_v58 = vstv %s4090_s3 }
 0x26c   :  { %s4095_s14 = sld [smem:[#allocation130_spill]]  ;;  %v742_v59 = vstv %s4091_s9  ;;  %v741_v4 = vsel %vm721_vm1, %v740_v58, %v716_v45 }
 0x26d   :  { %s2694_s27 = sld [smem:[#allocation3 + $0xb00]]  ;;  %v743_v5 = vsel %vm721_vm1, %v742_v59, %v718_v46 }
 0x26e   :  { %s4097_s15 = sld [smem:[#allocation131_spill]]  ;;  %v744_v60 = vstv %s4092_s5 }
 0x26f   :  { %4093 = sst [smem:[#allocation62_spill]] %s2684_s23  ;;  %v745_v6 = vsel %vm721_vm1, %v744_v60, %v720_v47  ;;  %vm1121_vm1 = vcmp.eq.s32.totalorder %v2152_v39, 27 }
 0x270   :  { %s4098_s18 = sld [smem:[#allocation132_spill]] }
 0x271   :  { %s4099_s1 = sld [smem:[#allocation133_spill]]  ;;  %v747_v61 = vstv %s4094_s12 }
 0x272   :  { %s2704_s19 = sld [smem:[#allocation3 + $0xb01]]  ;;  %v751_v63 = vstv %s4095_s14  ;;  %v748_v8 = vsel %vm746_vm2, %v747_v61, %v723_v49 }
 0x273   :  { %4096 = sst [smem:[#allocation63_spill]] %s2694_s27  ;;  %v752_v10 = vsel %vm746_vm2, %v751_v63, %v727_v51 }
 0x274   :  { %s4101_s27 = sld [smem:[#allocation134_spill]]  ;;  %v753_v0 = vstv %s4097_s15 }
 0x275   :  { %s2711_s23 = sld [smem:[#allocation3 + $0xb02]]  ;;  %v754_v12 = vsel %vm746_vm2, %v753_v0, %v729_v52 }
 0x276   :  { %s4103_s30 = sld [smem:[#allocation135_spill]]  ;;  %v755_v1 = vstv %s4098_s18 }
 0x277   :  { %s2717_s24 = sld [smem:[#allocation3 + $0xb03]]  ;;  %v757_v2 = vstv %s4099_s1  ;;  %v756_v13 = vsel %vm746_vm2, %v755_v1, %v731_v53 }
 0x278   :  { %4100 = sst [smem:[#allocation64_spill]] %s2704_s19  ;;  %v758_v14 = vsel %vm746_vm2, %v757_v2, %v733_v54 }
 0x279   :  { %s2723_s19 = sld [smem:[#allocation3 + $0xb04]] }
 0x27a   :  { %s4106_s3 = sld [smem:[#allocation136_spill]]  ;;  %v761_v7 = vstv %s4101_s27 }
 0x27b   :  { %4102 = sst [smem:[#allocation65_spill]] %s2711_s23  ;;  %v762_v16 = vsel %vm746_vm2, %v761_v7, %v737_v56  ;;  %v824_v7 = vstv %s2122_s11 }
 0x27c   :  { %s4107_s10 = sld [smem:[#allocation137_spill]]  ;;  %v763_v11 = vstv %s4103_s30 }
 0x27d   :  { %4104 = sst [smem:[#allocation66_spill]] %s2717_s24  ;;  %v764_v20 = vsel %vm746_vm2, %v763_v11, %v739_v57 }
 0x27e   :  { %s4108_s9 = sld [smem:[#allocation138_spill]] }
 0x27f   :  { %4105 = sst [smem:[#allocation67_spill]] %s2723_s19 }
 0x280   :  { %s2732_s5 = sld [smem:[#allocation3 + $0xb05]]  ;;  %v765_v17 = vstv %s4106_s3 }
 0x281   :  { %s4110_s6 = sld [smem:[#allocation139_spill]]  ;;  %v766_v27 = vsel %vm746_vm2, %v765_v17, %v741_v4 }
 0x282   :  { %s4111_s12 = sld [smem:[#allocation140_spill]]  ;;  %v767_v18 = vstv %s4107_s10 }
 0x283   :  { %s2741_s14 = sld [smem:[#allocation3 + $0xb06]]  ;;  %v768_v28 = vsel %vm746_vm2, %v767_v18, %v743_v5  ;;  %v819_v5 = vstv %s2118_s25 }
 0x284   :  { %s4113_s15 = sld [smem:[#allocation141_spill]]  ;;  %v769_v19 = vstv %s4108_s9 }
 0x285   :  { %s4114_s27 = sld [smem:[#allocation142_spill]]  ;;  %v770_v31 = vsel %vm746_vm2, %v769_v19, %v745_v6  ;;  %vm1146_vm2 = vcmp.eq.s32.totalorder %v2152_v39, 28 }
 0x286   :  { %4109 = sst [smem:[#allocation68_spill]] %s2732_s5 }
 0x287   :  { %s4115_s18 = sld [smem:[#allocation143_spill]]  ;;  %v772_v21 = vstv %s4110_s6 }
 0x288   :  { %s4116_s1 = sld [smem:[#allocation144_spill]]  ;;  %v774_v22 = vstv %s4111_s12  ;;  %v773_v32 = vsel %vm771_vm3, %v772_v21, %v748_v8 }
 0x289   :  { %4112 = sst [smem:[#allocation69_spill]] %s2741_s14  ;;  %v775_v33 = vsel %vm771_vm3, %v774_v22, %v750_v9 }
 0x28a   :  { %s2751_s5 = sld [smem:[#allocation3 + $0xb07]]  ;;  %v776_v23 = vstv %s4113_s15 }
 0x28b   :  { %s4118_s30 = sld [smem:[#allocation145_spill]]  ;;  %v778_v24 = vstv %s4114_s27  ;;  %v777_v35 = vsel %vm771_vm3, %v776_v23, %v752_v10 }
 0x28c   :  { %s4119_s14 = sld [smem:[#allocation146_spill]]  ;;  %v779_v36 = vsel %vm771_vm3, %v778_v24, %v754_v12 }
 0x28d   :  { %s2758_s19 = sld [smem:[#allocation3 + $0xb08]]  ;;  %v780_v25 = vstv %s4115_s18 }
 0x28e   :  { %s4121_s24 = sld [smem:[#allocation147_spill]]  ;;  %v782_v26 = vstv %s4116_s1  ;;  %v781_v37 = vsel %vm771_vm3, %v780_v25, %v756_v13 }
 0x28f   :  { %s2765_s23 = sld [smem:[#allocation3 + $0xb09]]  ;;  %v783_v38 = vsel %vm771_vm3, %v782_v26, %v758_v14 }
 0x290   :  { %4117 = sst [smem:[#allocation70_spill]] %s2751_s5 }
 0x291   :  { %s2771_s3 = sld [smem:[#allocation3 + $0xb0a]]  ;;  %v784_v29 = vstv %s4118_s30 }
 0x292   :  { %s4124_s10 = sld [smem:[#allocation148_spill]]  ;;  %v786_v30 = vstv %s4119_s14  ;;  %v785_v40 = vsel %vm771_vm3, %v784_v29, %v760_v15 }
 0x293   :  { %4120 = sst [smem:[#allocation71_spill]] %s2758_s19  ;;  %v787_v41 = vsel %vm771_vm3, %v786_v30, %v762_v16  ;;  %v847_v30 = vstv %s2148_s8 }
 0x294   :  { %s4125_s9 = sld [smem:[#allocation149_spill]]  ;;  %v788_v34 = vstv %s4121_s24 }
 0x295   :  { %4122 = sst [smem:[#allocation72_spill]] %s2765_s23  ;;  %v789_v44 = vsel %vm771_vm3, %v788_v34, %v764_v20  ;;  %v855_v34 = vstv %s2162_s2 }
 0x296   :  { %s2779_s6 = sld [smem:[#allocation3 + $0xb0b]] }
 0x297   :  { %4123 = sst [smem:[#allocation73_spill]] %s2771_s3 }
 0x298   :  { %s4127_s12 = sld [smem:[#allocation150_spill]]  ;;  %v790_v42 = vstv %s4124_s10 }
 0x299   :  { %s4128_s15 = sld [smem:[#allocation151_spill]]  ;;  %v791_v51 = vsel %vm771_vm3, %v790_v42, %v766_v27 }
 0x29a   :  { %s2788_s27 = sld [smem:[#allocation3 + $0xb80]]  ;;  %v792_v43 = vstv %s4125_s9 }
 0x29b   :  { %s4130_s18 = sld [smem:[#allocation152_spill]]  ;;  %v793_v55 = vsel %vm771_vm3, %v792_v43, %v768_v28  ;;  %v842_v28 = vstv %s2143_s13 }
 0x29c   :  { %4126 = sst [smem:[#allocation74_spill]] %s2779_s6 }
 0x29d   :  { %s4131_s14 = sld [smem:[#allocation153_spill]] }
 0x29e   :  { %s4132_s1 = sld [smem:[#allocation154_spill]]  ;;  %v794_v45 = vstv %s4127_s12 }
 0x29f   :  { %s4133_s30 = sld [smem:[#allocation155_spill]]  ;;  %v797_v46 = vstv %s4128_s15  ;;  %v795_v56 = vsel %vm771_vm3, %v794_v45, %v770_v31  ;;  %v849_v31 = vstv %s2150_s0  ;;  %v863_v45 = vstv %s2186_s20 }
 0x2a0   :  { %4129 = sst [smem:[#allocation75_spill]] %s2788_s27  ;;  %v798_v57 = vsel %vm796_vm4, %v797_v46, %v773_v32  ;;  %v820_v16 = vsel %vm796_vm4, %v819_v5, %v795_v56  ;;  %vm1171_vm3 = vcmp.eq.s32.totalorder %v2152_v39, 29 }
 0x2a1   :  { %s2798_s6 = sld [smem:[#allocation3 + $0xb81]]  ;;  %v799_v47 = vstv %s4130_s18 }
 0x2a2   :  { %s4135_s24 = sld [smem:[#allocation156_spill]]  ;;  %v800_v59 = vsel %vm796_vm4, %v799_v47, %v775_v33 }
 0x2a3   :  { %s4136_s27 = sld [smem:[#allocation157_spill]]  ;;  %v801_v48 = vstv %s4131_s14  ;;  %v825_v19 = vsel %vm821_vm5, %v824_v7, %v800_v59 }
 0x2a4   :  { %s4137_s3 = sld [smem:[#allocation158_spill]]  ;;  %v803_v49 = vstv %s4132_s1  ;;  %v802_v60 = vsel %vm796_vm4, %v801_v48, %v777_v35  ;;  %v857_v35 = vstv %s2168_s7  ;;  %v850_v43 = vsel %vm846_vm6, %v849_v31, %v825_v19 }
 0x2a5   :  { %s2806_s23 = sld [smem:[#allocation3 + $0xb82]]  ;;  %v805_v50 = vstv %s4133_s30  ;;  %v804_v61 = vsel %vm796_vm4, %v803_v49, %v779_v36  ;;  %v859_v36 = vstv %s2174_s16 }
 0x2a6   :  { %s2813_s19 = sld [smem:[#allocation3 + $0xb83]]  ;;  %v806_v62 = vsel %vm796_vm4, %v805_v50, %v781_v37 }
 0x2a7   :  { %4134 = sst [smem:[#allocation76_spill]] %s2798_s6 }
 0x2a8   :  { %s4138_s6 = sld [smem:[#allocation159_spill]]  ;;  %v807_v52 = vstv %s4135_s24 }
 0x2a9   :  { %s2819_s5 = sld [smem:[#allocation3 + $0xb84]]  ;;  %v809_v53 = vstv %s4136_s27  ;;  %v808_v63 = vsel %vm796_vm4, %v807_v52, %v783_v38  ;;  %v867_v52 = vstv %s2204_s28 }
 0x2aa   :  { %s4140_s10 = sld [smem:[#allocation160_spill]]  ;;  %v811_v54 = vstv %s4137_s3  ;;  %v810_v0 = vsel %vm796_vm4, %v809_v53, %v785_v40 }
 0x2ab   :  { %s2826_s9 = sld [smem:[#allocation3 + $0xb85]]  ;;  %v812_v1 = vsel %vm796_vm4, %v811_v54, %v787_v41  ;;  %v861_v41 = vstv %s2180_s17 }
 0x2ac   :  { %s4142_s12 = sld [smem:[#allocation161_spill]] }
 0x2ad   :  { %s2835_s15 = sld [smem:[#allocation3 + $0xb86]] }
 0x2ae   :  { %v813_v58 = vstv %s4138_s6  ;;  %s4144_s27 = sld [smem:[#allocation162_spill]] }
 0x2af   :  { %4139 = sst [smem:[#allocation77_spill]] %s2819_s5  ;;  %v814_v3 = vsel %vm796_vm4, %v813_v58, %v789_v44 }
 0x2b0   :  { %s4145_s3 = sld [smem:[#allocation163_spill]]  ;;  %v815_v2 = vstv %s4140_s10 }
 0x2b1   :  { %4141 = sst [smem:[#allocation78_spill]] %s2826_s9  ;;  %v816_v14 = vsel %vm796_vm4, %v815_v2, %v791_v51  ;;  %v865_v51 = vstv %s2194_s22 }
 0x2b2   :  { %s4146_s18 = sld [smem:[#allocation164_spill]]  ;;  %v817_v4 = vstv %s4142_s12 }
 0x2b3   :  { %4143 = sst [smem:[#allocation79_spill]] %s2835_s15  ;;  %v818_v15 = vsel %vm796_vm4, %v817_v4, %v793_v55  ;;  %vm1196_vm4 = vcmp.eq.s32.totalorder %v2152_v39, 30 }
 0x2b4   :  { %s2845_s14 = sld [smem:[#allocation3 + $0xb87]]  ;;  %v822_v6 = vstv %s4144_s27  ;;  %v843_v38 = vsel %vm821_vm5, %v842_v28, %v818_v15 }
 0x2b5   :  { %s4148_s6 = sld [smem:[#allocation165_spill]]  ;;  %v823_v18 = vsel %vm821_vm5, %v822_v6, %v798_v57 }
 0x2b6   :  { %s4149_s1 = sld [smem:[#allocation166_spill]]  ;;  %v826_v8 = vstv %s4145_s3  ;;  %v848_v42 = vsel %vm846_vm6, %v847_v30, %v823_v18 }
 0x2b7   :  { %s4150_s30 = sld [smem:[#allocation167_spill]]  ;;  %v827_v20 = vsel %vm821_vm5, %v826_v8, %v802_v60 }
 0x2b8   :  { %s4151_s24 = sld [smem:[#allocation168_spill]]  ;;  %v828_v9 = vstv %s4146_s18 }
 0x2b9   :  { %s2854_s15 = sld [smem:[#allocation3 + $0xb88]]  ;;  %v829_v21 = vsel %vm821_vm5, %v828_v9, %v804_v61 }
 0x2ba   :  { %4147 = sst [smem:[#allocation80_spill]] %s2845_s14 }
 0x2bb   :  { %s4152_s14 = sld [smem:[#allocation169_spill]]  ;;  %v830_v10 = vstv %s4148_s6 }
 0x2bc   :  { %s2861_s9 = sld [smem:[#allocation3 + $0xb89]]  ;;  %v832_v11 = vstv %s4149_s1  ;;  %v831_v22 = vsel %vm821_vm5, %v830_v10, %v806_v62  ;;  %v868_v62 = vsel %vm846_vm6, %v867_v52, %v843_v38 }
 0x2bd   :  { %s2867_s5 = sld [smem:[#allocation3 + $0xb8a]]  ;;  %v834_v12 = vstv %s4150_s30  ;;  %v833_v23 = vsel %vm821_vm5, %v832_v11, %v808_v63  ;;  %v856_v47 = vsel %vm846_vm6, %v855_v34, %v831_v22 }
 0x2be   :  { %v836_v13 = vstv %s4151_s24  ;;  %s2873_s10 = sld [smem:[#allocation3 + $0xb8b]]  ;;  %v835_v24 = vsel %vm821_vm5, %v834_v12, %v810_v0  ;;  %v858_v48 = vsel %vm846_vm6, %v857_v35, %v833_v23 }
 0x2bf   :  { %s4153_s25 = sld [smem:[#allocation170_spill]]  ;;  %v837_v25 = vsel %vm821_vm5, %v836_v13, %v812_v1  ;;  %v860_v49 = vsel %vm846_vm6, %v859_v36, %v835_v24 }
 0x2c0   :  { %s4154_s11 = sld [smem:[#allocation171_spill]]  ;;  %v862_v50 = vsel %vm846_vm6, %v861_v41, %v837_v25 }
 0x2c1   :  { %v838_v17 = vstv %s4152_s14  ;;  %s2882_s12 = sld [smem:[#allocation3 + $0xc00]] }
 0x2c2   :  { %s4155_s27 = sld [smem:[#allocation172_spill]]  ;;  %v839_v26 = vsel %vm821_vm5, %v838_v17, %v814_v3 }
 0x2c3   :  { %s2892_s3 = sld [smem:[#allocation3 + $0xc01]]  ;;  %v864_v54 = vsel %vm846_vm6, %v863_v45, %v839_v26 }
 0x2c4   :  { %s4156_s18 = sld [smem:[#allocation173_spill]] }
 0x2c5   :  { %s2902_s14 = sld [smem:[#allocation3 + $0xc02]]  ;;  %v840_v27 = vstv %s4153_s25 }
 0x2c6   :  { %v844_v29 = vstv %s4154_s11  ;;  %s2909_s6 = sld [smem:[#allocation3 + $0xc03]]  ;;  %v841_v37 = vsel %vm821_vm5, %v840_v27, %v816_v14 }
 0x2c7   :  { %s2915_s1 = sld [smem:[#allocation3 + $0xc04]]  ;;  %v845_v40 = vsel %vm821_vm5, %v844_v29, %v820_v16  ;;  %v866_v61 = vsel %vm846_vm6, %v865_v51, %v841_v37  ;;  %vm1221_vm5 = vcmp.eq.s32.totalorder %v2152_v39, 31 }
 0x2c8   :  { %v851_v32 = vstv %s4155_s27  ;;  %s2921_s30 = sld [smem:[#allocation3 + $0xc05]] }
 0x2c9   :  { %s4157_s13 = sld [smem:[#allocation6_spill]]  ;;  %v852_v44 = vsel %vm846_vm6, %v851_v32, %v827_v20 }
 0x2ca   :  { %v853_v33 = vstv %s4156_s18  ;;  %s2930_s0 = sld [smem:[#allocation3 + $0xc06]] }
 0x2cb   :  { %s4159_s2 = sld [smem:[#allocation7_spill]]  ;;  %v854_v46 = vsel %vm846_vm6, %v853_v33, %v829_v21 }
 0x2cc   :  { %s4160_s7 = sld [smem:[#allocation8_spill]] }
 0x2cd   :  { %s2939_s8 = sld [smem:[#allocation3 + $0xc07]] }
 0x2ce   :  { %s4162_s16 = sld [smem:[#allocation9_spill]] }
 0x2cf   :  { %s4163_s17 = sld [smem:[#allocation10_spill]]  ;;  %v869_v53 = vstv %s4157_s13 }
 0x2d0   :  { %4158 = sst [smem:[#allocation81_spill]] %s2930_s0  ;;  %v870_v1 = vsel %vm846_vm6, %v869_v53, %v845_v40  ;;  %vm1246_vm6 = vcmask 64512  }
 0x2d1   :  { %s4164_s24 = sld [smem:[#allocation11_spill]]  ;;  %v872_v55 = vstv %s4159_s2 }
 0x2d2   :  { %s4165_s25 = sld [smem:[#allocation12_spill]]  ;;  %v874_v56 = vstv %s4160_s7  ;;  %v873_v2 = vsel %vm871_vm7, %v872_v55, %v848_v42 }
 0x2d3   :  { %4161 = sst [smem:[#allocation82_spill]] %s2939_s8  ;;  %v875_v3 = vsel %vm871_vm7, %v874_v56, %v850_v43 }
 0x2d4   :  { %s2949_s11 = sld [smem:[#allocation3 + $0xc08]]  ;;  %v876_v57 = vstv %s4162_s16 }
 0x2d5   :  { %s4167_s20 = sld [smem:[#allocation13_spill]]  ;;  %v878_v58 = vstv %s4163_s17  ;;  %v877_v5 = vsel %vm871_vm7, %v876_v57, %v852_v44 }
 0x2d6   :  { %s4168_s27 = sld [smem:[#allocation14_spill]]  ;;  %v879_v6 = vsel %vm871_vm7, %v878_v58, %v854_v46 }
 0x2d7   :  { %s2956_s18 = sld [smem:[#allocation3 + $0xc09]]  ;;  %v880_v59 = vstv %s4164_s24 }
 0x2d8   :  { %s4170_s8 = sld [smem:[#allocation15_spill]]  ;;  %v882_v60 = vstv %s4165_s25  ;;  %v881_v7 = vsel %vm871_vm7, %v880_v59, %v856_v47 }
 0x2d9   :  { %s2963_s0 = sld [smem:[#allocation3 + $0xc0a]]  ;;  %v883_v8 = vsel %vm871_vm7, %v882_v60, %v858_v48 }
 0x2da   :  { %4166 = sst [smem:[#allocation83_spill]] %s2949_s11 }
 0x2db   :  { %s2969_s22 = sld [smem:[#allocation3 + $0xc0b]]  ;;  %v884_v63 = vstv %s4167_s20 }
 0x2dc   :  { %s4173_s28 = sld [smem:[#allocation16_spill]]  ;;  %v886_v0 = vstv %s4168_s27  ;;  %v885_v9 = vsel %vm871_vm7, %v884_v63, %v860_v49 }
 0x2dd   :  { %4169 = sst [smem:[#allocation84_spill]] %s2956_s18  ;;  %v887_v10 = vsel %vm871_vm7, %v886_v0, %v862_v50 }
 0x2de   :  { %s4174_s13 = sld [smem:[#allocation17_spill]]  ;;  %v888_v4 = vstv %s4170_s8 }
 0x2df   :  { %4171 = sst [smem:[#allocation85_spill]] %s2963_s0  ;;  %v889_v13 = vsel %vm871_vm7, %v888_v4, %v864_v54 }
 0x2e0   :  { %s2977_s2 = sld [smem:[#allocation3 + $0xc80]] }
 0x2e1   :  { %4172 = sst [smem:[#allocation86_spill]] %s2969_s22 }
 0x2e2   :  { %s4176_s7 = sld [smem:[#allocation18_spill]]  ;;  %v890_v11 = vstv %s4173_s28 }
 0x2e3   :  { %s4177_s16 = sld [smem:[#allocation19_spill]]  ;;  %v891_v20 = vsel %vm871_vm7, %v890_v11, %v866_v61 }
 0x2e4   :  { %s2986_s17 = sld [smem:[#allocation3 + $0xc81]]  ;;  %v892_v12 = vstv %s4174_s13 }
 0x2e5   :  { %s4179_s24 = sld [smem:[#allocation20_spill]]  ;;  %v893_v24 = vsel %vm871_vm7, %v892_v12, %v868_v62 }
 0x2e6   :  { %4175 = sst [smem:[#allocation87_spill]] %s2977_s2 }
 0x2e7   :  { %s4180_s25 = sld [smem:[#allocation21_spill]] }
 0x2e8   :  { %s4181_s20 = sld [smem:[#allocation22_spill]]  ;;  %v894_v14 = vstv %s4176_s7 }
 0x2e9   :  { %s4182_s27 = sld [smem:[#allocation23_spill]]  ;;  %v897_v15 = vstv %s4177_s16  ;;  %v895_v25 = vsel %vm871_vm7, %v894_v14, %v870_v1 }
 0x2ea   :  { %4178 = sst [smem:[#allocation88_spill]] %s2986_s17  ;;  %v898_v26 = vsel %vm896_vm8, %v897_v15, %v873_v2 }
 0x2eb   :  { %s2996_s2 = sld [smem:[#allocation3 + $0xc82]]  ;;  %v899_v16 = vstv %s4179_s24 }
 0x2ec   :  { %s4184_s8 = sld [smem:[#allocation24_spill]]  ;;  %v900_v28 = vsel %vm896_vm8, %v899_v16, %v875_v3 }
 0x2ed   :  { %s4185_s17 = sld [smem:[#allocation25_spill]]  ;;  %v901_v17 = vstv %s4180_s25 }
 0x2ee   :  { %s4186_s22 = sld [smem:[#allocation26_spill]]  ;;  %v903_v18 = vstv %s4181_s20  ;;  %v902_v29 = vsel %vm896_vm8, %v901_v17, %v877_v5 }
 0x2ef   :  { %s3004_s0 = sld [smem:[#allocation3 + $0xc83]]  ;;  %v905_v19 = vstv %s4182_s27  ;;  %v904_v30 = vsel %vm896_vm8, %v903_v18, %v879_v6 }
 0x2f0   :  { %s3011_s18 = sld [smem:[#allocation3 + $0xc84]]  ;;  %v906_v31 = vsel %vm896_vm8, %v905_v19, %v881_v7 }
 0x2f1   :  { %4183 = sst [smem:[#allocation89_spill]] %s2996_s2 }
 0x2f2   :  { %s4188_s2 = sld [smem:[#allocation27_spill]]  ;;  %v907_v21 = vstv %s4184_s8 }
 0x2f3   :  { %s3017_s11 = sld [smem:[#allocation3 + $0xc85]]  ;;  %v909_v22 = vstv %s4185_s17  ;;  %v908_v32 = vsel %vm896_vm8, %v907_v21, %v883_v8 }
 0x2f4   :  { %s4191_s28 = sld [smem:[#allocation28_spill]]  ;;  %v911_v23 = vstv %s4186_s22  ;;  %v910_v33 = vsel %vm896_vm8, %v909_v22, %v885_v9 }
 0x2f5   :  { %4187 = sst [smem:[#allocation90_spill]] %s3004_s0  ;;  %v912_v34 = vsel %vm896_vm8, %v911_v23, %v887_v10 }
 0x2f6   :  { %4189 = sst [smem:[#allocation91_spill]] %s3011_s18 }
 0x2f7   :  { %s3024_s13 = sld [smem:[#allocation3 + $0xc86]] }
 0x2f8   :  { %s4193_s7 = sld [smem:[#allocation29_spill]]  ;;  %v913_v27 = vstv %s4188_s2 }
 0x2f9   :  { %4190 = sst [smem:[#allocation92_spill]] %s3017_s11  ;;  %v914_v36 = vsel %vm896_vm8, %v913_v27, %v889_v13 }
 0x2fa   :  { %s4194_s16 = sld [smem:[#allocation30_spill]]  ;;  %v915_v35 = vstv %s4191_s28 }
 0x2fb   :  { %s3033_s24 = sld [smem:[#allocation3 + $0xc87]]  ;;  %v916_v48 = vsel %vm896_vm8, %v915_v35, %v891_v20 }
 0x2fc   :  { %s4196_s17 = sld [smem:[#allocation31_spill]] }
 0x2fd   :  { %4192 = sst [smem:[#allocation93_spill]] %s3024_s13 }
 0x2fe   :  { %s4197_s22 = sld [smem:[#allocation32_spill]]  ;;  %v917_v37 = vstv %s4193_s7 }
 0x2ff   :  { %s4198_s25 = sld [smem:[#allocation33_spill]]  ;;  %v918_v49 = vsel %vm896_vm8, %v917_v37, %v893_v24  ;;  %v988_v37 = vstv %s2663_s29 }
 0x300   :  { %s4199_s20 = sld [smem:[#allocation34_spill]]  ;;  %v919_v38 = vstv %s4194_s16 }
 0x301   :  { %4195 = sst [smem:[#allocation94_spill]] %s3033_s24  ;;  %v920_v50 = vsel %vm896_vm8, %v919_v38, %v895_v25  ;;  %v974_v25 = vstv %s2608_s4 }
 0x302   :  { %s3043_s27 = sld [smem:[#allocation3 + $0xc88]]  ;;  %v922_v40 = vstv %s4196_s17 }
 0x303   :  { %s4201_s2 = sld [smem:[#allocation35_spill]]  ;;  %v923_v52 = vsel %vm921_vm9, %v922_v40, %v898_v26  ;;  %v976_v26 = vstv %s2615_s21 }
 0x304   :  { %s4202_s8 = sld [smem:[#allocation36_spill]]  ;;  %v924_v41 = vstv %s4197_s22 }
 0x305   :  { %s4203_s24 = sld [smem:[#allocation37_spill]]  ;;  %v926_v42 = vstv %s4198_s25  ;;  %v925_v53 = vsel %vm921_vm9, %v924_v41, %v900_v28 }
 0x306   :  { %s4204_s13 = sld [smem:[#allocation38_spill]]  ;;  %v928_v43 = vstv %s4199_s20  ;;  %v927_v54 = vsel %vm921_vm9, %v926_v42, %v902_v29 }
 0x307   :  { %s3052_s11 = sld [smem:[#allocation3 + $0xc89]]  ;;  %v929_v55 = vsel %vm921_vm9, %v928_v43, %v904_v30 }
 0x308   :  { %4200 = sst [smem:[#allocation95_spill]] %s3043_s27 }
 0x309   :  { %s4206_s27 = sld [smem:[#allocation39_spill]]  ;;  %v930_v44 = vstv %s4201_s2 }
 0x30a   :  { %s3059_s18 = sld [smem:[#allocation3 + $0xc8a]]  ;;  %v932_v45 = vstv %s4202_s8  ;;  %v931_v56 = vsel %vm921_vm9, %v930_v44, %v906_v31 }
 0x30b   :  { %s3065_s0 = sld [smem:[#allocation3 + $0xc8b]]  ;;  %v934_v46 = vstv %s4203_s24  ;;  %v933_v57 = vsel %vm921_vm9, %v932_v45, %v908_v32 }
 0x30c   :  { %v936_v47 = vstv %s4204_s13  ;;  %s3071_s28 = sld [smem:[#allocation3 + $0xd00]]  ;;  %v935_v58 = vsel %vm921_vm9, %v934_v46, %v910_v33  ;;  %v986_v33 = vstv %s2656_s26 }
 0x30d   :  { %4205 = sst [smem:[#allocation96_spill]] %s3052_s11  ;;  %v937_v59 = vsel %vm921_vm9, %v936_v47, %v912_v34 }
 0x30e   :  { %s4210_s7 = sld [smem:[#allocation40_spill]] }
 0x30f   :  { %s4211_s16 = sld [smem:[#allocation41_spill]]  ;;  %v938_v51 = vstv %s4206_s27 }
 0x310   :  { %4207 = sst [smem:[#allocation97_spill]] %s3059_s18  ;;  %v939_v60 = vsel %vm921_vm9, %v938_v51, %v914_v36 }
 0x311   :  { %4208 = sst [smem:[#allocation98_spill]] %s3065_s0 }
 0x312   :  { %4209 = sst [smem:[#allocation99_spill]] %s3071_s28 }
 0x313   :  { %s4212_s17 = sld [smem:[#allocation42_spill]] }
 0x314   :  { %s3080_s22 = sld [smem:[#allocation3 + $0xd01]]  ;;  %v940_v61 = vstv %s4210_s7 }
 0x315   :  { %s4214_s13 = sld [smem:[#allocation43_spill]]  ;;  %v942_v62 = vstv %s4211_s16  ;;  %v941_v7 = vsel %vm921_vm9, %v940_v61, %v916_v48 }
 0x316   :  { %s4215_s24 = sld [smem:[#allocation44_spill]]  ;;  %v943_v8 = vsel %vm921_vm9, %v942_v62, %v918_v49 }
 0x317   :  { %s4216_s25 = sld [smem:[#allocation45_spill]] }
 0x318   :  { %s3090_s20 = sld [smem:[#allocation3 + $0xd02]] }
 0x319   :  { %s4218_s27 = sld [smem:[#allocation46_spill]]  ;;  %v944_v63 = vstv %s4212_s17 }
 0x31a   :  { %4213 = sst [smem:[#allocation100_spill]] %s3080_s22  ;;  %v945_v9 = vsel %vm921_vm9, %v944_v63, %v920_v50 }
 0x31b   :  { %s4219_s2 = sld [smem:[#allocation47_spill]]  ;;  %v947_v0 = vstv %s4214_s13 }
 0x31c   :  { %s4220_s8 = sld [smem:[#allocation48_spill]]  ;;  %v949_v1 = vstv %s4215_s24  ;;  %v948_v11 = vsel %vm946_vm10, %v947_v0, %v923_v52 }
 0x31d   :  { %s4221_s22 = sld [smem:[#allocation49_spill]]  ;;  %v951_v2 = vstv %s4216_s25  ;;  %v950_v12 = vsel %vm946_vm10, %v949_v1, %v925_v53 }
 0x31e   :  { %4217 = sst [smem:[#allocation101_spill]] %s3090_s20  ;;  %v952_v13 = vsel %vm946_vm10, %v951_v2, %v927_v54  ;;  %v975_v36 = vsel %vm971_vm11, %v974_v25, %v950_v12  ;;  %v1028_v12 = vstv %s2813_s19 }
 0x31f   :  { %s3100_s28 = sld [smem:[#allocation3 + $0xd03]]  ;;  %v953_v3 = vstv %s4218_s27  ;;  %v977_v38 = vsel %vm971_vm11, %v976_v26, %v952_v13 }
 0x320   :  { %s4223_s20 = sld [smem:[#allocation50_spill]]  ;;  %v954_v15 = vsel %vm946_vm10, %v953_v3, %v929_v55 }
 0x321   :  { %s3107_s0 = sld [smem:[#allocation3 + $0xd04]]  ;;  %v955_v4 = vstv %s4219_s2 }
 0x322   :  { %s4224_s18 = sld [smem:[#allocation51_spill]]  ;;  %v957_v5 = vstv %s4220_s8  ;;  %v956_v16 = vsel %vm946_vm10, %v955_v4, %v931_v56 }
 0x323   :  { %s3113_s11 = sld [smem:[#allocation3 + $0xd05]]  ;;  %v959_v6 = vstv %s4221_s22  ;;  %v958_v17 = vsel %vm946_vm10, %v957_v5, %v933_v57 }
 0x324   :  { %s4225_s7 = sld [smem:[#allocation52_spill]]  ;;  %v960_v18 = vsel %vm946_vm10, %v959_v6, %v935_v58 }
 0x325   :  { %4222 = sst [smem:[#allocation102_spill]] %s3100_s28 }
 0x326   :  { %s3119_s28 = sld [smem:[#allocation3 + $0xd06]]  ;;  %v961_v10 = vstv %s4223_s20 }
 0x327   :  { %s4226_s16 = sld [smem:[#allocation53_spill]]  ;;  %v962_v19 = vsel %vm946_vm10, %v961_v10, %v937_v59 }
 0x328   :  { %s4227_s17 = sld [smem:[#allocation54_spill]]  ;;  %v963_v14 = vstv %s4224_s18  ;;  %v987_v44 = vsel %vm971_vm11, %v986_v33, %v962_v19  ;;  %v1047_v33 = vstv %s2882_s12 }
 0x329   :  { %s3128_s13 = sld [smem:[#allocation3 + $0xd07]]  ;;  %v964_v23 = vsel %vm946_vm10, %v963_v14, %v939_v60 }
 0x32a   :  { %s4228_s22 = sld [smem:[#allocation55_spill]]  ;;  %v965_v20 = vstv %s4225_s7  ;;  %v989_v47 = vsel %vm971_vm11, %v988_v37, %v964_v23  ;;  %v1055_v37 = vstv %s2915_s1 }
 0x32b   :  { %s3137_s24 = sld [smem:[#allocation3 + $0xd08]]  ;;  %v966_v30 = vsel %vm946_vm10, %v965_v20, %v941_v7  ;;  %v1038_v20 = vstv %s2854_s15 }
 0x32c   :  { %s4230_s25 = sld [smem:[#allocation56_spill]] }
 0x32d   :  { %s4231_s20 = sld [smem:[#allocation57_spill]]  ;;  %v967_v21 = vstv %s4226_s16 }
 0x32e   :  { %s4232_s27 = sld [smem:[#allocation58_spill]]  ;;  %v969_v22 = vstv %s4227_s17  ;;  %v968_v31 = vsel %vm946_vm10, %v967_v21, %v943_v8 }
 0x32f   :  { %s3147_s2 = sld [smem:[#allocation3 + $0xd09]]  ;;  %v970_v34 = vsel %vm946_vm10, %v969_v22, %v945_v9 }
 0x330   :  { %s4234_s18 = sld [smem:[#allocation59_spill]]  ;;  %v972_v24 = vstv %s4228_s22 }
 0x331   :  { %4229 = sst [smem:[#allocation103_spill]] %s3137_s24  ;;  %v973_v35 = vsel %vm971_vm11, %v972_v24, %v948_v11  ;;  %v1026_v11 = vstv %s2806_s23 }
 0x332   :  { %s3154_s8 = sld [smem:[#allocation3 + $0xd0a]]  ;;  %v978_v27 = vstv %s4230_s25 }
 0x333   :  { %s3161_s24 = sld [smem:[#allocation3 + $0xd0b]]  ;;  %v980_v28 = vstv %s4231_s20  ;;  %v979_v40 = vsel %vm971_vm11, %v978_v27, %v954_v15 }
 0x334   :  { %v982_v29 = vstv %s4232_s27  ;;  %s3167_s7 = sld [smem:[#allocation3 + $0xd80]]  ;;  %v981_v41 = vsel %vm971_vm11, %v980_v28, %v956_v16 }
 0x335   :  { %4233 = sst [smem:[#allocation104_spill]] %s3147_s2  ;;  %v983_v42 = vsel %vm971_vm11, %v982_v29, %v958_v17 }
 0x336   :  { %s4238_s16 = sld [smem:[#allocation60_spill]]  ;;  %v984_v32 = vstv %s4234_s18 }
 0x337   :  { %s4239_s17 = sld [smem:[#allocation61_spill]]  ;;  %v985_v43 = vsel %vm971_vm11, %v984_v32, %v960_v18  ;;  %v1044_v32 = vstv %s2873_s10 }
 0x338   :  { %4235 = sst [smem:[#allocation105_spill]] %s3154_s8 }
 0x339   :  { %4236 = sst [smem:[#allocation106_spill]] %s3161_s24 }
 0x33a   :  { %4237 = sst [smem:[#allocation107_spill]] %s3167_s7 }
 0x33b   :  { %s3175_s22 = sld [smem:[#allocation3 + $0xd81]] }
 0x33c   :  { %s4241_s4 = sld [smem:[#allocation62_spill]]  ;;  %v990_v45 = vstv %s4238_s16 }
 0x33d   :  { %s4242_s21 = sld [smem:[#allocation63_spill]]  ;;  %v992_v46 = vstv %s4239_s17  ;;  %v991_v54 = vsel %vm971_vm11, %v990_v45, %v966_v30  ;;  %v1040_v30 = vstv %s2861_s9 }
 0x33e   :  { %s3184_s25 = sld [smem:[#allocation3 + $0xd82]]  ;;  %v993_v58 = vsel %vm971_vm11, %v992_v46, %v968_v31  ;;  %v1042_v31 = vstv %s2867_s5 }
 0x33f   :  { %s4244_s20 = sld [smem:[#allocation64_spill]] }
 0x340   :  { %s4245_s26 = sld [smem:[#allocation65_spill]] }
 0x341   :  { %4240 = sst [smem:[#allocation108_spill]] %s3175_s22 }
 0x342   :  { %s4246_s27 = sld [smem:[#allocation66_spill]]  ;;  %v994_v48 = vstv %s4241_s4 }
 0x343   :  { %s4247_s18 = sld [smem:[#allocation67_spill]]  ;;  %v997_v49 = vstv %s4242_s21  ;;  %v995_v59 = vsel %vm971_vm11, %v994_v48, %v970_v34  ;;  %v1049_v34 = vstv %s2892_s3 }
 0x344   :  { %4243 = sst [smem:[#allocation109_spill]] %s3184_s25  ;;  %v998_v60 = vsel %vm996_vm12, %v997_v49, %v973_v35  ;;  %v1051_v35 = vstv %s2902_s14 }
 0x345   :  { %s3194_s22 = sld [smem:[#allocation3 + $0xd83]]  ;;  %v999_v50 = vstv %s4244_s20 }
 0x346   :  { %s4249_s29 = sld [smem:[#allocation68_spill]]  ;;  %v1001_v51 = vstv %s4245_s26  ;;  %v1000_v62 = vsel %vm996_vm12, %v999_v50, %v975_v36  ;;  %v1053_v36 = vstv %s2909_s6 }
 0x347   :  { %s4250_s25 = sld [smem:[#allocation69_spill]]  ;;  %v1002_v63 = vsel %vm996_vm12, %v1001_v51, %v977_v38  ;;  %v1057_v38 = vstv %s2921_s30 }
 0x348   :  { %s4251_s7 = sld [smem:[#allocation70_spill]]  ;;  %v1003_v52 = vstv %s4246_s27  ;;  %v1027_v23 = vsel %vm1021_vm13, %v1026_v11, %v1002_v63 }
 0x349   :  { %s3202_s24 = sld [smem:[#allocation3 + $0xd84]]  ;;  %v1005_v53 = vstv %s4247_s18  ;;  %v1004_v0 = vsel %vm996_vm12, %v1003_v52, %v979_v40 }
 0x34a   :  { %s3209_s8 = sld [smem:[#allocation3 + $0xd85]]  ;;  %v1006_v1 = vsel %vm996_vm12, %v1005_v53, %v981_v41  ;;  %v1029_v24 = vsel %vm1021_vm13, %v1028_v12, %v1004_v0 }
 0x34b   :  { %4248 = sst [smem:[#allocation110_spill]] %s3194_s22  ;;  %v1054_v49 = vsel %vm1046_vm14, %v1053_v36, %v1029_v24  ;;  %v1107_v24 = vstv %s3113_s11 }
 0x34c   :  { %s4252_s22 = sld [smem:[#allocation71_spill]]  ;;  %v1007_v55 = vstv %s4249_s29 }
 0x34d   :  { %s3215_s2 = sld [smem:[#allocation3 + $0xd86]]  ;;  %v1009_v56 = vstv %s4250_s25  ;;  %v1008_v2 = vsel %vm996_vm12, %v1007_v55, %v983_v42 }
 0x34e   :  { %s4253_s16 = sld [smem:[#allocation72_spill]]  ;;  %v1011_v57 = vstv %s4251_s7  ;;  %v1010_v3 = vsel %vm996_vm12, %v1009_v56, %v985_v43 }
 0x34f   :  { %s3222_s17 = sld [smem:[#allocation3 + $0xd87]]  ;;  %v1012_v4 = vsel %vm996_vm12, %v1011_v57, %v987_v44 }
 0x350   :  { %s4255_s4 = sld [smem:[#allocation73_spill]] }
 0x351   :  { %s4256_s21 = sld [smem:[#allocation74_spill]] }
 0x352   :  { %v1013_v61 = vstv %s4252_s22  ;;  %s3231_s20 = sld [smem:[#allocation3 + $0xd88]] }
 0x353   :  { %s4258_s25 = sld [smem:[#allocation75_spill]]  ;;  %v1014_v6 = vsel %vm996_vm12, %v1013_v61, %v989_v47  ;;  %v1052_v47 = vsel %vm1046_vm14, %v1051_v35, %v1027_v23 }
 0x354   :  { %s4259_s7 = sld [smem:[#allocation76_spill]]  ;;  %v1015_v5 = vstv %s4253_s16  ;;  %v1039_v29 = vsel %vm1021_vm13, %v1038_v20, %v1014_v6 }
 0x355   :  { %4254 = sst [smem:[#allocation111_spill]] %s3222_s17  ;;  %v1016_v17 = vsel %vm996_vm12, %v1015_v5, %v991_v54 }
 0x356   :  { %s3241_s26 = sld [smem:[#allocation3 + $0xd89]]  ;;  %v1017_v7 = vstv %s4255_s4  ;;  %v1041_v41 = vsel %vm1021_vm13, %v1040_v30, %v1016_v17 }
 0x357   :  { %s4261_s22 = sld [smem:[#allocation77_spill]]  ;;  %v1019_v8 = vstv %s4256_s21  ;;  %v1018_v18 = vsel %vm996_vm12, %v1017_v7, %v993_v58 }
 0x358   :  { %4257 = sst [smem:[#allocation112_spill]] %s3231_s20  ;;  %v1020_v19 = vsel %vm996_vm12, %v1019_v8, %v995_v59  ;;  %v1043_v42 = vsel %vm1021_vm13, %v1042_v31, %v1018_v18 }
 0x359   :  { %s4262_s27 = sld [smem:[#allocation78_spill]]  ;;  %v1022_v9 = vstv %s4258_s25  ;;  %v1045_v43 = vsel %vm1021_vm13, %v1044_v32, %v1020_v19 }
 0x35a   :  { %s4263_s18 = sld [smem:[#allocation79_spill]]  ;;  %v1024_v10 = vstv %s4259_s7  ;;  %v1023_v21 = vsel %vm1021_vm13, %v1022_v9, %v998_v60 }
 0x35b   :  { %s4264_s29 = sld [smem:[#allocation80_spill]]  ;;  %v1025_v22 = vsel %vm1021_vm13, %v1024_v10, %v1000_v62  ;;  %v1048_v45 = vsel %vm1046_vm14, %v1047_v33, %v1023_v21 }
 0x35c   :  { %4260 = sst [smem:[#allocation113_spill]] %s3241_s26  ;;  %v1050_v46 = vsel %vm1046_vm14, %v1049_v34, %v1025_v22  ;;  %v1105_v22 = vstv %s3107_s0 }
 0x35d   :  { %s3250_s20 = sld [smem:[#allocation3 + $0xd8a]]  ;;  %v1030_v13 = vstv %s4261_s22 }
 0x35e   :  { %s3257_s26 = sld [smem:[#allocation3 + $0xd8b]]  ;;  %v1031_v25 = vsel %vm1021_vm13, %v1030_v13, %v1006_v1 }
 0x35f   :  { %s3263_s17 = sld [smem:[#allocation3 + $0xe00]]  ;;  %v1032_v14 = vstv %s4262_s27  ;;  %v1056_v50 = vsel %vm1046_vm14, %v1055_v37, %v1031_v25  ;;  %v1109_v25 = vstv %s3119_s28 }
 0x360   :  { %v1034_v15 = vstv %s4263_s18  ;;  %s3269_s16 = sld [smem:[#allocation3 + $0xe01]]  ;;  %v1033_v26 = vsel %vm1021_vm13, %v1032_v14, %v1008_v2 }
 0x361   :  { %v1036_v16 = vstv %s4264_s29  ;;  %s3278_s23 = sld [smem:[#allocation3 + $0xe02]]  ;;  %v1035_v27 = vsel %vm1021_vm13, %v1034_v15, %v1010_v3  ;;  %v1058_v51 = vsel %vm1046_vm14, %v1057_v38, %v1033_v26  ;;  %v1111_v26 = vstv %s3128_s13 }
 0x362   :  { %s3288_s19 = sld [smem:[#allocation3 + $0xe03]]  ;;  %v1037_v28 = vsel %vm1021_vm13, %v1036_v16, %v1012_v4 }
 0x363   :  { %s4265_s15 = sld [smem:[#allocation81_spill]] }
 0x364   :  { %s3298_s4 = sld [smem:[#allocation3 + $0xe04]] }
 0x365   :  { %s4266_s21 = sld [smem:[#allocation82_spill]] }
 0x366   :  { %s3305_s25 = sld [smem:[#allocation3 + $0xe05]] }
 0x367   :  { %s4267_s7 = sld [smem:[#allocation83_spill]] }
 0x368   :  { %s3311_s22 = sld [smem:[#allocation3 + $0xe06]] }
 0x369   :  { %v1059_v40 = vstv %s4265_s15  ;;  %s3317_s27 = sld [smem:[#allocation3 + $0xe07]] }
 0x36a   :  { %s4269_s5 = sld [smem:[#allocation84_spill]]  ;;  %v1060_v52 = vsel %vm1046_vm14, %v1059_v40, %v1035_v27 }
 0x36b   :  { %s4270_s9 = sld [smem:[#allocation85_spill]]  ;;  %v1061_v44 = vstv %s4266_s21 }
 0x36c   :  { %s4271_s10 = sld [smem:[#allocation86_spill]]  ;;  %v1062_v53 = vsel %vm1046_vm14, %v1061_v44, %v1037_v28 }
 0x36d   :  { %s3326_s12 = sld [smem:[#allocation3 + $0xe08]]  ;;  %v1063_v48 = vstv %s4267_s7 }
 0x36e   :  { %s4273_s3 = sld [smem:[#allocation87_spill]]  ;;  %v1064_v57 = vsel %vm1046_vm14, %v1063_v48, %v1039_v29  ;;  %v1130_v48 = vstv %s3202_s24 }
 0x36f   :  { %4268 = sst [smem:[#allocation114_spill]] %s3317_s27 }
 0x370   :  { %s4274_s14 = sld [smem:[#allocation88_spill]]  ;;  %v1065_v54 = vstv %s4269_s5 }
 0x371   :  { %s3335_s6 = sld [smem:[#allocation3 + $0xe09]]  ;;  %v1067_v55 = vstv %s4270_s9  ;;  %v1066_v0 = vsel %vm1046_vm14, %v1065_v54, %v1041_v41 }
 0x372   :  { %s4276_s1 = sld [smem:[#allocation89_spill]]  ;;  %v1069_v56 = vstv %s4271_s10  ;;  %v1068_v1 = vsel %vm1046_vm14, %v1067_v55, %v1043_v42 }
 0x373   :  { %4272 = sst [smem:[#allocation115_spill]] %s3326_s12  ;;  %v1070_v4 = vsel %vm1046_vm14, %v1069_v56, %v1045_v43 }
 0x374   :  { %s4277_s30 = sld [smem:[#allocation90_spill]]  ;;  %v1072_v58 = vstv %s4273_s3 }
 0x375   :  { %s4278_s18 = sld [smem:[#allocation91_spill]]  ;;  %v1073_v5 = vsel %vm1071_vm15, %v1072_v58, %v1048_v45 }
 0x376   :  { %s4279_s29 = sld [smem:[#allocation92_spill]]  ;;  %v1074_v59 = vstv %s4274_s14 }
 0x377   :  { %4275 = sst [smem:[#allocation116_spill]] %s3335_s6  ;;  %v1075_v6 = vsel %vm1071_vm15, %v1074_v59, %v1050_v46 }
 0x378   :  { %s3345_s15 = sld [smem:[#allocation3 + $0xe0a]]  ;;  %v1076_v60 = vstv %s4276_s1 }
 0x379   :  { %s4280_s21 = sld [smem:[#allocation93_spill]]  ;;  %v1077_v8 = vsel %vm1071_vm15, %v1076_v60, %v1052_v47 }
 0x37a   :  { %s4281_s7 = sld [smem:[#allocation94_spill]]  ;;  %v1078_v61 = vstv %s4277_s30 }
 0x37b   :  { %s3352_s6 = sld [smem:[#allocation3 + $0xe0b]]  ;;  %v1080_v62 = vstv %s4278_s18  ;;  %v1079_v9 = vsel %vm1071_vm15, %v1078_v61, %v1054_v49  ;;  %v1132_v49 = vstv %s3209_s8 }
 0x37c   :  { %s4282_s12 = sld [smem:[#allocation95_spill]]  ;;  %v1082_v63 = vstv %s4279_s29  ;;  %v1081_v10 = vsel %vm1071_vm15, %v1080_v62, %v1056_v50  ;;  %v1134_v50 = vstv %s3215_s2 }
 0x37d   :  { %s3359_s27 = sld [smem:[#allocation3 + $0xe80]]  ;;  %v1083_v11 = vsel %vm1071_vm15, %v1082_v63, %v1058_v51  ;;  %v1106_v34 = vsel %vm1096_vm0, %v1105_v22, %v1081_v10 }
 0x37e   :  { %s3365_s5 = sld [smem:[#allocation3 + $0xe81]]  ;;  %v1108_v35 = vsel %vm1096_vm0, %v1107_v24, %v1083_v11  ;;  %v1131_v59 = vsel %vm1121_vm1, %v1130_v48, %v1106_v34  ;;  %v1167_v24 = vstv %s3345_s15 }
 0x37f   :  { %s4283_s9 = sld [smem:[#allocation96_spill]]  ;;  %v1084_v2 = vstv %s4280_s21  ;;  %v1133_v60 = vsel %vm1121_vm1, %v1132_v49, %v1108_v35 }
 0x380   :  { %s4284_s10 = sld [smem:[#allocation97_spill]]  ;;  %v1086_v3 = vstv %s4281_s7  ;;  %v1085_v12 = vsel %vm1071_vm15, %v1084_v2, %v1060_v52  ;;  %v1144_v2 = vstv %s3257_s26 }
 0x381   :  { %s3373_s3 = sld [smem:[#allocation3 + $0xe82]]  ;;  %v1087_v13 = vsel %vm1071_vm15, %v1086_v3, %v1062_v53  ;;  %v1110_v36 = vsel %vm1096_vm0, %v1109_v25, %v1085_v12  ;;  %v1147_v3 = vstv %s3263_s17  ;;  %v1159_v12 = vstv %s3311_s22 }
 0x382   :  { %s4286_s14 = sld [smem:[#allocation98_spill]]  ;;  %v1088_v7 = vstv %s4282_s12  ;;  %v1112_v37 = vsel %vm1096_vm0, %v1111_v26, %v1087_v13  ;;  %v1135_v61 = vsel %vm1121_vm1, %v1134_v50, %v1110_v36  ;;  %v1169_v25 = vstv %s3352_s6 }
 0x383   :  { %s4287_s1 = sld [smem:[#allocation99_spill]]  ;;  %v1089_v16 = vsel %vm1071_vm15, %v1088_v7, %v1064_v57  ;;  %v1153_v7 = vstv %s3288_s19  ;;  %v1160_v22 = vsel %vm1146_vm2, %v1159_v12, %v1135_v61 }
 0x384   :  { %s3382_s30 = sld [smem:[#allocation3 + $0xe83]] }
 0x385   :  { %s4289_s18 = sld [smem:[#allocation100_spill]]  ;;  %v1090_v14 = vstv %s4283_s9 }
 0x386   :  { %s4290_s29 = sld [smem:[#allocation101_spill]]  ;;  %v1092_v15 = vstv %s4284_s10  ;;  %v1091_v23 = vsel %vm1071_vm15, %v1090_v14, %v1066_v0 }
 0x387   :  { %4285 = sst [smem:[#allocation117_spill]] %s3373_s3  ;;  %v1093_v27 = vsel %vm1071_vm15, %v1092_v15, %v1068_v1  ;;  %v1142_v1 = vstv %s3250_s20 }
 0x388   :  { %s4291_s21 = sld [smem:[#allocation102_spill]]  ;;  %v1094_v17 = vstv %s4286_s14 }
 0x389   :  { %s3392_s7 = sld [smem:[#allocation3 + $0xe84]]  ;;  %v1097_v18 = vstv %s4287_s1  ;;  %v1095_v28 = vsel %vm1071_vm15, %v1094_v17, %v1070_v4  ;;  %v1149_v4 = vstv %s3269_s16 }
 0x38a   :  { %4288 = sst [smem:[#allocation118_spill]] %s3382_s30  ;;  %v1098_v29 = vsel %vm1096_vm0, %v1097_v18, %v1073_v5  ;;  %v1151_v5 = vstv %s3278_s23 }
 0x38b   :  { %s3400_s12 = sld [smem:[#allocation3 + $0xe85]]  ;;  %v1099_v19 = vstv %s4289_s18 }
 0x38c   :  { %s3407_s30 = sld [smem:[#allocation3 + $0xe86]]  ;;  %v1101_v20 = vstv %s4290_s29  ;;  %v1100_v31 = vsel %vm1096_vm0, %v1099_v19, %v1075_v6 }
 0x38d   :  { %s3413_s3 = sld [smem:[#allocation3 + $0xe87]]  ;;  %v1102_v32 = vsel %vm1096_vm0, %v1101_v20, %v1077_v8  ;;  %v1155_v8 = vstv %s3298_s4 }
 0x38e   :  { %v1103_v21 = vstv %s4291_s21  ;;  %s4294_s9 = sld [smem:[#allocation104_spill]]  ;;  %v1156_v19 = vsel %vm1146_vm2, %v1155_v8, %v1131_v59 }
 0x38f   :  { %4292 = sst [smem:[#allocation119_spill]] %s3392_s7  ;;  %v1104_v33 = vsel %vm1096_vm0, %v1103_v21, %v1079_v9  ;;  %v1157_v9 = vstv %s3305_s25 }
 0x390   :  { %s4293_s7 = sld [smem:[#allocation103_spill]]  ;;  %v1158_v20 = vsel %vm1146_vm2, %v1157_v9, %v1133_v60 }
 0x391   :  { %s3420_s10 = sld [smem:[#allocation3 + $0xe88]]  ;;  %v1182_v35 = vstv %s3400_s12 }
 0x392   :  { %s4296_s14 = sld [smem:[#allocation105_spill]]  ;;  %v1184_v36 = vstv %s3407_s30 }
 0x393   :  { %s4297_s0 = sld [smem:[#allocation106_spill]] }
 0x394   :  { %s3429_s1 = sld [smem:[#allocation3 + $0xe89]]  ;;  %v1115_v38 = vstv %s4294_s9 }
 0x395   :  { %s4299_s11 = sld [smem:[#allocation107_spill]]  ;;  %v1116_v47 = vsel %vm1096_vm0, %v1115_v38, %v1091_v23 }
 0x396   :  { %v1113_v30 = vstv %s4293_s7  ;;  %s4300_s28 = sld [smem:[#allocation108_spill]] }
 0x397   :  { %4295 = sst [smem:[#allocation120_spill]] %s3420_s10  ;;  %v1114_v40 = vsel %vm1096_vm0, %v1113_v30, %v1089_v16 }
 0x398   :  { %s4301_s13 = sld [smem:[#allocation109_spill]]  ;;  %v1117_v41 = vstv %s4296_s14 }
 0x399   :  { %s4302_s18 = sld [smem:[#allocation110_spill]]  ;;  %v1119_v42 = vstv %s4297_s0  ;;  %v1118_v51 = vsel %vm1096_vm0, %v1117_v41, %v1093_v27  ;;  %v1172_v27 = vstv %s3359_s27 }
 0x39a   :  { %4298 = sst [smem:[#allocation121_spill]] %s3429_s1  ;;  %v1120_v52 = vsel %vm1096_vm0, %v1119_v42, %v1095_v28  ;;  %v1143_v10 = vsel %vm1121_vm1, %v1142_v1, %v1118_v51  ;;  %v1174_v28 = vstv %s3365_s5 }
 0x39b   :  { %s3439_s29 = sld [smem:[#allocation3 + $0xe8a]]  ;;  %v1122_v43 = vstv %s4299_s11  ;;  %v1145_v11 = vsel %vm1121_vm1, %v1144_v2, %v1120_v52 }
 0x39c   :  { %s3448_s21 = sld [smem:[#allocation3 + $0xe8b]]  ;;  %v1124_v44 = vstv %s4300_s28  ;;  %v1123_v55 = vsel %vm1121_vm1, %v1122_v43, %v1098_v29  ;;  %v1170_v34 = vsel %vm1146_vm2, %v1169_v25, %v1145_v11 }
 0x39d   :  { %s4304_s7 = sld [smem:[#allocation111_spill]]  ;;  %v1125_v56 = vsel %vm1121_vm1, %v1124_v44, %v1100_v31  ;;  %v1148_v14 = vsel %vm1146_vm2, %v1147_v3, %v1123_v55 }
 0x39e   :  { %s3455_s1 = sld [smem:[#allocation3 + $0xf00]]  ;;  %v1126_v45 = vstv %s4301_s13  ;;  %v1150_v15 = vsel %vm1146_vm2, %v1149_v4, %v1125_v56 }
 0x39f   :  { %v1128_v46 = vstv %s4302_s18  ;;  %s3461_s10 = sld [smem:[#allocation3 + $0xf01]]  ;;  %v1127_v57 = vsel %vm1121_vm1, %v1126_v45, %v1102_v32  ;;  %v1175_v38 = vsel %vm1171_vm3, %v1174_v28, %v1150_v15 }
 0x3a0   :  { %s4306_s9 = sld [smem:[#allocation113_spill]]  ;;  %v1129_v58 = vsel %vm1121_vm1, %v1128_v46, %v1104_v33  ;;  %v1152_v16 = vsel %vm1146_vm2, %v1151_v5, %v1127_v57  ;;  %v1168_v33 = vsel %vm1146_vm2, %v1167_v24, %v1143_v10  ;;  %v1183_v46 = vsel %vm1171_vm3, %v1182_v35, %v1158_v20 }
 0x3a1   :  { %4303 = sst [smem:[#allocation122_spill]] %s3439_s29  ;;  %v1154_v18 = vsel %vm1146_vm2, %v1153_v7, %v1129_v58 }
 0x3a2   :  { %s4305_s29 = sld [smem:[#allocation112_spill]] }
 0x3a3   :  { %s3468_s14 = sld [smem:[#allocation3 + $0xf02]]  ;;  %v1136_v53 = vstv %s4304_s7 }
 0x3a4   :  { %s3476_s0 = sld [smem:[#allocation3 + $0xf03]]  ;;  %v1137_v63 = vsel %vm1121_vm1, %v1136_v53, %v1112_v37  ;;  %v1173_v37 = vsel %vm1171_vm3, %v1172_v27, %v1148_v14  ;;  %v1197_v48 = vstv %s3455_s1 }
 0x3a5   :  { %s3486_s24 = sld [smem:[#allocation3 + $0xf04]]  ;;  %v1199_v52 = vstv %s3461_s10  ;;  %v1198_v57 = vsel %vm1196_vm4, %v1197_v48, %v1173_v37 }
 0x3a6   :  { %v1140_v62 = vstv %s4306_s9  ;;  %s3495_s2 = sld [smem:[#allocation3 + $0xf05]]  ;;  %v1200_v61 = vsel %vm1196_vm4, %v1199_v52, %v1175_v38 }
 0x3a7   :  { %s4307_s8 = sld [smem:[#allocation114_spill]]  ;;  %v1141_v6 = vsel %vm1121_vm1, %v1140_v62, %v1116_v47  ;;  %v1185_v47 = vsel %vm1171_vm3, %v1184_v36, %v1160_v22 }
 0x3a8   :  { %v1138_v54 = vstv %s4305_s29  ;;  %s3503_s11 = sld [smem:[#allocation3 + $0xf06]] }
 0x3a9   :  { %v1139_v0 = vsel %vm1121_vm1, %v1138_v54, %v1114_v40  ;;  %s4308_s28 = sld [smem:[#allocation115_spill]]  ;;  %v1186_v40 = vstv %s3413_s3  ;;  %v1194_v54 = vstv %s3448_s21  ;;  %v1201_v55 = vstv %s3468_s14 }
 0x3aa   :  { %s3509_s13 = sld [smem:[#allocation3 + $0xf07]]  ;;  %v1203_v56 = vstv %s3476_s0 }
 0x3ab   :  { %s4309_s18 = sld [smem:[#allocation116_spill]]  ;;  %v1205_v58 = vstv %s3486_s24 }
 0x3ac   :  { %s3516_s20 = sld [smem:[#allocation3 + $0xf08]]  ;;  %v1207_v62 = vstv %s3495_s2 }
 0x3ad   :  { %v1161_v13 = vstv %s4307_s8  ;;  %s3524_s17 = sld [smem:[#allocation3 + $0xf09]]  ;;  %v1208_v8 = vsel %vm1196_vm4, %v1207_v62, %v1183_v46 }
 0x3ae   :  { %s3533_s26 = sld [smem:[#allocation3 + $0xf0a]]  ;;  %v1162_v23 = vsel %vm1146_vm2, %v1161_v13, %v1137_v63  ;;  %v1209_v5 = vstv %s3503_s11 }
 0x3af   :  { %v1163_v17 = vstv %s4308_s28  ;;  %s4310_s16 = sld [smem:[#allocation117_spill]]  ;;  %v1187_v49 = vsel %vm1171_vm3, %v1186_v40, %v1162_v23  ;;  %v1210_v15 = vsel %vm1196_vm4, %v1209_v5, %v1185_v47 }
 0x3b0   :  { %s4311_s23 = sld [smem:[#allocation118_spill]]  ;;  %v1164_v26 = vsel %vm1146_vm2, %v1163_v17, %v1139_v0  ;;  %v1195_v0 = vsel %vm1171_vm3, %v1194_v54, %v1170_v34  ;;  %v1211_v9 = vstv %s3509_s13 }
 0x3b1   :  { %s4312_s19 = sld [smem:[#allocation119_spill]]  ;;  %v1165_v21 = vstv %s4309_s18 }
 0x3b2   :  { %s3542_s4 = sld [smem:[#allocation3 + $0xf0b]]  ;;  %v1166_v29 = vsel %vm1146_vm2, %v1165_v21, %v1141_v6  ;;  %v1213_v12 = vstv %s3516_s20 }
 0x3b3   :  { %s3550_s25 = sld [smem:[#allocation3 + $0xf80]] }
 0x3b4   :  { %s4313_s22 = sld [smem:[#allocation120_spill]]  ;;  %v1217_v20 = vstv %s3533_s26 }
 0x3b5   :  { %s3557_s29 = sld [smem:[#allocation3 + $0xf81]]  ;;  %v1176_v30 = vstv %s4310_s16 }
 0x3b6   :  { %v1178_v31 = vstv %s4311_s23  ;;  %s4314_s15 = sld [smem:[#allocation121_spill]]  ;;  %v1177_v42 = vsel %vm1171_vm3, %v1176_v30, %v1152_v16  ;;  %v1215_v16 = vstv %s3524_s17 }
 0x3b7   :  { %v1180_v32 = vstv %s4312_s19  ;;  %s3564_s6 = sld [smem:[#allocation3 + $0xf82]]  ;;  %v1179_v43 = vsel %vm1171_vm3, %v1178_v31, %v1154_v18  ;;  %v1202_v1 = vsel %vm1196_vm4, %v1201_v55, %v1177_v42 }
 0x3b8   :  { %s3572_s27 = sld [smem:[#allocation3 + $0xf83]]  ;;  %v1181_v44 = vsel %vm1171_vm3, %v1180_v32, %v1156_v19  ;;  %v1204_v2 = vsel %vm1196_vm4, %v1203_v56, %v1179_v43  ;;  %v1212_v19 = vsel %vm1196_vm4, %v1211_v9, %v1187_v49  ;;  %v1219_v24 = vstv %s3542_s4 }
 0x3b9   :  { %s4315_s5 = sld [smem:[#allocation122_spill]]  ;;  %v1222_v59 = vstv %s3550_s25  ;;  %v1206_v4 = vsel %vm1196_vm4, %v1205_v58, %v1181_v44 }
 0x3ba   :  { %v1188_v41 = vstv %s4313_s22  ;;  %s3580_s7 = sld [smem:[#allocation3 + $0xf84]]  ;;  %v1223_v6 = vsel %vm1221_vm5, %v1222_v59, %v1198_v57 }
 0x3bb   :  { %s3589_s30 = sld [smem:[#allocation3 + $0xf85]]  ;;  %v1189_v50 = vsel %vm1171_vm3, %v1188_v41, %v1164_v26  ;;  %v1224_v63 = vstv %s3557_s29 }
 0x3bc   :  { %v1190_v45 = vstv %s4314_s15  ;;  %s3597_s3 = sld [smem:[#allocation3 + $0xf86]]  ;;  %v1225_v10 = vsel %vm1221_vm5, %v1224_v63, %v1200_v61  ;;  %v1214_v23 = vsel %vm1196_vm4, %v1213_v12, %v1189_v50 }
 0x3bd   :  { %s3605_s12 = sld [smem:[#allocation3 + $0xf87]]  ;;  %v1191_v53 = vsel %vm1171_vm3, %v1190_v45, %v1166_v29  ;;  %v1226_v3 = vstv %s3564_s6 }
 0x3be   :  { %s3612_s1 = sld [smem:[#allocation3 + $0xf88]]  ;;  %v1228_v7 = vstv %s3572_s27  ;;  %v1227_v13 = vsel %vm1221_vm5, %v1226_v3, %v1202_v1  ;;  %v1216_v27 = vsel %vm1196_vm4, %v1215_v16, %v1191_v53 }
 0x3bf   :  { %v1192_v51 = vstv %s4315_s5  ;;  %s3619_s10 = sld [smem:[#allocation3 + $0xf89]]  ;;  %v1229_v17 = vsel %vm1221_vm5, %v1228_v7, %v1204_v2 }
 0x3c0   :  { %v1193_v60 = vsel %vm1171_vm3, %v1192_v51, %v1168_v33  ;;  %s3627_s21 = sld [smem:[#allocation3 + $0xf8a]]  ;;  %v1230_v11 = vstv %s3580_s7  ;;  %v1220_v33 = vsel %vm1196_vm4, %v1219_v24, %v1195_v0 }
 0x3c1   :  { %s3636_s9 = sld [smem:[#allocation3 + $0xf8b]]  ;;  %v1232_v14 = vstv %s3589_s30  ;;  %v1231_v21 = vsel %vm1221_vm5, %v1230_v11, %v1206_v4  ;;  %v1218_v30 = vsel %vm1196_vm4, %v1217_v20, %v1193_v60 }
 0x3c2   :  { %v1234_v18 = vstv %s3597_s3  ;;  %s4316_s24 = sld [smem:[#allocation174_spill]]  ;;  %v1233_v25 = vsel %vm1221_vm5, %v1232_v14, %v1208_v8 }
 0x3c3   :  { %v1236_v22 = vstv %s3605_s12  ;;  %v1235_v28 = vsel %vm1221_vm5, %v1234_v18, %v1210_v15 }
 0x3c4   :  { %v1238_v26 = vstv %s3612_s1  ;;  %v1237_v31 = vsel %vm1221_vm5, %v1236_v22, %v1212_v19 }
 0x3c5   :  { %v1240_v29 = vstv %s3619_s10  ;;  %v1239_v34 = vsel %vm1221_vm5, %v1238_v26, %v1214_v23 }
 0x3c6   :  { %v1242_v32 = vstv %s3627_s21  ;;  %v1241_v36 = vsel %vm1221_vm5, %v1240_v29, %v1216_v27 }
 0x3c7   :  { %v1244_v35 = vstv %s3636_s9  ;;  %v1243_v37 = vsel %vm1221_vm5, %v1242_v32, %v1218_v30 }
 0x3c8   :  { %1247 = vst.msk [vmem:[%s4316_s24] sm:$0xff] %vm1246_vm6, %v1223_v6  ;;  %v1245_v38 = vsel %vm1221_vm5, %v1244_v35, %v1220_v33 }
 0x3c9   :  { %1680 = vst.msk [vmem:[%s4316_s24 + $0x8] sm:$0xff] %vm1246_vm6, %v1225_v10 }
 0x3ca   :  { %1681 = vst.msk [vmem:[%s4316_s24 + $0x10] sm:$0xff] %vm1246_vm6, %v1227_v13 }
 0x3cb   :  { %1682 = vst.msk [vmem:[%s4316_s24 + $0x18] sm:$0xff] %vm1246_vm6, %v1229_v17 }
 0x3cc   :  { %1683 = vst.msk [vmem:[%s4316_s24 + $0x20] sm:$0xff] %vm1246_vm6, %v1231_v21 }
 0x3cd   :  { %1684 = vst.msk [vmem:[%s4316_s24 + $0x28] sm:$0xff] %vm1246_vm6, %v1233_v25 }
 0x3ce   :  { %1685 = vst.msk [vmem:[%s4316_s24 + $0x30] sm:$0xff] %vm1246_vm6, %v1235_v28 }
 0x3cf   :  { %1686 = vst.msk [vmem:[%s4316_s24 + $0x38] sm:$0xff] %vm1246_vm6, %v1237_v31 }
 0x3d0   :  { %1687 = vst.msk [vmem:[%s4316_s24 + $0x40] sm:$0xff] %vm1246_vm6, %v1239_v34 }
 0x3d1   :  { %1688 = vst.msk [vmem:[%s4316_s24 + $0x48] sm:$0xff] %vm1246_vm6, %v1241_v36 }
 0x3d2   :  { %1689 = vst.msk [vmem:[%s4316_s24 + $0x50] sm:$0xff] %vm1246_vm6, %v1243_v37 }
 0x3d3   :  { %1690 = vst.msk [vmem:[%s4316_s24 + $0x58] sm:$0xff] %vm1246_vm6, %v1245_v38 }
 0x3d4   :  { %1285 = vsyncpa [#allocation4], 1 }

</bundles_post_ra>
